<compile_context>
chip_gen: v7x
topology: tpu7x:2x2x1
jax: 0.10.0
libtpu: 0.0.40
codegen_flags: <defaults>
</compile_context>

<pallas_src>
import functools

import jax
import jax.numpy as jnp
import numpy as np
from jax.experimental import pallas as pl
from jax.experimental.pallas import tpu as pltpu


def _round_up(x, m):
    return (x + m - 1) // m * m


# ----------------------------- Pallas kernel ------------------------------- #
def _make_gru_kernel(tc, h_pad, b_pad, seq_len, unroll):
    """Fused recurrent GRU kernel. Grid axis = time chunks (sequential).

    x_ref    : (tc, b_pad, d_pad)   time-major input chunk
    wih_ref  : (d_pad, 3*H_pad)     fused input->hidden weights  [r|z|n]
    whh_ref  : (h_pad, 3*H_pad)     fused hidden->hidden weights [r|z|n]
    bx_ref   : (1, 3*H_pad)         folded biases [b_ir+b_hr | b_iz+b_hz | b_in]
    bhn_ref  : (1, h_pad)           hidden bias of the n gate (inside r*(...))
    wlin_ref : (1, h_pad)           Linear(hidden, 1) weight row
    h0_ref   : (b_pad, h_pad)       initial hidden state z
    xr_ref   : (b_pad, tc)          X_right slab for this chunk (time on lanes)
    hfin_ref : (b_pad, h_pad)       final hidden state h_{T-1}
    h_ref    : (b_pad, h_pad)       VMEM scratch carrying h across chunks
    """

    def kernel(x_ref, wih_ref, whh_ref, bx_ref, bhn_ref, wlin_ref, h0_ref,
               xr_ref, hfin_ref, h_ref):
        @pl.when(pl.program_id(0) == 0)
        def _():
            h_ref[...] = h0_ref[...]

        # Time-invariant operands (and their sublane broadcasts) hoisted out of
        # the unrolled step loop -- JAX does not CSE broadcast_in_dim.
        wih = wih_ref[...]
        whh = whh_ref[...]
        bx = jnp.broadcast_to(bx_ref[...], (b_pad, 3 * h_pad))
        bhn = jnp.broadcast_to(bhn_ref[...], (b_pad, h_pad))
        wlin = jnp.broadcast_to(wlin_ref[...], (b_pad, h_pad))
        lane = jax.lax.broadcasted_iota(jnp.int32, (1, tc), 1)
        t_base = pl.program_id(0) * tc

        def step(i, carry):
            h, xr = carry
            # Fused input projection: streams only the D-wide X chunk from HBM
            # instead of a precomputed 3*H_pad-wide gate tensor.
            gx = jnp.dot(x_ref[i], wih, preferred_element_type=jnp.float32) + bx
            gh = jnp.dot(h, whh, preferred_element_type=jnp.float32)
            r = jax.nn.sigmoid(gx[:, :h_pad] + gh[:, :h_pad])
            z = jax.nn.sigmoid(gx[:, h_pad:2 * h_pad] + gh[:, h_pad:2 * h_pad])
            n = jnp.tanh(gx[:, 2 * h_pad:] + r * (gh[:, 2 * h_pad:] + bhn))
            h_new = n + z * (h - n)          # == (1 - z) * n + z * h
            # Freeze h on padded timesteps (t >= T) so the carried state and the
            # final-hidden output stay exact.
            keep = (t_base + i < seq_len).astype(jnp.float32)
            h_new = h + keep * (h_new - h)
            # Fused output head Linear(hidden, 1): lane-reduce, then scatter the
            # scalar-per-row into lane i of the (b_pad, tc) X_right slab.
            col = jnp.sum(h_new * wlin, axis=-1, keepdims=True)    # (b_pad, 1)
            onehot = (lane == i).astype(jnp.float32)                # (1, tc)
            xr = xr + col * onehot   # each lane written exactly once per chunk
            return h_new, xr

        h, xr = jax.lax.fori_loop(
            0, tc, step,
            (h_ref[...], jnp.zeros((b_pad, tc), jnp.float32)),
            unroll=unroll)
        h_ref[...] = h            # carry hidden state to the next time chunk
        xr_ref[...] = xr          # lane-dense per-chunk X_right block

        @pl.when(pl.program_id(0) == pl.num_programs(0) - 1)
        def _():
            hfin_ref[...] = h     # == h_{T-1} thanks to the padded-step freeze

    return kernel


# ----------------------- parameter packing for the kernel ------------------- #
def _pack_params(w_ih, w_hh, b_ih, b_hh, w_lin, d_pad, h_pad):
    """PyTorch-layout GRU params -> fused / padded kernel layout.

    w_ih: (3H, D)  w_hh: (3H, H)  b_ih, b_hh: (3H,)  w_lin: (1, H).
    Zero padding keeps the padded hidden/input dims inert.
    """
    H = w_hh.shape[1]
    D = w_ih.shape[1]
    hp = h_pad - H
    dp = d_pad - D

    def gsplit(a):
        return a[0:H], a[H:2 * H], a[2 * H:3 * H]

    wir, wiz, win = gsplit(w_ih)
    whr, whz, whn = gsplit(w_hh)
    bir, biz, bin_ = gsplit(b_ih)
    bhr, bhz, bhn = gsplit(b_hh)

    def pad_ih(m):                        # (H, D) -> (d_pad, h_pad), transposed
        return jnp.pad(m.T, ((0, dp), (0, hp)))

    def pad_hh(m):                        # (H, H) -> (h_pad, h_pad), transposed
        return jnp.pad(m.T, ((0, hp), (0, hp)))

    def pad_vec(v):                       # (H,) -> (h_pad,)
        return jnp.pad(v, (0, hp))

    wih_cat = jnp.concatenate([pad_ih(wir), pad_ih(wiz), pad_ih(win)], axis=1)
    whh_cat = jnp.concatenate([pad_hh(whr), pad_hh(whz), pad_hh(whn)], axis=1)
    b_x = jnp.concatenate(
        [pad_vec(bir + bhr), pad_vec(biz + bhz), pad_vec(bin_)]
    ).reshape(1, 3 * h_pad)
    b_hn = pad_vec(bhn).reshape(1, h_pad)
    w_lin_row = jnp.pad(w_lin, ((0, 0), (0, hp)))            # (1, h_pad)
    return wih_cat, whh_cat, b_x, b_hn, w_lin_row


# --------------------------------- forward --------------------------------- #
@functools.partial(jax.jit, static_argnames=("tc", "single_buffer_weights"))
def gru_forward(X, z, params, *, tc=128, single_buffer_weights=True):
    """Replicates GRU.forward(X, z, mode='train').

    X: (B, T, num_series) batch_first.  z: (1, B, hidden) initial hidden state.
    Returns (X_right (B, T, 1), hidden_out (1, B, hidden)).
    """
    w_ih, w_hh, b_ih, b_hh, w_lin, b_lin = params
    B, T, D = X.shape
    H = w_hh.shape[1]
    h_pad = _round_up(H, 128)            # lanes
    d_pad = _round_up(D, 128)            # lanes (input projection K dim)
    b_pad = _round_up(max(B, 8), 8)      # sublanes

    # Time-chunk size: a single full-dim chunk for short sequences, otherwise a
    # multiple of 128 so the (b_pad, tc) X_right blocks are lane-dense
    # (unmasked vst).  Large tc amortizes the ~0.35us per-grid-step overhead.
    if T <= tc:
        tc = T
    else:
        tc = _round_up(tc, 128)
    t_pad = _round_up(T, tc)
    unroll = max(1, min(8, tc))          # partial unroll bounds vreg live ranges

    wih_cat, whh_cat, b_x, b_hn, w_lin_row = _pack_params(
        w_ih, w_hh, b_ih, b_hh, w_lin, d_pad, h_pad)

    # X is only D-wide, tiny next to the 3*H_pad-wide gate stream the previous
    # version materialized in HBM, so this pad + time-major transpose is
    # negligible.  No gates_x intermediate (and no extra pad pass) exists.
    x_tm = jnp.transpose(
        jnp.pad(X, ((0, b_pad - B), (0, t_pad - T), (0, d_pad - D))),
        (1, 0, 2))                                           # (t_pad, b_pad, d_pad)
    h0 = jnp.pad(z[0], ((0, b_pad - B), (0, h_pad - H)))     # (b_pad, h_pad)

    # Time-invariant operands: constant index_map => DMA'd once; Buffered(1)
    # drops the default double-buffer so their VMEM footprint is halved
    # (critical for large H on v7x's 64 MiB VMEM / v6e's 32 MiB scoped default).
    const = {"pipeline_mode": pl.Buffered(1)} if single_buffer_weights else {}

    xr, h_fin = pl.pallas_call(
        _make_gru_kernel(tc, h_pad, b_pad, T, unroll),
        out_shape=(jax.ShapeDtypeStruct((b_pad, t_pad), jnp.float32),
                   jax.ShapeDtypeStruct((b_pad, h_pad), jnp.float32)),
        grid_spec=pltpu.PrefetchScalarGridSpec(
            num_scalar_prefetch=0,
            grid=(t_pad // tc,),
            in_specs=[
                pl.BlockSpec((tc, b_pad, d_pad), lambda c: (c, 0, 0)),         # X
                pl.BlockSpec((d_pad, 3 * h_pad), lambda c: (0, 0), **const),   # W_ih
                pl.BlockSpec((h_pad, 3 * h_pad), lambda c: (0, 0), **const),   # W_hh
                pl.BlockSpec((1, 3 * h_pad), lambda c: (0, 0), **const),       # b_x
                pl.BlockSpec((1, h_pad), lambda c: (0, 0), **const),           # b_hn
                pl.BlockSpec((1, h_pad), lambda c: (0, 0), **const),           # w_lin
                pl.BlockSpec((b_pad, h_pad), lambda c: (0, 0), **const),       # h0
            ],
            out_specs=[
                pl.BlockSpec((b_pad, tc), lambda c: (0, c)),      # X_right slab
                pl.BlockSpec((b_pad, h_pad), lambda c: (0, 0)),   # final hidden
            ],
            scratch_shapes=[pltpu.VMEM((b_pad, h_pad), jnp.float32)],
        ),
        # Time must stay sequential: the VMEM scratch carries h across chunks.
        compiler_params=pltpu.CompilerParams(dimension_semantics=("arbitrary",)),
    )(x_tm, wih_cat, whh_cat, b_x, b_hn, w_lin_row, h0)

    X_right = xr[:B, :T][..., None] + b_lin         # (B, T, 1), batch_first
    hidden_out = h_fin[:B, :H][None]                # (1, B, H)
    return X_right, hidden_out


# ------------------------- deterministic param init ------------------------ #
def init_params(key, num_series, hidden):
    """PyTorch-layout params. GRU: U(-1/sqrt(H), 1/sqrt(H)); Linear likewise."""
    k = 1.0 / np.sqrt(hidden)
    keys = jax.random.split(key, 6)
    w_ih = jax.random.uniform(keys[0], (3 * hidden, num_series), jnp.float32, -k, k)
    w_hh = jax.random.uniform(keys[1], (3 * hidden, hidden), jnp.float32, -k, k)
    b_ih = jax.random.uniform(keys[2], (3 * hidden,), jnp.float32, -k, k)
    b_hh = jax.random.uniform(keys[3], (3 * hidden,), jnp.float32, -k, k)
    w_lin = jax.random.uniform(keys[4], (1, hidden), jnp.float32, -k, k)
    b_lin = jax.random.uniform(keys[5], (1,), jnp.float32, -k, k)
    return (w_ih, w_hh, b_ih, b_hh, w_lin, b_lin)


# ----------------------------- pure-JAX reference --------------------------- #
def gru_reference(X, z, params):
    w_ih, w_hh, b_ih, b_hh, w_lin, b_lin = params
    H = w_hh.shape[1]

    def step(h, x_t):
        gi = x_t @ w_ih.T + b_ih
        gh = h @ w_hh.T + b_hh
        r = jax.nn.sigmoid(gi[:, :H] + gh[:, :H])
        zz = jax.nn.sigmoid(gi[:, H:2 * H] + gh[:, H:2 * H])
        n = jnp.tanh(gi[:, 2 * H:] + r * gh[:, 2 * H:])
        h_new = (1.0 - zz) * n + zz * h
        return h_new, h_new

    h_last, outs = jax.lax.scan(step, z[0], jnp.transpose(X, (1, 0, 2)))
    gru_out = jnp.transpose(outs, (1, 0, 2))                       # (B, T, H)
    X_right = gru_out @ w_lin.T + b_lin                            # (B, T, 1)
    return X_right, h_last[None]


# ---------------------------------- main ----------------------------------- #
if __name__ == "__main__":
    num_series, hidden = 16, 32
    key = jax.random.PRNGKey(0)
    key, kp = jax.random.split(key)
    params = init_params(kp, num_series, hidden)

    def run(X, z0, tc):
        # Prefer single-buffered time-invariant weights (pl.Buffered(1)); fall
        # back to default double-buffering if this jax build rejects it.
        try:
            out = gru_forward(X, z0, params, tc=tc, single_buffer_weights=True)
            return jax.block_until_ready(out)
        except Exception:
            out = gru_forward(X, z0, params, tc=tc, single_buffer_weights=False)
            return jax.block_until_ready(out)

    # (a) tiny sequence: single full-dim chunk, grid=(1,)
    # (b) longer sequence: grid=(2,), lane-dense (b_pad, 128) X_right blocks,
    #     exercises the cross-chunk hidden-state carry and partial unroll.
    for (B, T, tc) in [(2, 8, 128), (2, 256, 128)]:
        key, kx, kz = jax.random.split(key, 3)
        X = jax.random.normal(kx, (B, T, num_series), jnp.float32)
        z0 = 0.1 * jax.random.normal(kz, (1, B, hidden), jnp.float32)

        X_right, hidden_out = run(X, z0, tc)
        X_right_ref, hidden_ref = gru_reference(X, z0, params)

        np.testing.assert_allclose(np.asarray(X_right), np.asarray(X_right_ref),
                                   atol=2e-4, rtol=2e-4)
        np.testing.assert_allclose(np.asarray(hidden_out), np.asarray(hidden_ref),
                                   atol=2e-4, rtol=2e-4)
        assert X_right.shape == (B, T, 1)
        assert hidden_out.shape == (1, B, hidden)

    print("KERNEL_OK")
</pallas_src>

<mosaic_0001>
module attributes {stable_mosaic.version = 11 : i64} {
  func.func @kernel(%arg0: i32, %arg1: memref<8x8x128xf32, #tpu.memory_space<vmem>>, %arg2: memref<128x384xf32, #tpu.memory_space<vmem>>, %arg3: memref<128x384xf32, #tpu.memory_space<vmem>>, %arg4: memref<1x384xf32, #tpu.memory_space<vmem>>, %arg5: memref<1x128xf32, #tpu.memory_space<vmem>>, %arg6: memref<1x128xf32, #tpu.memory_space<vmem>>, %arg7: memref<8x128xf32, #tpu.memory_space<vmem>>, %arg8: memref<8x8xf32, #tpu.memory_space<vmem>>, %arg9: memref<8x128xf32, #tpu.memory_space<vmem>>, %arg10: memref<8x128xf32, #tpu.memory_space<vmem>>) attributes {dimension_semantics = [#tpu.dimension_semantics<arbitrary>], iteration_bounds = array<i64: 1>, scalar_prefetch = 0 : i64, scratch_operands = 1 : i64, tpu.core_type = #tpu.core_type<tc>, window_params = [{transform_indices = @transform_0, window_bounds = array<i64: 8, 8, 128>}, {pipeline_mode = #tpu.pipeline_mode<synchronous>, transform_indices = @transform_1, window_bounds = array<i64: 128, 384>}, {pipeline_mode = #tpu.pipeline_mode<synchronous>, transform_indices = @transform_2, window_bounds = array<i64: 128, 384>}, {pipeline_mode = #tpu.pipeline_mode<synchronous>, transform_indices = @transform_3, window_bounds = array<i64: 1, 384>}, {pipeline_mode = #tpu.pipeline_mode<synchronous>, transform_indices = @transform_4, window_bounds = array<i64: 1, 128>}, {pipeline_mode = #tpu.pipeline_mode<synchronous>, transform_indices = @transform_5, window_bounds = array<i64: 1, 128>}, {pipeline_mode = #tpu.pipeline_mode<synchronous>, transform_indices = @transform_6, window_bounds = array<i64: 8, 128>}, {transform_indices = @transform_7, window_bounds = array<i64: 8, 8>}, {pipeline_mode = #tpu.pipeline_mode<synchronous>, transform_indices = @transform_8, window_bounds = array<i64: 8, 128>}]} {
    %c0_i32 = arith.constant 0 : i32
    %0 = arith.cmpi eq, %arg0, %c0_i32 : i32
    %1 = arith.extui %0 : i1 to i32
    %c0_i32_0 = arith.constant 0 : i32
    %2 = arith.cmpi ne, %1, %c0_i32_0 : i32
    scf.if %2 {
      %c0_84 = arith.constant 0 : index
      %c0_85 = arith.constant 0 : index
      %423 = vector.load %arg7[%c0_84, %c0_85] : memref<8x128xf32, #tpu.memory_space<vmem>>, vector<8x128xf32>
      %c0_86 = arith.constant 0 : index
      %c0_87 = arith.constant 0 : index
      %424 = vector.load %arg10[%c0_86, %c0_87] : memref<8x128xf32, #tpu.memory_space<vmem>>, vector<8x128xf32>
      tpu.vector_store %arg10[%c0_86, %c0_87], %423 {strides = array<i32>} : memref<8x128xf32, #tpu.memory_space<vmem>>, vector<8x128xf32>,
    } else {
    }
    %c0 = arith.constant 0 : index
    %c0_1 = arith.constant 0 : index
    %3 = vector.load %arg2[%c0, %c0_1] : memref<128x384xf32, #tpu.memory_space<vmem>>, vector<128x384xf32>
    %c0_2 = arith.constant 0 : index
    %c0_3 = arith.constant 0 : index
    %4 = vector.load %arg3[%c0_2, %c0_3] : memref<128x384xf32, #tpu.memory_space<vmem>>, vector<128x384xf32>
    %c0_4 = arith.constant 0 : index
    %c0_5 = arith.constant 0 : index
    %5 = vector.load %arg4[%c0_4, %c0_5] : memref<1x384xf32, #tpu.memory_space<vmem>>, vector<1x384xf32>
    %6 = vector.shape_cast %5 : vector<1x384xf32> to vector<1x384xf32>
    %7 = vector.broadcast %6 : vector<1x384xf32> to vector<8x384xf32>
    %c0_6 = arith.constant 0 : index
    %c0_7 = arith.constant 0 : index
    %8 = vector.load %arg5[%c0_6, %c0_7] : memref<1x128xf32, #tpu.memory_space<vmem>>, vector<1x128xf32>
    %9 = vector.shape_cast %8 : vector<1x128xf32> to vector<1x128xf32>
    %10 = vector.broadcast %9 : vector<1x128xf32> to vector<8x128xf32>
    %c0_8 = arith.constant 0 : index
    %c0_9 = arith.constant 0 : index
    %11 = vector.load %arg6[%c0_8, %c0_9] : memref<1x128xf32, #tpu.memory_space<vmem>>, vector<1x128xf32>
    %12 = vector.shape_cast %11 : vector<1x128xf32> to vector<1x128xf32>
    %13 = vector.broadcast %12 : vector<1x128xf32> to vector<8x128xf32>
    %14 = tpu.iota {dimensions = array<i32: 1>} : vector<1x8xi32>
    %c8_i32 = arith.constant 8 : i32
    %15 = arith.muli %arg0, %c8_i32 : i32
    %c0_10 = arith.constant 0 : index
    %c0_11 = arith.constant 0 : index
    %16 = vector.load %arg10[%c0_10, %c0_11] : memref<8x128xf32, #tpu.memory_space<vmem>>, vector<8x128xf32>
    %cst = arith.constant 0.000000e+00 : f32
    %17 = vector.broadcast %cst : f32 to vector<8x8xf32>
    %c0_i32_12 = arith.constant 0 : i32
    %18 = arith.index_cast %c0_i32_12 : i32 to index
    %c0_13 = arith.constant 0 : index
    %c0_14 = arith.constant 0 : index
    %19 = vector.load %arg1[%18, %c0_13, %c0_14] : memref<8x8x128xf32, #tpu.memory_space<vmem>>, vector<1x8x128xf32>
    %20 = vector.shape_cast %19 : vector<1x8x128xf32> to vector<8x128xf32>
    %cst_15 = arith.constant dense<0.000000e+00> : vector<8x384xf32>
    %21 = tpu.matmul %20, %3, %cst_15 {dimension_numbers = #tpu.dot_dimension_numbers<[1], [0], [0], [1], [0, 0, 1, 1], [], []>} : vector<8x128xf32>, vector<128x384xf32>, vector<8x384xf32> -> vector<8x384xf32>
    %22 = arith.addf %21, %7 : vector<8x384xf32>
    %cst_16 = arith.constant dense<0.000000e+00> : vector<8x384xf32>
    %23 = tpu.matmul %16, %4, %cst_16 {dimension_numbers = #tpu.dot_dimension_numbers<[1], [0], [0], [1], [0, 0, 1, 1], [], []>} : vector<8x128xf32>, vector<128x384xf32>, vector<8x384xf32> -> vector<8x384xf32>
    %24 = vector.extract_strided_slice %22 {offsets = [0, 0], sizes = [8, 128], strides = [1, 1]} : vector<8x384xf32> to vector<8x128xf32>
    %25 = vector.extract_strided_slice %23 {offsets = [0, 0], sizes = [8, 128], strides = [1, 1]} : vector<8x384xf32> to vector<8x128xf32>
    %26 = arith.addf %24, %25 : vector<8x128xf32>
    %27 = arith.negf %26 : vector<8x128xf32>
    %28 = math.exp %27 : vector<8x128xf32>
    %cst_17 = arith.constant 1.000000e+00 : f32
    %29 = vector.broadcast %cst_17 : f32 to vector<8x128xf32>
    %30 = arith.addf %29, %28 : vector<8x128xf32>
    %31 = arith.divf %29, %30 : vector<8x128xf32>
    %32 = vector.extract_strided_slice %22 {offsets = [0, 128], sizes = [8, 128], strides = [1, 1]} : vector<8x384xf32> to vector<8x128xf32>
    %33 = vector.extract_strided_slice %23 {offsets = [0, 128], sizes = [8, 128], strides = [1, 1]} : vector<8x384xf32> to vector<8x128xf32>
    %34 = arith.addf %32, %33 : vector<8x128xf32>
    %35 = arith.negf %34 : vector<8x128xf32>
    %36 = math.exp %35 : vector<8x128xf32>
    %cst_18 = arith.constant 1.000000e+00 : f32
    %37 = vector.broadcast %cst_18 : f32 to vector<8x128xf32>
    %38 = arith.addf %37, %36 : vector<8x128xf32>
    %39 = arith.divf %37, %38 : vector<8x128xf32>
    %40 = vector.extract_strided_slice %22 {offsets = [0, 256], sizes = [8, 128], strides = [1, 1]} : vector<8x384xf32> to vector<8x128xf32>
    %41 = vector.extract_strided_slice %23 {offsets = [0, 256], sizes = [8, 128], strides = [1, 1]} : vector<8x384xf32> to vector<8x128xf32>
    %42 = arith.addf %41, %10 : vector<8x128xf32>
    %43 = arith.mulf %31, %42 : vector<8x128xf32>
    %44 = arith.addf %40, %43 : vector<8x128xf32>
    %45 = math.tanh %44 : vector<8x128xf32>
    %46 = arith.subf %16, %45 : vector<8x128xf32>
    %47 = arith.mulf %39, %46 : vector<8x128xf32>
    %48 = arith.addf %45, %47 : vector<8x128xf32>
    %49 = arith.addi %15, %c0_i32_12 : i32
    %c8_i32_19 = arith.constant 8 : i32
    %50 = arith.cmpi slt, %49, %c8_i32_19 : i32
    %51 = arith.extui %50 : i1 to i32
    %52 = arith.sitofp %51 : i32 to f32
    %53 = arith.subf %48, %16 : vector<8x128xf32>
    %54 = vector.broadcast %52 : f32 to vector<8x128xf32>
    %55 = arith.mulf %54, %53 : vector<8x128xf32>
    %56 = arith.addf %16, %55 : vector<8x128xf32>
    %57 = arith.mulf %56, %13 : vector<8x128xf32>
    %cst_20 = arith.constant dense<0.000000e+00> : vector<8xf32>
    %58 = vector.multi_reduction <add>, %57, %cst_20 [1] : vector<8x128xf32> to vector<8xf32>
    %59 = vector.shape_cast %58 : vector<8xf32> to vector<8x1xf32>
    %60 = vector.broadcast %c0_i32_12 : i32 to vector<1x8xi32>
    %61 = arith.cmpi eq, %14, %60 : vector<1x8xi32>
    %62 = arith.extui %61 : vector<1x8xi1> to vector<1x8xi32>
    %63 = arith.sitofp %62 : vector<1x8xi32> to vector<1x8xf32>
    %64 = vector.broadcast %59 : vector<8x1xf32> to vector<8x8xf32>
    %65 = vector.broadcast %63 : vector<1x8xf32> to vector<8x8xf32>
    %66 = arith.mulf %64, %65 : vector<8x8xf32>
    %67 = arith.addf %17, %66 : vector<8x8xf32>
    %c1_i32 = arith.constant 1 : i32
    %68 = arith.index_cast %c1_i32 : i32 to index
    %c0_21 = arith.constant 0 : index
    %c0_22 = arith.constant 0 : index
    %69 = vector.load %arg1[%68, %c0_21, %c0_22] : memref<8x8x128xf32, #tpu.memory_space<vmem>>, vector<1x8x128xf32>
    %70 = vector.shape_cast %69 : vector<1x8x128xf32> to vector<8x128xf32>
    %cst_23 = arith.constant dense<0.000000e+00> : vector<8x384xf32>
    %71 = tpu.matmul %70, %3, %cst_23 {dimension_numbers = #tpu.dot_dimension_numbers<[1], [0], [0], [1], [0, 0, 1, 1], [], []>} : vector<8x128xf32>, vector<128x384xf32>, vector<8x384xf32> -> vector<8x384xf32>
    %72 = arith.addf %71, %7 : vector<8x384xf32>
    %cst_24 = arith.constant dense<0.000000e+00> : vector<8x384xf32>
    %73 = tpu.matmul %56, %4, %cst_24 {dimension_numbers = #tpu.dot_dimension_numbers<[1], [0], [0], [1], [0, 0, 1, 1], [], []>} : vector<8x128xf32>, vector<128x384xf32>, vector<8x384xf32> -> vector<8x384xf32>
    %74 = vector.extract_strided_slice %72 {offsets = [0, 0], sizes = [8, 128], strides = [1, 1]} : vector<8x384xf32> to vector<8x128xf32>
    %75 = vector.extract_strided_slice %73 {offsets = [0, 0], sizes = [8, 128], strides = [1, 1]} : vector<8x384xf32> to vector<8x128xf32>
    %76 = arith.addf %74, %75 : vector<8x128xf32>
    %77 = arith.negf %76 : vector<8x128xf32>
    %78 = math.exp %77 : vector<8x128xf32>
    %cst_25 = arith.constant 1.000000e+00 : f32
    %79 = vector.broadcast %cst_25 : f32 to vector<8x128xf32>
    %80 = arith.addf %79, %78 : vector<8x128xf32>
    %81 = arith.divf %79, %80 : vector<8x128xf32>
    %82 = vector.extract_strided_slice %72 {offsets = [0, 128], sizes = [8, 128], strides = [1, 1]} : vector<8x384xf32> to vector<8x128xf32>
    %83 = vector.extract_strided_slice %73 {offsets = [0, 128], sizes = [8, 128], strides = [1, 1]} : vector<8x384xf32> to vector<8x128xf32>
    %84 = arith.addf %82, %83 : vector<8x128xf32>
    %85 = arith.negf %84 : vector<8x128xf32>
    %86 = math.exp %85 : vector<8x128xf32>
    %cst_26 = arith.constant 1.000000e+00 : f32
    %87 = vector.broadcast %cst_26 : f32 to vector<8x128xf32>
    %88 = arith.addf %87, %86 : vector<8x128xf32>
    %89 = arith.divf %87, %88 : vector<8x128xf32>
    %90 = vector.extract_strided_slice %72 {offsets = [0, 256], sizes = [8, 128], strides = [1, 1]} : vector<8x384xf32> to vector<8x128xf32>
    %91 = vector.extract_strided_slice %73 {offsets = [0, 256], sizes = [8, 128], strides = [1, 1]} : vector<8x384xf32> to vector<8x128xf32>
    %92 = arith.addf %91, %10 : vector<8x128xf32>
    %93 = arith.mulf %81, %92 : vector<8x128xf32>
    %94 = arith.addf %90, %93 : vector<8x128xf32>
    %95 = math.tanh %94 : vector<8x128xf32>
    %96 = arith.subf %56, %95 : vector<8x128xf32>
    %97 = arith.mulf %89, %96 : vector<8x128xf32>
    %98 = arith.addf %95, %97 : vector<8x128xf32>
    %99 = arith.addi %15, %c1_i32 : i32
    %c8_i32_27 = arith.constant 8 : i32
    %100 = arith.cmpi slt, %99, %c8_i32_27 : i32
    %101 = arith.extui %100 : i1 to i32
    %102 = arith.sitofp %101 : i32 to f32
    %103 = arith.subf %98, %56 : vector<8x128xf32>
    %104 = vector.broadcast %102 : f32 to vector<8x128xf32>
    %105 = arith.mulf %104, %103 : vector<8x128xf32>
    %106 = arith.addf %56, %105 : vector<8x128xf32>
    %107 = arith.mulf %106, %13 : vector<8x128xf32>
    %cst_28 = arith.constant dense<0.000000e+00> : vector<8xf32>
    %108 = vector.multi_reduction <add>, %107, %cst_28 [1] : vector<8x128xf32> to vector<8xf32>
    %109 = vector.shape_cast %108 : vector<8xf32> to vector<8x1xf32>
    %110 = vector.broadcast %c1_i32 : i32 to vector<1x8xi32>
    %111 = arith.cmpi eq, %14, %110 : vector<1x8xi32>
    %112 = arith.extui %111 : vector<1x8xi1> to vector<1x8xi32>
    %113 = arith.sitofp %112 : vector<1x8xi32> to vector<1x8xf32>
    %114 = vector.broadcast %109 : vector<8x1xf32> to vector<8x8xf32>
    %115 = vector.broadcast %113 : vector<1x8xf32> to vector<8x8xf32>
    %116 = arith.mulf %114, %115 : vector<8x8xf32>
    %117 = arith.addf %67, %116 : vector<8x8xf32>
    %c2_i32 = arith.constant 2 : i32
    %118 = arith.index_cast %c2_i32 : i32 to index
    %c0_29 = arith.constant 0 : index
    %c0_30 = arith.constant 0 : index
    %119 = vector.load %arg1[%118, %c0_29, %c0_30] : memref<8x8x128xf32, #tpu.memory_space<vmem>>, vector<1x8x128xf32>
    %120 = vector.shape_cast %119 : vector<1x8x128xf32> to vector<8x128xf32>
    %cst_31 = arith.constant dense<0.000000e+00> : vector<8x384xf32>
    %121 = tpu.matmul %120, %3, %cst_31 {dimension_numbers = #tpu.dot_dimension_numbers<[1], [0], [0], [1], [0, 0, 1, 1], [], []>} : vector<8x128xf32>, vector<128x384xf32>, vector<8x384xf32> -> vector<8x384xf32>
    %122 = arith.addf %121, %7 : vector<8x384xf32>
    %cst_32 = arith.constant dense<0.000000e+00> : vector<8x384xf32>
    %123 = tpu.matmul %106, %4, %cst_32 {dimension_numbers = #tpu.dot_dimension_numbers<[1], [0], [0], [1], [0, 0, 1, 1], [], []>} : vector<8x128xf32>, vector<128x384xf32>, vector<8x384xf32> -> vector<8x384xf32>
    %124 = vector.extract_strided_slice %122 {offsets = [0, 0], sizes = [8, 128], strides = [1, 1]} : vector<8x384xf32> to vector<8x128xf32>
    %125 = vector.extract_strided_slice %123 {offsets = [0, 0], sizes = [8, 128], strides = [1, 1]} : vector<8x384xf32> to vector<8x128xf32>
    %126 = arith.addf %124, %125 : vector<8x128xf32>
    %127 = arith.negf %126 : vector<8x128xf32>
    %128 = math.exp %127 : vector<8x128xf32>
    %cst_33 = arith.constant 1.000000e+00 : f32
    %129 = vector.broadcast %cst_33 : f32 to vector<8x128xf32>
    %130 = arith.addf %129, %128 : vector<8x128xf32>
    %131 = arith.divf %129, %130 : vector<8x128xf32>
    %132 = vector.extract_strided_slice %122 {offsets = [0, 128], sizes = [8, 128], strides = [1, 1]} : vector<8x384xf32> to vector<8x128xf32>
    %133 = vector.extract_strided_slice %123 {offsets = [0, 128], sizes = [8, 128], strides = [1, 1]} : vector<8x384xf32> to vector<8x128xf32>
    %134 = arith.addf %132, %133 : vector<8x128xf32>
    %135 = arith.negf %134 : vector<8x128xf32>
    %136 = math.exp %135 : vector<8x128xf32>
    %cst_34 = arith.constant 1.000000e+00 : f32
    %137 = vector.broadcast %cst_34 : f32 to vector<8x128xf32>
    %138 = arith.addf %137, %136 : vector<8x128xf32>
    %139 = arith.divf %137, %138 : vector<8x128xf32>
    %140 = vector.extract_strided_slice %122 {offsets = [0, 256], sizes = [8, 128], strides = [1, 1]} : vector<8x384xf32> to vector<8x128xf32>
    %141 = vector.extract_strided_slice %123 {offsets = [0, 256], sizes = [8, 128], strides = [1, 1]} : vector<8x384xf32> to vector<8x128xf32>
    %142 = arith.addf %141, %10 : vector<8x128xf32>
    %143 = arith.mulf %131, %142 : vector<8x128xf32>
    %144 = arith.addf %140, %143 : vector<8x128xf32>
    %145 = math.tanh %144 : vector<8x128xf32>
    %146 = arith.subf %106, %145 : vector<8x128xf32>
    %147 = arith.mulf %139, %146 : vector<8x128xf32>
    %148 = arith.addf %145, %147 : vector<8x128xf32>
    %149 = arith.addi %15, %c2_i32 : i32
    %c8_i32_35 = arith.constant 8 : i32
    %150 = arith.cmpi slt, %149, %c8_i32_35 : i32
    %151 = arith.extui %150 : i1 to i32
    %152 = arith.sitofp %151 : i32 to f32
    %153 = arith.subf %148, %106 : vector<8x128xf32>
    %154 = vector.broadcast %152 : f32 to vector<8x128xf32>
    %155 = arith.mulf %154, %153 : vector<8x128xf32>
    %156 = arith.addf %106, %155 : vector<8x128xf32>
    %157 = arith.mulf %156, %13 : vector<8x128xf32>
    %cst_36 = arith.constant dense<0.000000e+00> : vector<8xf32>
    %158 = vector.multi_reduction <add>, %157, %cst_36 [1] : vector<8x128xf32> to vector<8xf32>
    %159 = vector.shape_cast %158 : vector<8xf32> to vector<8x1xf32>
    %160 = vector.broadcast %c2_i32 : i32 to vector<1x8xi32>
    %161 = arith.cmpi eq, %14, %160 : vector<1x8xi32>
    %162 = arith.extui %161 : vector<1x8xi1> to vector<1x8xi32>
    %163 = arith.sitofp %162 : vector<1x8xi32> to vector<1x8xf32>
    %164 = vector.broadcast %159 : vector<8x1xf32> to vector<8x8xf32>
    %165 = vector.broadcast %163 : vector<1x8xf32> to vector<8x8xf32>
    %166 = arith.mulf %164, %165 : vector<8x8xf32>
    %167 = arith.addf %117, %166 : vector<8x8xf32>
    %c3_i32 = arith.constant 3 : i32
    %168 = arith.index_cast %c3_i32 : i32 to index
    %c0_37 = arith.constant 0 : index
    %c0_38 = arith.constant 0 : index
    %169 = vector.load %arg1[%168, %c0_37, %c0_38] : memref<8x8x128xf32, #tpu.memory_space<vmem>>, vector<1x8x128xf32>
    %170 = vector.shape_cast %169 : vector<1x8x128xf32> to vector<8x128xf32>
    %cst_39 = arith.constant dense<0.000000e+00> : vector<8x384xf32>
    %171 = tpu.matmul %170, %3, %cst_39 {dimension_numbers = #tpu.dot_dimension_numbers<[1], [0], [0], [1], [0, 0, 1, 1], [], []>} : vector<8x128xf32>, vector<128x384xf32>, vector<8x384xf32> -> vector<8x384xf32>
    %172 = arith.addf %171, %7 : vector<8x384xf32>
    %cst_40 = arith.constant dense<0.000000e+00> : vector<8x384xf32>
    %173 = tpu.matmul %156, %4, %cst_40 {dimension_numbers = #tpu.dot_dimension_numbers<[1], [0], [0], [1], [0, 0, 1, 1], [], []>} : vector<8x128xf32>, vector<128x384xf32>, vector<8x384xf32> -> vector<8x384xf32>
    %174 = vector.extract_strided_slice %172 {offsets = [0, 0], sizes = [8, 128], strides = [1, 1]} : vector<8x384xf32> to vector<8x128xf32>
    %175 = vector.extract_strided_slice %173 {offsets = [0, 0], sizes = [8, 128], strides = [1, 1]} : vector<8x384xf32> to vector<8x128xf32>
    %176 = arith.addf %174, %175 : vector<8x128xf32>
    %177 = arith.negf %176 : vector<8x128xf32>
    %178 = math.exp %177 : vector<8x128xf32>
    %cst_41 = arith.constant 1.000000e+00 : f32
    %179 = vector.broadcast %cst_41 : f32 to vector<8x128xf32>
    %180 = arith.addf %179, %178 : vector<8x128xf32>
    %181 = arith.divf %179, %180 : vector<8x128xf32>
    %182 = vector.extract_strided_slice %172 {offsets = [0, 128], sizes = [8, 128], strides = [1, 1]} : vector<8x384xf32> to vector<8x128xf32>
    %183 = vector.extract_strided_slice %173 {offsets = [0, 128], sizes = [8, 128], strides = [1, 1]} : vector<8x384xf32> to vector<8x128xf32>
    %184 = arith.addf %182, %183 : vector<8x128xf32>
    %185 = arith.negf %184 : vector<8x128xf32>
    %186 = math.exp %185 : vector<8x128xf32>
    %cst_42 = arith.constant 1.000000e+00 : f32
    %187 = vector.broadcast %cst_42 : f32 to vector<8x128xf32>
    %188 = arith.addf %187, %186 : vector<8x128xf32>
    %189 = arith.divf %187, %188 : vector<8x128xf32>
    %190 = vector.extract_strided_slice %172 {offsets = [0, 256], sizes = [8, 128], strides = [1, 1]} : vector<8x384xf32> to vector<8x128xf32>
    %191 = vector.extract_strided_slice %173 {offsets = [0, 256], sizes = [8, 128], strides = [1, 1]} : vector<8x384xf32> to vector<8x128xf32>
    %192 = arith.addf %191, %10 : vector<8x128xf32>
    %193 = arith.mulf %181, %192 : vector<8x128xf32>
    %194 = arith.addf %190, %193 : vector<8x128xf32>
    %195 = math.tanh %194 : vector<8x128xf32>
    %196 = arith.subf %156, %195 : vector<8x128xf32>
    %197 = arith.mulf %189, %196 : vector<8x128xf32>
    %198 = arith.addf %195, %197 : vector<8x128xf32>
    %199 = arith.addi %15, %c3_i32 : i32
    %c8_i32_43 = arith.constant 8 : i32
    %200 = arith.cmpi slt, %199, %c8_i32_43 : i32
    %201 = arith.extui %200 : i1 to i32
    %202 = arith.sitofp %201 : i32 to f32
    %203 = arith.subf %198, %156 : vector<8x128xf32>
    %204 = vector.broadcast %202 : f32 to vector<8x128xf32>
    %205 = arith.mulf %204, %203 : vector<8x128xf32>
    %206 = arith.addf %156, %205 : vector<8x128xf32>
    %207 = arith.mulf %206, %13 : vector<8x128xf32>
    %cst_44 = arith.constant dense<0.000000e+00> : vector<8xf32>
    %208 = vector.multi_reduction <add>, %207, %cst_44 [1] : vector<8x128xf32> to vector<8xf32>
    %209 = vector.shape_cast %208 : vector<8xf32> to vector<8x1xf32>
    %210 = vector.broadcast %c3_i32 : i32 to vector<1x8xi32>
    %211 = arith.cmpi eq, %14, %210 : vector<1x8xi32>
    %212 = arith.extui %211 : vector<1x8xi1> to vector<1x8xi32>
    %213 = arith.sitofp %212 : vector<1x8xi32> to vector<1x8xf32>
    %214 = vector.broadcast %209 : vector<8x1xf32> to vector<8x8xf32>
    %215 = vector.broadcast %213 : vector<1x8xf32> to vector<8x8xf32>
    %216 = arith.mulf %214, %215 : vector<8x8xf32>
    %217 = arith.addf %167, %216 : vector<8x8xf32>
    %c4_i32 = arith.constant 4 : i32
    %218 = arith.index_cast %c4_i32 : i32 to index
    %c0_45 = arith.constant 0 : index
    %c0_46 = arith.constant 0 : index
    %219 = vector.load %arg1[%218, %c0_45, %c0_46] : memref<8x8x128xf32, #tpu.memory_space<vmem>>, vector<1x8x128xf32>
    %220 = vector.shape_cast %219 : vector<1x8x128xf32> to vector<8x128xf32>
    %cst_47 = arith.constant dense<0.000000e+00> : vector<8x384xf32>
    %221 = tpu.matmul %220, %3, %cst_47 {dimension_numbers = #tpu.dot_dimension_numbers<[1], [0], [0], [1], [0, 0, 1, 1], [], []>} : vector<8x128xf32>, vector<128x384xf32>, vector<8x384xf32> -> vector<8x384xf32>
    %222 = arith.addf %221, %7 : vector<8x384xf32>
    %cst_48 = arith.constant dense<0.000000e+00> : vector<8x384xf32>
    %223 = tpu.matmul %206, %4, %cst_48 {dimension_numbers = #tpu.dot_dimension_numbers<[1], [0], [0], [1], [0, 0, 1, 1], [], []>} : vector<8x128xf32>, vector<128x384xf32>, vector<8x384xf32> -> vector<8x384xf32>
    %224 = vector.extract_strided_slice %222 {offsets = [0, 0], sizes = [8, 128], strides = [1, 1]} : vector<8x384xf32> to vector<8x128xf32>
    %225 = vector.extract_strided_slice %223 {offsets = [0, 0], sizes = [8, 128], strides = [1, 1]} : vector<8x384xf32> to vector<8x128xf32>
    %226 = arith.addf %224, %225 : vector<8x128xf32>
    %227 = arith.negf %226 : vector<8x128xf32>
    %228 = math.exp %227 : vector<8x128xf32>
    %cst_49 = arith.constant 1.000000e+00 : f32
    %229 = vector.broadcast %cst_49 : f32 to vector<8x128xf32>
    %230 = arith.addf %229, %228 : vector<8x128xf32>
    %231 = arith.divf %229, %230 : vector<8x128xf32>
    %232 = vector.extract_strided_slice %222 {offsets = [0, 128], sizes = [8, 128], strides = [1, 1]} : vector<8x384xf32> to vector<8x128xf32>
    %233 = vector.extract_strided_slice %223 {offsets = [0, 128], sizes = [8, 128], strides = [1, 1]} : vector<8x384xf32> to vector<8x128xf32>
    %234 = arith.addf %232, %233 : vector<8x128xf32>
    %235 = arith.negf %234 : vector<8x128xf32>
    %236 = math.exp %235 : vector<8x128xf32>
    %cst_50 = arith.constant 1.000000e+00 : f32
    %237 = vector.broadcast %cst_50 : f32 to vector<8x128xf32>
    %238 = arith.addf %237, %236 : vector<8x128xf32>
    %239 = arith.divf %237, %238 : vector<8x128xf32>
    %240 = vector.extract_strided_slice %222 {offsets = [0, 256], sizes = [8, 128], strides = [1, 1]} : vector<8x384xf32> to vector<8x128xf32>
    %241 = vector.extract_strided_slice %223 {offsets = [0, 256], sizes = [8, 128], strides = [1, 1]} : vector<8x384xf32> to vector<8x128xf32>
    %242 = arith.addf %241, %10 : vector<8x128xf32>
    %243 = arith.mulf %231, %242 : vector<8x128xf32>
    %244 = arith.addf %240, %243 : vector<8x128xf32>
    %245 = math.tanh %244 : vector<8x128xf32>
    %246 = arith.subf %206, %245 : vector<8x128xf32>
    %247 = arith.mulf %239, %246 : vector<8x128xf32>
    %248 = arith.addf %245, %247 : vector<8x128xf32>
    %249 = arith.addi %15, %c4_i32 : i32
    %c8_i32_51 = arith.constant 8 : i32
    %250 = arith.cmpi slt, %249, %c8_i32_51 : i32
    %251 = arith.extui %250 : i1 to i32
    %252 = arith.sitofp %251 : i32 to f32
    %253 = arith.subf %248, %206 : vector<8x128xf32>
    %254 = vector.broadcast %252 : f32 to vector<8x128xf32>
    %255 = arith.mulf %254, %253 : vector<8x128xf32>
    %256 = arith.addf %206, %255 : vector<8x128xf32>
    %257 = arith.mulf %256, %13 : vector<8x128xf32>
    %cst_52 = arith.constant dense<0.000000e+00> : vector<8xf32>
    %258 = vector.multi_reduction <add>, %257, %cst_52 [1] : vector<8x128xf32> to vector<8xf32>
    %259 = vector.shape_cast %258 : vector<8xf32> to vector<8x1xf32>
    %260 = vector.broadcast %c4_i32 : i32 to vector<1x8xi32>
    %261 = arith.cmpi eq, %14, %260 : vector<1x8xi32>
    %262 = arith.extui %261 : vector<1x8xi1> to vector<1x8xi32>
    %263 = arith.sitofp %262 : vector<1x8xi32> to vector<1x8xf32>
    %264 = vector.broadcast %259 : vector<8x1xf32> to vector<8x8xf32>
    %265 = vector.broadcast %263 : vector<1x8xf32> to vector<8x8xf32>
    %266 = arith.mulf %264, %265 : vector<8x8xf32>
    %267 = arith.addf %217, %266 : vector<8x8xf32>
    %c5_i32 = arith.constant 5 : i32
    %268 = arith.index_cast %c5_i32 : i32 to index
    %c0_53 = arith.constant 0 : index
    %c0_54 = arith.constant 0 : index
    %269 = vector.load %arg1[%268, %c0_53, %c0_54] : memref<8x8x128xf32, #tpu.memory_space<vmem>>, vector<1x8x128xf32>
    %270 = vector.shape_cast %269 : vector<1x8x128xf32> to vector<8x128xf32>
    %cst_55 = arith.constant dense<0.000000e+00> : vector<8x384xf32>
    %271 = tpu.matmul %270, %3, %cst_55 {dimension_numbers = #tpu.dot_dimension_numbers<[1], [0], [0], [1], [0, 0, 1, 1], [], []>} : vector<8x128xf32>, vector<128x384xf32>, vector<8x384xf32> -> vector<8x384xf32>
    %272 = arith.addf %271, %7 : vector<8x384xf32>
    %cst_56 = arith.constant dense<0.000000e+00> : vector<8x384xf32>
    %273 = tpu.matmul %256, %4, %cst_56 {dimension_numbers = #tpu.dot_dimension_numbers<[1], [0], [0], [1], [0, 0, 1, 1], [], []>} : vector<8x128xf32>, vector<128x384xf32>, vector<8x384xf32> -> vector<8x384xf32>
    %274 = vector.extract_strided_slice %272 {offsets = [0, 0], sizes = [8, 128], strides = [1, 1]} : vector<8x384xf32> to vector<8x128xf32>
    %275 = vector.extract_strided_slice %273 {offsets = [0, 0], sizes = [8, 128], strides = [1, 1]} : vector<8x384xf32> to vector<8x128xf32>
    %276 = arith.addf %274, %275 : vector<8x128xf32>
    %277 = arith.negf %276 : vector<8x128xf32>
    %278 = math.exp %277 : vector<8x128xf32>
    %cst_57 = arith.constant 1.000000e+00 : f32
    %279 = vector.broadcast %cst_57 : f32 to vector<8x128xf32>
    %280 = arith.addf %279, %278 : vector<8x128xf32>
    %281 = arith.divf %279, %280 : vector<8x128xf32>
    %282 = vector.extract_strided_slice %272 {offsets = [0, 128], sizes = [8, 128], strides = [1, 1]} : vector<8x384xf32> to vector<8x128xf32>
    %283 = vector.extract_strided_slice %273 {offsets = [0, 128], sizes = [8, 128], strides = [1, 1]} : vector<8x384xf32> to vector<8x128xf32>
    %284 = arith.addf %282, %283 : vector<8x128xf32>
    %285 = arith.negf %284 : vector<8x128xf32>
    %286 = math.exp %285 : vector<8x128xf32>
    %cst_58 = arith.constant 1.000000e+00 : f32
    %287 = vector.broadcast %cst_58 : f32 to vector<8x128xf32>
    %288 = arith.addf %287, %286 : vector<8x128xf32>
    %289 = arith.divf %287, %288 : vector<8x128xf32>
    %290 = vector.extract_strided_slice %272 {offsets = [0, 256], sizes = [8, 128], strides = [1, 1]} : vector<8x384xf32> to vector<8x128xf32>
    %291 = vector.extract_strided_slice %273 {offsets = [0, 256], sizes = [8, 128], strides = [1, 1]} : vector<8x384xf32> to vector<8x128xf32>
    %292 = arith.addf %291, %10 : vector<8x128xf32>
    %293 = arith.mulf %281, %292 : vector<8x128xf32>
    %294 = arith.addf %290, %293 : vector<8x128xf32>
    %295 = math.tanh %294 : vector<8x128xf32>
    %296 = arith.subf %256, %295 : vector<8x128xf32>
    %297 = arith.mulf %289, %296 : vector<8x128xf32>
    %298 = arith.addf %295, %297 : vector<8x128xf32>
    %299 = arith.addi %15, %c5_i32 : i32
    %c8_i32_59 = arith.constant 8 : i32
    %300 = arith.cmpi slt, %299, %c8_i32_59 : i32
    %301 = arith.extui %300 : i1 to i32
    %302 = arith.sitofp %301 : i32 to f32
    %303 = arith.subf %298, %256 : vector<8x128xf32>
    %304 = vector.broadcast %302 : f32 to vector<8x128xf32>
    %305 = arith.mulf %304, %303 : vector<8x128xf32>
    %306 = arith.addf %256, %305 : vector<8x128xf32>
    %307 = arith.mulf %306, %13 : vector<8x128xf32>
    %cst_60 = arith.constant dense<0.000000e+00> : vector<8xf32>
    %308 = vector.multi_reduction <add>, %307, %cst_60 [1] : vector<8x128xf32> to vector<8xf32>
    %309 = vector.shape_cast %308 : vector<8xf32> to vector<8x1xf32>
    %310 = vector.broadcast %c5_i32 : i32 to vector<1x8xi32>
    %311 = arith.cmpi eq, %14, %310 : vector<1x8xi32>
    %312 = arith.extui %311 : vector<1x8xi1> to vector<1x8xi32>
    %313 = arith.sitofp %312 : vector<1x8xi32> to vector<1x8xf32>
    %314 = vector.broadcast %309 : vector<8x1xf32> to vector<8x8xf32>
    %315 = vector.broadcast %313 : vector<1x8xf32> to vector<8x8xf32>
    %316 = arith.mulf %314, %315 : vector<8x8xf32>
    %317 = arith.addf %267, %316 : vector<8x8xf32>
    %c6_i32 = arith.constant 6 : i32
    %318 = arith.index_cast %c6_i32 : i32 to index
    %c0_61 = arith.constant 0 : index
    %c0_62 = arith.constant 0 : index
    %319 = vector.load %arg1[%318, %c0_61, %c0_62] : memref<8x8x128xf32, #tpu.memory_space<vmem>>, vector<1x8x128xf32>
    %320 = vector.shape_cast %319 : vector<1x8x128xf32> to vector<8x128xf32>
    %cst_63 = arith.constant dense<0.000000e+00> : vector<8x384xf32>
    %321 = tpu.matmul %320, %3, %cst_63 {dimension_numbers = #tpu.dot_dimension_numbers<[1], [0], [0], [1], [0, 0, 1, 1], [], []>} : vector<8x128xf32>, vector<128x384xf32>, vector<8x384xf32> -> vector<8x384xf32>
    %322 = arith.addf %321, %7 : vector<8x384xf32>
    %cst_64 = arith.constant dense<0.000000e+00> : vector<8x384xf32>
    %323 = tpu.matmul %306, %4, %cst_64 {dimension_numbers = #tpu.dot_dimension_numbers<[1], [0], [0], [1], [0, 0, 1, 1], [], []>} : vector<8x128xf32>, vector<128x384xf32>, vector<8x384xf32> -> vector<8x384xf32>
    %324 = vector.extract_strided_slice %322 {offsets = [0, 0], sizes = [8, 128], strides = [1, 1]} : vector<8x384xf32> to vector<8x128xf32>
    %325 = vector.extract_strided_slice %323 {offsets = [0, 0], sizes = [8, 128], strides = [1, 1]} : vector<8x384xf32> to vector<8x128xf32>
    %326 = arith.addf %324, %325 : vector<8x128xf32>
    %327 = arith.negf %326 : vector<8x128xf32>
    %328 = math.exp %327 : vector<8x128xf32>
    %cst_65 = arith.constant 1.000000e+00 : f32
    %329 = vector.broadcast %cst_65 : f32 to vector<8x128xf32>
    %330 = arith.addf %329, %328 : vector<8x128xf32>
    %331 = arith.divf %329, %330 : vector<8x128xf32>
    %332 = vector.extract_strided_slice %322 {offsets = [0, 128], sizes = [8, 128], strides = [1, 1]} : vector<8x384xf32> to vector<8x128xf32>
    %333 = vector.extract_strided_slice %323 {offsets = [0, 128], sizes = [8, 128], strides = [1, 1]} : vector<8x384xf32> to vector<8x128xf32>
    %334 = arith.addf %332, %333 : vector<8x128xf32>
    %335 = arith.negf %334 : vector<8x128xf32>
    %336 = math.exp %335 : vector<8x128xf32>
    %cst_66 = arith.constant 1.000000e+00 : f32
    %337 = vector.broadcast %cst_66 : f32 to vector<8x128xf32>
    %338 = arith.addf %337, %336 : vector<8x128xf32>
    %339 = arith.divf %337, %338 : vector<8x128xf32>
    %340 = vector.extract_strided_slice %322 {offsets = [0, 256], sizes = [8, 128], strides = [1, 1]} : vector<8x384xf32> to vector<8x128xf32>
    %341 = vector.extract_strided_slice %323 {offsets = [0, 256], sizes = [8, 128], strides = [1, 1]} : vector<8x384xf32> to vector<8x128xf32>
    %342 = arith.addf %341, %10 : vector<8x128xf32>
    %343 = arith.mulf %331, %342 : vector<8x128xf32>
    %344 = arith.addf %340, %343 : vector<8x128xf32>
    %345 = math.tanh %344 : vector<8x128xf32>
    %346 = arith.subf %306, %345 : vector<8x128xf32>
    %347 = arith.mulf %339, %346 : vector<8x128xf32>
    %348 = arith.addf %345, %347 : vector<8x128xf32>
    %349 = arith.addi %15, %c6_i32 : i32
    %c8_i32_67 = arith.constant 8 : i32
    %350 = arith.cmpi slt, %349, %c8_i32_67 : i32
    %351 = arith.extui %350 : i1 to i32
    %352 = arith.sitofp %351 : i32 to f32
    %353 = arith.subf %348, %306 : vector<8x128xf32>
    %354 = vector.broadcast %352 : f32 to vector<8x128xf32>
    %355 = arith.mulf %354, %353 : vector<8x128xf32>
    %356 = arith.addf %306, %355 : vector<8x128xf32>
    %357 = arith.mulf %356, %13 : vector<8x128xf32>
    %cst_68 = arith.constant dense<0.000000e+00> : vector<8xf32>
    %358 = vector.multi_reduction <add>, %357, %cst_68 [1] : vector<8x128xf32> to vector<8xf32>
    %359 = vector.shape_cast %358 : vector<8xf32> to vector<8x1xf32>
    %360 = vector.broadcast %c6_i32 : i32 to vector<1x8xi32>
    %361 = arith.cmpi eq, %14, %360 : vector<1x8xi32>
    %362 = arith.extui %361 : vector<1x8xi1> to vector<1x8xi32>
    %363 = arith.sitofp %362 : vector<1x8xi32> to vector<1x8xf32>
    %364 = vector.broadcast %359 : vector<8x1xf32> to vector<8x8xf32>
    %365 = vector.broadcast %363 : vector<1x8xf32> to vector<8x8xf32>
    %366 = arith.mulf %364, %365 : vector<8x8xf32>
    %367 = arith.addf %317, %366 : vector<8x8xf32>
    %c7_i32 = arith.constant 7 : i32
    %368 = arith.index_cast %c7_i32 : i32 to index
    %c0_69 = arith.constant 0 : index
    %c0_70 = arith.constant 0 : index
    %369 = vector.load %arg1[%368, %c0_69, %c0_70] : memref<8x8x128xf32, #tpu.memory_space<vmem>>, vector<1x8x128xf32>
    %370 = vector.shape_cast %369 : vector<1x8x128xf32> to vector<8x128xf32>
    %cst_71 = arith.constant dense<0.000000e+00> : vector<8x384xf32>
    %371 = tpu.matmul %370, %3, %cst_71 {dimension_numbers = #tpu.dot_dimension_numbers<[1], [0], [0], [1], [0, 0, 1, 1], [], []>} : vector<8x128xf32>, vector<128x384xf32>, vector<8x384xf32> -> vector<8x384xf32>
    %372 = arith.addf %371, %7 : vector<8x384xf32>
    %cst_72 = arith.constant dense<0.000000e+00> : vector<8x384xf32>
    %373 = tpu.matmul %356, %4, %cst_72 {dimension_numbers = #tpu.dot_dimension_numbers<[1], [0], [0], [1], [0, 0, 1, 1], [], []>} : vector<8x128xf32>, vector<128x384xf32>, vector<8x384xf32> -> vector<8x384xf32>
    %374 = vector.extract_strided_slice %372 {offsets = [0, 0], sizes = [8, 128], strides = [1, 1]} : vector<8x384xf32> to vector<8x128xf32>
    %375 = vector.extract_strided_slice %373 {offsets = [0, 0], sizes = [8, 128], strides = [1, 1]} : vector<8x384xf32> to vector<8x128xf32>
    %376 = arith.addf %374, %375 : vector<8x128xf32>
    %377 = arith.negf %376 : vector<8x128xf32>
    %378 = math.exp %377 : vector<8x128xf32>
    %cst_73 = arith.constant 1.000000e+00 : f32
    %379 = vector.broadcast %cst_73 : f32 to vector<8x128xf32>
    %380 = arith.addf %379, %378 : vector<8x128xf32>
    %381 = arith.divf %379, %380 : vector<8x128xf32>
    %382 = vector.extract_strided_slice %372 {offsets = [0, 128], sizes = [8, 128], strides = [1, 1]} : vector<8x384xf32> to vector<8x128xf32>
    %383 = vector.extract_strided_slice %373 {offsets = [0, 128], sizes = [8, 128], strides = [1, 1]} : vector<8x384xf32> to vector<8x128xf32>
    %384 = arith.addf %382, %383 : vector<8x128xf32>
    %385 = arith.negf %384 : vector<8x128xf32>
    %386 = math.exp %385 : vector<8x128xf32>
    %cst_74 = arith.constant 1.000000e+00 : f32
    %387 = vector.broadcast %cst_74 : f32 to vector<8x128xf32>
    %388 = arith.addf %387, %386 : vector<8x128xf32>
    %389 = arith.divf %387, %388 : vector<8x128xf32>
    %390 = vector.extract_strided_slice %372 {offsets = [0, 256], sizes = [8, 128], strides = [1, 1]} : vector<8x384xf32> to vector<8x128xf32>
    %391 = vector.extract_strided_slice %373 {offsets = [0, 256], sizes = [8, 128], strides = [1, 1]} : vector<8x384xf32> to vector<8x128xf32>
    %392 = arith.addf %391, %10 : vector<8x128xf32>
    %393 = arith.mulf %381, %392 : vector<8x128xf32>
    %394 = arith.addf %390, %393 : vector<8x128xf32>
    %395 = math.tanh %394 : vector<8x128xf32>
    %396 = arith.subf %356, %395 : vector<8x128xf32>
    %397 = arith.mulf %389, %396 : vector<8x128xf32>
    %398 = arith.addf %395, %397 : vector<8x128xf32>
    %399 = arith.addi %15, %c7_i32 : i32
    %c8_i32_75 = arith.constant 8 : i32
    %400 = arith.cmpi slt, %399, %c8_i32_75 : i32
    %401 = arith.extui %400 : i1 to i32
    %402 = arith.sitofp %401 : i32 to f32
    %403 = arith.subf %398, %356 : vector<8x128xf32>
    %404 = vector.broadcast %402 : f32 to vector<8x128xf32>
    %405 = arith.mulf %404, %403 : vector<8x128xf32>
    %406 = arith.addf %356, %405 : vector<8x128xf32>
    %407 = arith.mulf %406, %13 : vector<8x128xf32>
    %cst_76 = arith.constant dense<0.000000e+00> : vector<8xf32>
    %408 = vector.multi_reduction <add>, %407, %cst_76 [1] : vector<8x128xf32> to vector<8xf32>
    %409 = vector.shape_cast %408 : vector<8xf32> to vector<8x1xf32>
    %410 = vector.broadcast %c7_i32 : i32 to vector<1x8xi32>
    %411 = arith.cmpi eq, %14, %410 : vector<1x8xi32>
    %412 = arith.extui %411 : vector<1x8xi1> to vector<1x8xi32>
    %413 = arith.sitofp %412 : vector<1x8xi32> to vector<1x8xf32>
    %414 = vector.broadcast %409 : vector<8x1xf32> to vector<8x8xf32>
    %415 = vector.broadcast %413 : vector<1x8xf32> to vector<8x8xf32>
    %416 = arith.mulf %414, %415 : vector<8x8xf32>
    %417 = arith.addf %367, %416 : vector<8x8xf32>
    %c8_i32_77 = arith.constant 8 : i32
    %c0_78 = arith.constant 0 : index
    %c0_79 = arith.constant 0 : index
    %418 = vector.load %arg10[%c0_78, %c0_79] : memref<8x128xf32, #tpu.memory_space<vmem>>, vector<8x128xf32>
    tpu.vector_store %arg10[%c0_78, %c0_79], %406 {strides = array<i32>} : memref<8x128xf32, #tpu.memory_space<vmem>>, vector<8x128xf32>,
    %c0_80 = arith.constant 0 : index
    %c0_81 = arith.constant 0 : index
    %419 = vector.load %arg8[%c0_80, %c0_81] : memref<8x8xf32, #tpu.memory_space<vmem>>, vector<8x8xf32>
    tpu.vector_store %arg8[%c0_80, %c0_81], %417 {strides = array<i32>} : memref<8x8xf32, #tpu.memory_space<vmem>>, vector<8x8xf32>,
    %c0_i32_82 = arith.constant 0 : i32
    %420 = arith.cmpi eq, %arg0, %c0_i32_82 : i32
    %421 = arith.extui %420 : i1 to i32
    %c0_i32_83 = arith.constant 0 : i32
    %422 = arith.cmpi ne, %421, %c0_i32_83 : i32
    scf.if %422 {
      %c0_84 = arith.constant 0 : index
      %c0_85 = arith.constant 0 : index
      %423 = vector.load %arg9[%c0_84, %c0_85] : memref<8x128xf32, #tpu.memory_space<vmem>>, vector<8x128xf32>
      tpu.vector_store %arg9[%c0_84, %c0_85], %406 {strides = array<i32>} : memref<8x128xf32, #tpu.memory_space<vmem>>, vector<8x128xf32>,
    } else {
    }
    return
  }
  func.func @transform_0(%arg0: i32) -> (i32, i32, i32) {
    %c0_i32 = arith.constant 0 : i32
    %c0_i32_0 = arith.constant 0 : i32
    %c0_i32_1 = arith.constant 0 : i32
    return %arg0, %c0_i32, %c0_i32_0 : i32, i32, i32
  }
  func.func @transform_1(%arg0: i32) -> (i32, i32) {
    %c0_i32 = arith.constant 0 : i32
    %c0_i32_0 = arith.constant 0 : i32
    %c0_i32_1 = arith.constant 0 : i32
    return %c0_i32, %c0_i32_0 : i32, i32
  }
  func.func @transform_2(%arg0: i32) -> (i32, i32) {
    %c0_i32 = arith.constant 0 : i32
    %c0_i32_0 = arith.constant 0 : i32
    %c0_i32_1 = arith.constant 0 : i32
    return %c0_i32, %c0_i32_0 : i32, i32
  }
  func.func @transform_3(%arg0: i32) -> (i32, i32) {
    %c0_i32 = arith.constant 0 : i32
    %c0_i32_0 = arith.constant 0 : i32
    %c0_i32_1 = arith.constant 0 : i32
    return %c0_i32, %c0_i32_0 : i32, i32
  }
  func.func @transform_4(%arg0: i32) -> (i32, i32) {
    %c0_i32 = arith.constant 0 : i32
    %c0_i32_0 = arith.constant 0 : i32
    %c0_i32_1 = arith.constant 0 : i32
    return %c0_i32, %c0_i32_0 : i32, i32
  }
  func.func @transform_5(%arg0: i32) -> (i32, i32) {
    %c0_i32 = arith.constant 0 : i32
    %c0_i32_0 = arith.constant 0 : i32
    %c0_i32_1 = arith.constant 0 : i32
    return %c0_i32, %c0_i32_0 : i32, i32
  }
  func.func @transform_6(%arg0: i32) -> (i32, i32) {
    %c0_i32 = arith.constant 0 : i32
    %c0_i32_0 = arith.constant 0 : i32
    %c0_i32_1 = arith.constant 0 : i32
    return %c0_i32, %c0_i32_0 : i32, i32
  }
  func.func @transform_7(%arg0: i32) -> (i32, i32) {
    %c0_i32 = arith.constant 0 : i32
    %c0_i32_0 = arith.constant 0 : i32
    return %c0_i32, %arg0 : i32, i32
  }
  func.func @transform_8(%arg0: i32) -> (i32, i32) {
    %c0_i32 = arith.constant 0 : i32
    %c0_i32_0 = arith.constant 0 : i32
    %c0_i32_1 = arith.constant 0 : i32
    return %c0_i32, %c0_i32_0 : i32, i32
  }
}

module attributes {stable_mosaic.version = 11 : i64} {
  func.func @kernel(%arg0: i32, %arg1: memref<8x8x128xf32, #tpu.memory_space<vmem>>, %arg2: memref<128x384xf32, #tpu.memory_space<vmem>>, %arg3: memref<128x384xf32, #tpu.memory_space<vmem>>, %arg4: memref<1x384xf32, #tpu.memory_space<vmem>>, %arg5: memref<1x128xf32, #tpu.memory_space<vmem>>, %arg6: memref<1x128xf32, #tpu.memory_space<vmem>>, %arg7: memref<8x128xf32, #tpu.memory_space<vmem>>, %arg8: memref<8x8xf32, #tpu.memory_space<vmem>>, %arg9: memref<8x128xf32, #tpu.memory_space<vmem>>, %arg10: memref<8x128xf32, #tpu.memory_space<vmem>>) attributes {dimension_semantics = [#tpu.dimension_semantics<arbitrary>], iteration_bounds = array<i64: 1>, scalar_prefetch = 0 : i64, scratch_operands = 1 : i64, tpu.core_type = #tpu.core_type<tc>, window_params = [{transform_indices = @transform_0, window_bounds = array<i64: 8, 8, 128>}, {pipeline_mode = #tpu.pipeline_mode<synchronous>, transform_indices = @transform_1, window_bounds = array<i64: 128, 384>}, {pipeline_mode = #tpu.pipeline_mode<synchronous>, transform_indices = @transform_2, window_bounds = array<i64: 128, 384>}, {pipeline_mode = #tpu.pipeline_mode<synchronous>, transform_indices = @transform_3, window_bounds = array<i64: 1, 384>}, {pipeline_mode = #tpu.pipeline_mode<synchronous>, transform_indices = @transform_4, window_bounds = array<i64: 1, 128>}, {pipeline_mode = #tpu.pipeline_mode<synchronous>, transform_indices = @transform_5, window_bounds = array<i64: 1, 128>}, {pipeline_mode = #tpu.pipeline_mode<synchronous>, transform_indices = @transform_6, window_bounds = array<i64: 8, 128>}, {transform_indices = @transform_7, window_bounds = array<i64: 8, 8>}, {pipeline_mode = #tpu.pipeline_mode<synchronous>, transform_indices = @transform_8, window_bounds = array<i64: 8, 128>}]} {
    %c0_i32 = arith.constant 0 : i32
    %0 = arith.cmpi eq, %arg0, %c0_i32 : i32
    %1 = arith.extui %0 : i1 to i32
    %c0_i32_0 = arith.constant 0 : i32
    %2 = arith.cmpi ne, %1, %c0_i32_0 : i32
    scf.if %2 {
      %c0_84 = arith.constant 0 : index
      %c0_85 = arith.constant 0 : index
      %423 = vector.load %arg7[%c0_84, %c0_85] : memref<8x128xf32, #tpu.memory_space<vmem>>, vector<8x128xf32>
      %c0_86 = arith.constant 0 : index
      %c0_87 = arith.constant 0 : index
      %424 = vector.load %arg10[%c0_86, %c0_87] : memref<8x128xf32, #tpu.memory_space<vmem>>, vector<8x128xf32>
      tpu.vector_store %arg10[%c0_86, %c0_87], %423 {strides = array<i32>} : memref<8x128xf32, #tpu.memory_space<vmem>>, vector<8x128xf32>,
    } else {
    }
    %c0 = arith.constant 0 : index
    %c0_1 = arith.constant 0 : index
    %3 = vector.load %arg2[%c0, %c0_1] : memref<128x384xf32, #tpu.memory_space<vmem>>, vector<128x384xf32>
    %c0_2 = arith.constant 0 : index
    %c0_3 = arith.constant 0 : index
    %4 = vector.load %arg3[%c0_2, %c0_3] : memref<128x384xf32, #tpu.memory_space<vmem>>, vector<128x384xf32>
    %c0_4 = arith.constant 0 : index
    %c0_5 = arith.constant 0 : index
    %5 = vector.load %arg4[%c0_4, %c0_5] : memref<1x384xf32, #tpu.memory_space<vmem>>, vector<1x384xf32>
    %6 = vector.shape_cast %5 : vector<1x384xf32> to vector<1x384xf32>
    %7 = vector.broadcast %6 : vector<1x384xf32> to vector<8x384xf32>
    %c0_6 = arith.constant 0 : index
    %c0_7 = arith.constant 0 : index
    %8 = vector.load %arg5[%c0_6, %c0_7] : memref<1x128xf32, #tpu.memory_space<vmem>>, vector<1x128xf32>
    %9 = vector.shape_cast %8 : vector<1x128xf32> to vector<1x128xf32>
    %10 = vector.broadcast %9 : vector<1x128xf32> to vector<8x128xf32>
    %c0_8 = arith.constant 0 : index
    %c0_9 = arith.constant 0 : index
    %11 = vector.load %arg6[%c0_8, %c0_9] : memref<1x128xf32, #tpu.memory_space<vmem>>, vector<1x128xf32>
    %12 = vector.shape_cast %11 : vector<1x128xf32> to vector<1x128xf32>
    %13 = vector.broadcast %12 : vector<1x128xf32> to vector<8x128xf32>
    %14 = tpu.iota {dimensions = array<i32: 1>} : vector<1x8xi32>
    %c8_i32 = arith.constant 8 : i32
    %15 = arith.muli %arg0, %c8_i32 : i32
    %c0_10 = arith.constant 0 : index
    %c0_11 = arith.constant 0 : index
    %16 = vector.load %arg10[%c0_10, %c0_11] : memref<8x128xf32, #tpu.memory_space<vmem>>, vector<8x128xf32>
    %cst = arith.constant 0.000000e+00 : f32
    %17 = vector.broadcast %cst : f32 to vector<8x8xf32>
    %c0_i32_12 = arith.constant 0 : i32
    %18 = arith.index_cast %c0_i32_12 : i32 to index
    %c0_13 = arith.constant 0 : index
    %c0_14 = arith.constant 0 : index
    %19 = vector.load %arg1[%18, %c0_13, %c0_14] : memref<8x8x128xf32, #tpu.memory_space<vmem>>, vector<1x8x128xf32>
    %20 = vector.shape_cast %19 : vector<1x8x128xf32> to vector<8x128xf32>
    %cst_15 = arith.constant dense<0.000000e+00> : vector<8x384xf32>
    %21 = tpu.matmul %20, %3, %cst_15 {dimension_numbers = #tpu.dot_dimension_numbers<[1], [0], [0], [1], [0, 0, 1, 1], [], []>} : vector<8x128xf32>, vector<128x384xf32>, vector<8x384xf32> -> vector<8x384xf32>
    %22 = arith.addf %21, %7 : vector<8x384xf32>
    %cst_16 = arith.constant dense<0.000000e+00> : vector<8x384xf32>
    %23 = tpu.matmul %16, %4, %cst_16 {dimension_numbers = #tpu.dot_dimension_numbers<[1], [0], [0], [1], [0, 0, 1, 1], [], []>} : vector<8x128xf32>, vector<128x384xf32>, vector<8x384xf32> -> vector<8x384xf32>
    %24 = vector.extract_strided_slice %22 {offsets = [0, 0], sizes = [8, 128], strides = [1, 1]} : vector<8x384xf32> to vector<8x128xf32>
    %25 = vector.extract_strided_slice %23 {offsets = [0, 0], sizes = [8, 128], strides = [1, 1]} : vector<8x384xf32> to vector<8x128xf32>
    %26 = arith.addf %24, %25 : vector<8x128xf32>
    %27 = arith.negf %26 : vector<8x128xf32>
    %28 = math.exp %27 : vector<8x128xf32>
    %cst_17 = arith.constant 1.000000e+00 : f32
    %29 = vector.broadcast %cst_17 : f32 to vector<8x128xf32>
    %30 = arith.addf %29, %28 : vector<8x128xf32>
    %31 = arith.divf %29, %30 : vector<8x128xf32>
    %32 = vector.extract_strided_slice %22 {offsets = [0, 128], sizes = [8, 128], strides = [1, 1]} : vector<8x384xf32> to vector<8x128xf32>
    %33 = vector.extract_strided_slice %23 {offsets = [0, 128], sizes = [8, 128], strides = [1, 1]} : vector<8x384xf32> to vector<8x128xf32>
    %34 = arith.addf %32, %33 : vector<8x128xf32>
    %35 = arith.negf %34 : vector<8x128xf32>
    %36 = math.exp %35 : vector<8x128xf32>
    %cst_18 = arith.constant 1.000000e+00 : f32
    %37 = vector.broadcast %cst_18 : f32 to vector<8x128xf32>
    %38 = arith.addf %37, %36 : vector<8x128xf32>
    %39 = arith.divf %37, %38 : vector<8x128xf32>
    %40 = vector.extract_strided_slice %22 {offsets = [0, 256], sizes = [8, 128], strides = [1, 1]} : vector<8x384xf32> to vector<8x128xf32>
    %41 = vector.extract_strided_slice %23 {offsets = [0, 256], sizes = [8, 128], strides = [1, 1]} : vector<8x384xf32> to vector<8x128xf32>
    %42 = arith.addf %41, %10 : vector<8x128xf32>
    %43 = arith.mulf %31, %42 : vector<8x128xf32>
    %44 = arith.addf %40, %43 : vector<8x128xf32>
    %45 = math.tanh %44 : vector<8x128xf32>
    %46 = arith.subf %16, %45 : vector<8x128xf32>
    %47 = arith.mulf %39, %46 : vector<8x128xf32>
    %48 = arith.addf %45, %47 : vector<8x128xf32>
    %49 = arith.addi %15, %c0_i32_12 : i32
    %c8_i32_19 = arith.constant 8 : i32
    %50 = arith.cmpi slt, %49, %c8_i32_19 : i32
    %51 = arith.extui %50 : i1 to i32
    %52 = arith.sitofp %51 : i32 to f32
    %53 = arith.subf %48, %16 : vector<8x128xf32>
    %54 = vector.broadcast %52 : f32 to vector<8x128xf32>
    %55 = arith.mulf %54, %53 : vector<8x128xf32>
    %56 = arith.addf %16, %55 : vector<8x128xf32>
    %57 = arith.mulf %56, %13 : vector<8x128xf32>
    %cst_20 = arith.constant dense<0.000000e+00> : vector<8xf32>
    %58 = vector.multi_reduction <add>, %57, %cst_20 [1] : vector<8x128xf32> to vector<8xf32>
    %59 = vector.shape_cast %58 : vector<8xf32> to vector<8x1xf32>
    %60 = vector.broadcast %c0_i32_12 : i32 to vector<1x8xi32>
    %61 = arith.cmpi eq, %14, %60 : vector<1x8xi32>
    %62 = arith.extui %61 : vector<1x8xi1> to vector<1x8xi32>
    %63 = arith.sitofp %62 : vector<1x8xi32> to vector<1x8xf32>
    %64 = vector.broadcast %59 : vector<8x1xf32> to vector<8x8xf32>
    %65 = vector.broadcast %63 : vector<1x8xf32> to vector<8x8xf32>
    %66 = arith.mulf %64, %65 : vector<8x8xf32>
    %67 = arith.addf %17, %66 : vector<8x8xf32>
    %c1_i32 = arith.constant 1 : i32
    %68 = arith.index_cast %c1_i32 : i32 to index
    %c0_21 = arith.constant 0 : index
    %c0_22 = arith.constant 0 : index
    %69 = vector.load %arg1[%68, %c0_21, %c0_22] : memref<8x8x128xf32, #tpu.memory_space<vmem>>, vector<1x8x128xf32>
    %70 = vector.shape_cast %69 : vector<1x8x128xf32> to vector<8x128xf32>
    %cst_23 = arith.constant dense<0.000000e+00> : vector<8x384xf32>
    %71 = tpu.matmul %70, %3, %cst_23 {dimension_numbers = #tpu.dot_dimension_numbers<[1], [0], [0], [1], [0, 0, 1, 1], [], []>} : vector<8x128xf32>, vector<128x384xf32>, vector<8x384xf32> -> vector<8x384xf32>
    %72 = arith.addf %71, %7 : vector<8x384xf32>
    %cst_24 = arith.constant dense<0.000000e+00> : vector<8x384xf32>
    %73 = tpu.matmul %56, %4, %cst_24 {dimension_numbers = #tpu.dot_dimension_numbers<[1], [0], [0], [1], [0, 0, 1, 1], [], []>} : vector<8x128xf32>, vector<128x384xf32>, vector<8x384xf32> -> vector<8x384xf32>
    %74 = vector.extract_strided_slice %72 {offsets = [0, 0], sizes = [8, 128], strides = [1, 1]} : vector<8x384xf32> to vector<8x128xf32>
    %75 = vector.extract_strided_slice %73 {offsets = [0, 0], sizes = [8, 128], strides = [1, 1]} : vector<8x384xf32> to vector<8x128xf32>
    %76 = arith.addf %74, %75 : vector<8x128xf32>
    %77 = arith.negf %76 : vector<8x128xf32>
    %78 = math.exp %77 : vector<8x128xf32>
    %cst_25 = arith.constant 1.000000e+00 : f32
    %79 = vector.broadcast %cst_25 : f32 to vector<8x128xf32>
    %80 = arith.addf %79, %78 : vector<8x128xf32>
    %81 = arith.divf %79, %80 : vector<8x128xf32>
    %82 = vector.extract_strided_slice %72 {offsets = [0, 128], sizes = [8, 128], strides = [1, 1]} : vector<8x384xf32> to vector<8x128xf32>
    %83 = vector.extract_strided_slice %73 {offsets = [0, 128], sizes = [8, 128], strides = [1, 1]} : vector<8x384xf32> to vector<8x128xf32>
    %84 = arith.addf %82, %83 : vector<8x128xf32>
    %85 = arith.negf %84 : vector<8x128xf32>
    %86 = math.exp %85 : vector<8x128xf32>
    %cst_26 = arith.constant 1.000000e+00 : f32
    %87 = vector.broadcast %cst_26 : f32 to vector<8x128xf32>
    %88 = arith.addf %87, %86 : vector<8x128xf32>
    %89 = arith.divf %87, %88 : vector<8x128xf32>
    %90 = vector.extract_strided_slice %72 {offsets = [0, 256], sizes = [8, 128], strides = [1, 1]} : vector<8x384xf32> to vector<8x128xf32>
    %91 = vector.extract_strided_slice %73 {offsets = [0, 256], sizes = [8, 128], strides = [1, 1]} : vector<8x384xf32> to vector<8x128xf32>
    %92 = arith.addf %91, %10 : vector<8x128xf32>
    %93 = arith.mulf %81, %92 : vector<8x128xf32>
    %94 = arith.addf %90, %93 : vector<8x128xf32>
    %95 = math.tanh %94 : vector<8x128xf32>
    %96 = arith.subf %56, %95 : vector<8x128xf32>
    %97 = arith.mulf %89, %96 : vector<8x128xf32>
    %98 = arith.addf %95, %97 : vector<8x128xf32>
    %99 = arith.addi %15, %c1_i32 : i32
    %c8_i32_27 = arith.constant 8 : i32
    %100 = arith.cmpi slt, %99, %c8_i32_27 : i32
    %101 = arith.extui %100 : i1 to i32
    %102 = arith.sitofp %101 : i32 to f32
    %103 = arith.subf %98, %56 : vector<8x128xf32>
    %104 = vector.broadcast %102 : f32 to vector<8x128xf32>
    %105 = arith.mulf %104, %103 : vector<8x128xf32>
    %106 = arith.addf %56, %105 : vector<8x128xf32>
    %107 = arith.mulf %106, %13 : vector<8x128xf32>
    %cst_28 = arith.constant dense<0.000000e+00> : vector<8xf32>
    %108 = vector.multi_reduction <add>, %107, %cst_28 [1] : vector<8x128xf32> to vector<8xf32>
    %109 = vector.shape_cast %108 : vector<8xf32> to vector<8x1xf32>
    %110 = vector.broadcast %c1_i32 : i32 to vector<1x8xi32>
    %111 = arith.cmpi eq, %14, %110 : vector<1x8xi32>
    %112 = arith.extui %111 : vector<1x8xi1> to vector<1x8xi32>
    %113 = arith.sitofp %112 : vector<1x8xi32> to vector<1x8xf32>
    %114 = vector.broadcast %109 : vector<8x1xf32> to vector<8x8xf32>
    %115 = vector.broadcast %113 : vector<1x8xf32> to vector<8x8xf32>
    %116 = arith.mulf %114, %115 : vector<8x8xf32>
    %117 = arith.addf %67, %116 : vector<8x8xf32>
    %c2_i32 = arith.constant 2 : i32
    %118 = arith.index_cast %c2_i32 : i32 to index
    %c0_29 = arith.constant 0 : index
    %c0_30 = arith.constant 0 : index
    %119 = vector.load %arg1[%118, %c0_29, %c0_30] : memref<8x8x128xf32, #tpu.memory_space<vmem>>, vector<1x8x128xf32>
    %120 = vector.shape_cast %119 : vector<1x8x128xf32> to vector<8x128xf32>
    %cst_31 = arith.constant dense<0.000000e+00> : vector<8x384xf32>
    %121 = tpu.matmul %120, %3, %cst_31 {dimension_numbers = #tpu.dot_dimension_numbers<[1], [0], [0], [1], [0, 0, 1, 1], [], []>} : vector<8x128xf32>, vector<128x384xf32>, vector<8x384xf32> -> vector<8x384xf32>
    %122 = arith.addf %121, %7 : vector<8x384xf32>
    %cst_32 = arith.constant dense<0.000000e+00> : vector<8x384xf32>
    %123 = tpu.matmul %106, %4, %cst_32 {dimension_numbers = #tpu.dot_dimension_numbers<[1], [0], [0], [1], [0, 0, 1, 1], [], []>} : vector<8x128xf32>, vector<128x384xf32>, vector<8x384xf32> -> vector<8x384xf32>
    %124 = vector.extract_strided_slice %122 {offsets = [0, 0], sizes = [8, 128], strides = [1, 1]} : vector<8x384xf32> to vector<8x128xf32>
    %125 = vector.extract_strided_slice %123 {offsets = [0, 0], sizes = [8, 128], strides = [1, 1]} : vector<8x384xf32> to vector<8x128xf32>
    %126 = arith.addf %124, %125 : vector<8x128xf32>
    %127 = arith.negf %126 : vector<8x128xf32>
    %128 = math.exp %127 : vector<8x128xf32>
    %cst_33 = arith.constant 1.000000e+00 : f32
    %129 = vector.broadcast %cst_33 : f32 to vector<8x128xf32>
    %130 = arith.addf %129, %128 : vector<8x128xf32>
    %131 = arith.divf %129, %130 : vector<8x128xf32>
    %132 = vector.extract_strided_slice %122 {offsets = [0, 128], sizes = [8, 128], strides = [1, 1]} : vector<8x384xf32> to vector<8x128xf32>
    %133 = vector.extract_strided_slice %123 {offsets = [0, 128], sizes = [8, 128], strides = [1, 1]} : vector<8x384xf32> to vector<8x128xf32>
    %134 = arith.addf %132, %133 : vector<8x128xf32>
    %135 = arith.negf %134 : vector<8x128xf32>
    %136 = math.exp %135 : vector<8x128xf32>
    %cst_34 = arith.constant 1.000000e+00 : f32
    %137 = vector.broadcast %cst_34 : f32 to vector<8x128xf32>
    %138 = arith.addf %137, %136 : vector<8x128xf32>
    %139 = arith.divf %137, %138 : vector<8x128xf32>
    %140 = vector.extract_strided_slice %122 {offsets = [0, 256], sizes = [8, 128], strides = [1, 1]} : vector<8x384xf32> to vector<8x128xf32>
    %141 = vector.extract_strided_slice %123 {offsets = [0, 256], sizes = [8, 128], strides = [1, 1]} : vector<8x384xf32> to vector<8x128xf32>
    %142 = arith.addf %141, %10 : vector<8x128xf32>
    %143 = arith.mulf %131, %142 : vector<8x128xf32>
    %144 = arith.addf %140, %143 : vector<8x128xf32>
    %145 = math.tanh %144 : vector<8x128xf32>
    %146 = arith.subf %106, %145 : vector<8x128xf32>
    %147 = arith.mulf %139, %146 : vector<8x128xf32>
    %148 = arith.addf %145, %147 : vector<8x128xf32>
    %149 = arith.addi %15, %c2_i32 : i32
    %c8_i32_35 = arith.constant 8 : i32
    %150 = arith.cmpi slt, %149, %c8_i32_35 : i32
    %151 = arith.extui %150 : i1 to i32
    %152 = arith.sitofp %151 : i32 to f32
    %153 = arith.subf %148, %106 : vector<8x128xf32>
    %154 = vector.broadcast %152 : f32 to vector<8x128xf32>
    %155 = arith.mulf %154, %153 : vector<8x128xf32>
    %156 = arith.addf %106, %155 : vector<8x128xf32>
    %157 = arith.mulf %156, %13 : vector<8x128xf32>
    %cst_36 = arith.constant dense<0.000000e+00> : vector<8xf32>
    %158 = vector.multi_reduction <add>, %157, %cst_36 [1] : vector<8x128xf32> to vector<8xf32>
    %159 = vector.shape_cast %158 : vector<8xf32> to vector<8x1xf32>
    %160 = vector.broadcast %c2_i32 : i32 to vector<1x8xi32>
    %161 = arith.cmpi eq, %14, %160 : vector<1x8xi32>
    %162 = arith.extui %161 : vector<1x8xi1> to vector<1x8xi32>
    %163 = arith.sitofp %162 : vector<1x8xi32> to vector<1x8xf32>
    %164 = vector.broadcast %159 : vector<8x1xf32> to vector<8x8xf32>
    %165 = vector.broadcast %163 : vector<1x8xf32> to vector<8x8xf32>
    %166 = arith.mulf %164, %165 : vector<8x8xf32>
    %167 = arith.addf %117, %166 : vector<8x8xf32>
    %c3_i32 = arith.constant 3 : i32
    %168 = arith.index_cast %c3_i32 : i32 to index
    %c0_37 = arith.constant 0 : index
    %c0_38 = arith.constant 0 : index
    %169 = vector.load %arg1[%168, %c0_37, %c0_38] : memref<8x8x128xf32, #tpu.memory_space<vmem>>, vector<1x8x128xf32>
    %170 = vector.shape_cast %169 : vector<1x8x128xf32> to vector<8x128xf32>
    %cst_39 = arith.constant dense<0.000000e+00> : vector<8x384xf32>
    %171 = tpu.matmul %170, %3, %cst_39 {dimension_numbers = #tpu.dot_dimension_numbers<[1], [0], [0], [1], [0, 0, 1, 1], [], []>} : vector<8x128xf32>, vector<128x384xf32>, vector<8x384xf32> -> vector<8x384xf32>
    %172 = arith.addf %171, %7 : vector<8x384xf32>
    %cst_40 = arith.constant dense<0.000000e+00> : vector<8x384xf32>
    %173 = tpu.matmul %156, %4, %cst_40 {dimension_numbers = #tpu.dot_dimension_numbers<[1], [0], [0], [1], [0, 0, 1, 1], [], []>} : vector<8x128xf32>, vector<128x384xf32>, vector<8x384xf32> -> vector<8x384xf32>
    %174 = vector.extract_strided_slice %172 {offsets = [0, 0], sizes = [8, 128], strides = [1, 1]} : vector<8x384xf32> to vector<8x128xf32>
    %175 = vector.extract_strided_slice %173 {offsets = [0, 0], sizes = [8, 128], strides = [1, 1]} : vector<8x384xf32> to vector<8x128xf32>
    %176 = arith.addf %174, %175 : vector<8x128xf32>
    %177 = arith.negf %176 : vector<8x128xf32>
    %178 = math.exp %177 : vector<8x128xf32>
    %cst_41 = arith.constant 1.000000e+00 : f32
    %179 = vector.broadcast %cst_41 : f32 to vector<8x128xf32>
    %180 = arith.addf %179, %178 : vector<8x128xf32>
    %181 = arith.divf %179, %180 : vector<8x128xf32>
    %182 = vector.extract_strided_slice %172 {offsets = [0, 128], sizes = [8, 128], strides = [1, 1]} : vector<8x384xf32> to vector<8x128xf32>
    %183 = vector.extract_strided_slice %173 {offsets = [0, 128], sizes = [8, 128], strides = [1, 1]} : vector<8x384xf32> to vector<8x128xf32>
    %184 = arith.addf %182, %183 : vector<8x128xf32>
    %185 = arith.negf %184 : vector<8x128xf32>
    %186 = math.exp %185 : vector<8x128xf32>
    %cst_42 = arith.constant 1.000000e+00 : f32
    %187 = vector.broadcast %cst_42 : f32 to vector<8x128xf32>
    %188 = arith.addf %187, %186 : vector<8x128xf32>
    %189 = arith.divf %187, %188 : vector<8x128xf32>
    %190 = vector.extract_strided_slice %172 {offsets = [0, 256], sizes = [8, 128], strides = [1, 1]} : vector<8x384xf32> to vector<8x128xf32>
    %191 = vector.extract_strided_slice %173 {offsets = [0, 256], sizes = [8, 128], strides = [1, 1]} : vector<8x384xf32> to vector<8x128xf32>
    %192 = arith.addf %191, %10 : vector<8x128xf32>
    %193 = arith.mulf %181, %192 : vector<8x128xf32>
    %194 = arith.addf %190, %193 : vector<8x128xf32>
    %195 = math.tanh %194 : vector<8x128xf32>
    %196 = arith.subf %156, %195 : vector<8x128xf32>
    %197 = arith.mulf %189, %196 : vector<8x128xf32>
    %198 = arith.addf %195, %197 : vector<8x128xf32>
    %199 = arith.addi %15, %c3_i32 : i32
    %c8_i32_43 = arith.constant 8 : i32
    %200 = arith.cmpi slt, %199, %c8_i32_43 : i32
    %201 = arith.extui %200 : i1 to i32
    %202 = arith.sitofp %201 : i32 to f32
    %203 = arith.subf %198, %156 : vector<8x128xf32>
    %204 = vector.broadcast %202 : f32 to vector<8x128xf32>
    %205 = arith.mulf %204, %203 : vector<8x128xf32>
    %206 = arith.addf %156, %205 : vector<8x128xf32>
    %207 = arith.mulf %206, %13 : vector<8x128xf32>
    %cst_44 = arith.constant dense<0.000000e+00> : vector<8xf32>
    %208 = vector.multi_reduction <add>, %207, %cst_44 [1] : vector<8x128xf32> to vector<8xf32>
    %209 = vector.shape_cast %208 : vector<8xf32> to vector<8x1xf32>
    %210 = vector.broadcast %c3_i32 : i32 to vector<1x8xi32>
    %211 = arith.cmpi eq, %14, %210 : vector<1x8xi32>
    %212 = arith.extui %211 : vector<1x8xi1> to vector<1x8xi32>
    %213 = arith.sitofp %212 : vector<1x8xi32> to vector<1x8xf32>
    %214 = vector.broadcast %209 : vector<8x1xf32> to vector<8x8xf32>
    %215 = vector.broadcast %213 : vector<1x8xf32> to vector<8x8xf32>
    %216 = arith.mulf %214, %215 : vector<8x8xf32>
    %217 = arith.addf %167, %216 : vector<8x8xf32>
    %c4_i32 = arith.constant 4 : i32
    %218 = arith.index_cast %c4_i32 : i32 to index
    %c0_45 = arith.constant 0 : index
    %c0_46 = arith.constant 0 : index
    %219 = vector.load %arg1[%218, %c0_45, %c0_46] : memref<8x8x128xf32, #tpu.memory_space<vmem>>, vector<1x8x128xf32>
    %220 = vector.shape_cast %219 : vector<1x8x128xf32> to vector<8x128xf32>
    %cst_47 = arith.constant dense<0.000000e+00> : vector<8x384xf32>
    %221 = tpu.matmul %220, %3, %cst_47 {dimension_numbers = #tpu.dot_dimension_numbers<[1], [0], [0], [1], [0, 0, 1, 1], [], []>} : vector<8x128xf32>, vector<128x384xf32>, vector<8x384xf32> -> vector<8x384xf32>
    %222 = arith.addf %221, %7 : vector<8x384xf32>
    %cst_48 = arith.constant dense<0.000000e+00> : vector<8x384xf32>
    %223 = tpu.matmul %206, %4, %cst_48 {dimension_numbers = #tpu.dot_dimension_numbers<[1], [0], [0], [1], [0, 0, 1, 1], [], []>} : vector<8x128xf32>, vector<128x384xf32>, vector<8x384xf32> -> vector<8x384xf32>
    %224 = vector.extract_strided_slice %222 {offsets = [0, 0], sizes = [8, 128], strides = [1, 1]} : vector<8x384xf32> to vector<8x128xf32>
    %225 = vector.extract_strided_slice %223 {offsets = [0, 0], sizes = [8, 128], strides = [1, 1]} : vector<8x384xf32> to vector<8x128xf32>
    %226 = arith.addf %224, %225 : vector<8x128xf32>
    %227 = arith.negf %226 : vector<8x128xf32>
    %228 = math.exp %227 : vector<8x128xf32>
    %cst_49 = arith.constant 1.000000e+00 : f32
    %229 = vector.broadcast %cst_49 : f32 to vector<8x128xf32>
    %230 = arith.addf %229, %228 : vector<8x128xf32>
    %231 = arith.divf %229, %230 : vector<8x128xf32>
    %232 = vector.extract_strided_slice %222 {offsets = [0, 128], sizes = [8, 128], strides = [1, 1]} : vector<8x384xf32> to vector<8x128xf32>
    %233 = vector.extract_strided_slice %223 {offsets = [0, 128], sizes = [8, 128], strides = [1, 1]} : vector<8x384xf32> to vector<8x128xf32>
    %234 = arith.addf %232, %233 : vector<8x128xf32>
    %235 = arith.negf %234 : vector<8x128xf32>
    %236 = math.exp %235 : vector<8x128xf32>
    %cst_50 = arith.constant 1.000000e+00 : f32
    %237 = vector.broadcast %cst_50 : f32 to vector<8x128xf32>
    %238 = arith.addf %237, %236 : vector<8x128xf32>
    %239 = arith.divf %237, %238 : vector<8x128xf32>
    %240 = vector.extract_strided_slice %222 {offsets = [0, 256], sizes = [8, 128], strides = [1, 1]} : vector<8x384xf32> to vector<8x128xf32>
    %241 = vector.extract_strided_slice %223 {offsets = [0, 256], sizes = [8, 128], strides = [1, 1]} : vector<8x384xf32> to vector<8x128xf32>
    %242 = arith.addf %241, %10 : vector<8x128xf32>
    %243 = arith.mulf %231, %242 : vector<8x128xf32>
    %244 = arith.addf %240, %243 : vector<8x128xf32>
    %245 = math.tanh %244 : vector<8x128xf32>
    %246 = arith.subf %206, %245 : vector<8x128xf32>
    %247 = arith.mulf %239, %246 : vector<8x128xf32>
    %248 = arith.addf %245, %247 : vector<8x128xf32>
    %249 = arith.addi %15, %c4_i32 : i32
    %c8_i32_51 = arith.constant 8 : i32
    %250 = arith.cmpi slt, %249, %c8_i32_51 : i32
    %251 = arith.extui %250 : i1 to i32
    %252 = arith.sitofp %251 : i32 to f32
    %253 = arith.subf %248, %206 : vector<8x128xf32>
    %254 = vector.broadcast %252 : f32 to vector<8x128xf32>
    %255 = arith.mulf %254, %253 : vector<8x128xf32>
    %256 = arith.addf %206, %255 : vector<8x128xf32>
    %257 = arith.mulf %256, %13 : vector<8x128xf32>
    %cst_52 = arith.constant dense<0.000000e+00> : vector<8xf32>
    %258 = vector.multi_reduction <add>, %257, %cst_52 [1] : vector<8x128xf32> to vector<8xf32>
    %259 = vector.shape_cast %258 : vector<8xf32> to vector<8x1xf32>
    %260 = vector.broadcast %c4_i32 : i32 to vector<1x8xi32>
    %261 = arith.cmpi eq, %14, %260 : vector<1x8xi32>
    %262 = arith.extui %261 : vector<1x8xi1> to vector<1x8xi32>
    %263 = arith.sitofp %262 : vector<1x8xi32> to vector<1x8xf32>
    %264 = vector.broadcast %259 : vector<8x1xf32> to vector<8x8xf32>
    %265 = vector.broadcast %263 : vector<1x8xf32> to vector<8x8xf32>
    %266 = arith.mulf %264, %265 : vector<8x8xf32>
    %267 = arith.addf %217, %266 : vector<8x8xf32>
    %c5_i32 = arith.constant 5 : i32
    %268 = arith.index_cast %c5_i32 : i32 to index
    %c0_53 = arith.constant 0 : index
    %c0_54 = arith.constant 0 : index
    %269 = vector.load %arg1[%268, %c0_53, %c0_54] : memref<8x8x128xf32, #tpu.memory_space<vmem>>, vector<1x8x128xf32>
    %270 = vector.shape_cast %269 : vector<1x8x128xf32> to vector<8x128xf32>
    %cst_55 = arith.constant dense<0.000000e+00> : vector<8x384xf32>
    %271 = tpu.matmul %270, %3, %cst_55 {dimension_numbers = #tpu.dot_dimension_numbers<[1], [0], [0], [1], [0, 0, 1, 1], [], []>} : vector<8x128xf32>, vector<128x384xf32>, vector<8x384xf32> -> vector<8x384xf32>
    %272 = arith.addf %271, %7 : vector<8x384xf32>
    %cst_56 = arith.constant dense<0.000000e+00> : vector<8x384xf32>
    %273 = tpu.matmul %256, %4, %cst_56 {dimension_numbers = #tpu.dot_dimension_numbers<[1], [0], [0], [1], [0, 0, 1, 1], [], []>} : vector<8x128xf32>, vector<128x384xf32>, vector<8x384xf32> -> vector<8x384xf32>
    %274 = vector.extract_strided_slice %272 {offsets = [0, 0], sizes = [8, 128], strides = [1, 1]} : vector<8x384xf32> to vector<8x128xf32>
    %275 = vector.extract_strided_slice %273 {offsets = [0, 0], sizes = [8, 128], strides = [1, 1]} : vector<8x384xf32> to vector<8x128xf32>
    %276 = arith.addf %274, %275 : vector<8x128xf32>
    %277 = arith.negf %276 : vector<8x128xf32>
    %278 = math.exp %277 : vector<8x128xf32>
    %cst_57 = arith.constant 1.000000e+00 : f32
    %279 = vector.broadcast %cst_57 : f32 to vector<8x128xf32>
    %280 = arith.addf %279, %278 : vector<8x128xf32>
    %281 = arith.divf %279, %280 : vector<8x128xf32>
    %282 = vector.extract_strided_slice %272 {offsets = [0, 128], sizes = [8, 128], strides = [1, 1]} : vector<8x384xf32> to vector<8x128xf32>
    %283 = vector.extract_strided_slice %273 {offsets = [0, 128], sizes = [8, 128], strides = [1, 1]} : vector<8x384xf32> to vector<8x128xf32>
    %284 = arith.addf %282, %283 : vector<8x128xf32>
    %285 = arith.negf %284 : vector<8x128xf32>
    %286 = math.exp %285 : vector<8x128xf32>
    %cst_58 = arith.constant 1.000000e+00 : f32
    %287 = vector.broadcast %cst_58 : f32 to vector<8x128xf32>
    %288 = arith.addf %287, %286 : vector<8x128xf32>
    %289 = arith.divf %287, %288 : vector<8x128xf32>
    %290 = vector.extract_strided_slice %272 {offsets = [0, 256], sizes = [8, 128], strides = [1, 1]} : vector<8x384xf32> to vector<8x128xf32>
    %291 = vector.extract_strided_slice %273 {offsets = [0, 256], sizes = [8, 128], strides = [1, 1]} : vector<8x384xf32> to vector<8x128xf32>
    %292 = arith.addf %291, %10 : vector<8x128xf32>
    %293 = arith.mulf %281, %292 : vector<8x128xf32>
    %294 = arith.addf %290, %293 : vector<8x128xf32>
    %295 = math.tanh %294 : vector<8x128xf32>
    %296 = arith.subf %256, %295 : vector<8x128xf32>
    %297 = arith.mulf %289, %296 : vector<8x128xf32>
    %298 = arith.addf %295, %297 : vector<8x128xf32>
    %299 = arith.addi %15, %c5_i32 : i32
    %c8_i32_59 = arith.constant 8 : i32
    %300 = arith.cmpi slt, %299, %c8_i32_59 : i32
    %301 = arith.extui %300 : i1 to i32
    %302 = arith.sitofp %301 : i32 to f32
    %303 = arith.subf %298, %256 : vector<8x128xf32>
    %304 = vector.broadcast %302 : f32 to vector<8x128xf32>
    %305 = arith.mulf %304, %303 : vector<8x128xf32>
    %306 = arith.addf %256, %305 : vector<8x128xf32>
    %307 = arith.mulf %306, %13 : vector<8x128xf32>
    %cst_60 = arith.constant dense<0.000000e+00> : vector<8xf32>
    %308 = vector.multi_reduction <add>, %307, %cst_60 [1] : vector<8x128xf32> to vector<8xf32>
    %309 = vector.shape_cast %308 : vector<8xf32> to vector<8x1xf32>
    %310 = vector.broadcast %c5_i32 : i32 to vector<1x8xi32>
    %311 = arith.cmpi eq, %14, %310 : vector<1x8xi32>
    %312 = arith.extui %311 : vector<1x8xi1> to vector<1x8xi32>
    %313 = arith.sitofp %312 : vector<1x8xi32> to vector<1x8xf32>
    %314 = vector.broadcast %309 : vector<8x1xf32> to vector<8x8xf32>
    %315 = vector.broadcast %313 : vector<1x8xf32> to vector<8x8xf32>
    %316 = arith.mulf %314, %315 : vector<8x8xf32>
    %317 = arith.addf %267, %316 : vector<8x8xf32>
    %c6_i32 = arith.constant 6 : i32
    %318 = arith.index_cast %c6_i32 : i32 to index
    %c0_61 = arith.constant 0 : index
    %c0_62 = arith.constant 0 : index
    %319 = vector.load %arg1[%318, %c0_61, %c0_62] : memref<8x8x128xf32, #tpu.memory_space<vmem>>, vector<1x8x128xf32>
    %320 = vector.shape_cast %319 : vector<1x8x128xf32> to vector<8x128xf32>
    %cst_63 = arith.constant dense<0.000000e+00> : vector<8x384xf32>
    %321 = tpu.matmul %320, %3, %cst_63 {dimension_numbers = #tpu.dot_dimension_numbers<[1], [0], [0], [1], [0, 0, 1, 1], [], []>} : vector<8x128xf32>, vector<128x384xf32>, vector<8x384xf32> -> vector<8x384xf32>
    %322 = arith.addf %321, %7 : vector<8x384xf32>
    %cst_64 = arith.constant dense<0.000000e+00> : vector<8x384xf32>
    %323 = tpu.matmul %306, %4, %cst_64 {dimension_numbers = #tpu.dot_dimension_numbers<[1], [0], [0], [1], [0, 0, 1, 1], [], []>} : vector<8x128xf32>, vector<128x384xf32>, vector<8x384xf32> -> vector<8x384xf32>
    %324 = vector.extract_strided_slice %322 {offsets = [0, 0], sizes = [8, 128], strides = [1, 1]} : vector<8x384xf32> to vector<8x128xf32>
    %325 = vector.extract_strided_slice %323 {offsets = [0, 0], sizes = [8, 128], strides = [1, 1]} : vector<8x384xf32> to vector<8x128xf32>
    %326 = arith.addf %324, %325 : vector<8x128xf32>
    %327 = arith.negf %326 : vector<8x128xf32>
    %328 = math.exp %327 : vector<8x128xf32>
    %cst_65 = arith.constant 1.000000e+00 : f32
    %329 = vector.broadcast %cst_65 : f32 to vector<8x128xf32>
    %330 = arith.addf %329, %328 : vector<8x128xf32>
    %331 = arith.divf %329, %330 : vector<8x128xf32>
    %332 = vector.extract_strided_slice %322 {offsets = [0, 128], sizes = [8, 128], strides = [1, 1]} : vector<8x384xf32> to vector<8x128xf32>
    %333 = vector.extract_strided_slice %323 {offsets = [0, 128], sizes = [8, 128], strides = [1, 1]} : vector<8x384xf32> to vector<8x128xf32>
    %334 = arith.addf %332, %333 : vector<8x128xf32>
    %335 = arith.negf %334 : vector<8x128xf32>
    %336 = math.exp %335 : vector<8x128xf32>
    %cst_66 = arith.constant 1.000000e+00 : f32
    %337 = vector.broadcast %cst_66 : f32 to vector<8x128xf32>
    %338 = arith.addf %337, %336 : vector<8x128xf32>
    %339 = arith.divf %337, %338 : vector<8x128xf32>
    %340 = vector.extract_strided_slice %322 {offsets = [0, 256], sizes = [8, 128], strides = [1, 1]} : vector<8x384xf32> to vector<8x128xf32>
    %341 = vector.extract_strided_slice %323 {offsets = [0, 256], sizes = [8, 128], strides = [1, 1]} : vector<8x384xf32> to vector<8x128xf32>
    %342 = arith.addf %341, %10 : vector<8x128xf32>
    %343 = arith.mulf %331, %342 : vector<8x128xf32>
    %344 = arith.addf %340, %343 : vector<8x128xf32>
    %345 = math.tanh %344 : vector<8x128xf32>
    %346 = arith.subf %306, %345 : vector<8x128xf32>
    %347 = arith.mulf %339, %346 : vector<8x128xf32>
    %348 = arith.addf %345, %347 : vector<8x128xf32>
    %349 = arith.addi %15, %c6_i32 : i32
    %c8_i32_67 = arith.constant 8 : i32
    %350 = arith.cmpi slt, %349, %c8_i32_67 : i32
    %351 = arith.extui %350 : i1 to i32
    %352 = arith.sitofp %351 : i32 to f32
    %353 = arith.subf %348, %306 : vector<8x128xf32>
    %354 = vector.broadcast %352 : f32 to vector<8x128xf32>
    %355 = arith.mulf %354, %353 : vector<8x128xf32>
    %356 = arith.addf %306, %355 : vector<8x128xf32>
    %357 = arith.mulf %356, %13 : vector<8x128xf32>
    %cst_68 = arith.constant dense<0.000000e+00> : vector<8xf32>
    %358 = vector.multi_reduction <add>, %357, %cst_68 [1] : vector<8x128xf32> to vector<8xf32>
    %359 = vector.shape_cast %358 : vector<8xf32> to vector<8x1xf32>
    %360 = vector.broadcast %c6_i32 : i32 to vector<1x8xi32>
    %361 = arith.cmpi eq, %14, %360 : vector<1x8xi32>
    %362 = arith.extui %361 : vector<1x8xi1> to vector<1x8xi32>
    %363 = arith.sitofp %362 : vector<1x8xi32> to vector<1x8xf32>
    %364 = vector.broadcast %359 : vector<8x1xf32> to vector<8x8xf32>
    %365 = vector.broadcast %363 : vector<1x8xf32> to vector<8x8xf32>
    %366 = arith.mulf %364, %365 : vector<8x8xf32>
    %367 = arith.addf %317, %366 : vector<8x8xf32>
    %c7_i32 = arith.constant 7 : i32
    %368 = arith.index_cast %c7_i32 : i32 to index
    %c0_69 = arith.constant 0 : index
    %c0_70 = arith.constant 0 : index
    %369 = vector.load %arg1[%368, %c0_69, %c0_70] : memref<8x8x128xf32, #tpu.memory_space<vmem>>, vector<1x8x128xf32>
    %370 = vector.shape_cast %369 : vector<1x8x128xf32> to vector<8x128xf32>
    %cst_71 = arith.constant dense<0.000000e+00> : vector<8x384xf32>
    %371 = tpu.matmul %370, %3, %cst_71 {dimension_numbers = #tpu.dot_dimension_numbers<[1], [0], [0], [1], [0, 0, 1, 1], [], []>} : vector<8x128xf32>, vector<128x384xf32>, vector<8x384xf32> -> vector<8x384xf32>
    %372 = arith.addf %371, %7 : vector<8x384xf32>
    %cst_72 = arith.constant dense<0.000000e+00> : vector<8x384xf32>
    %373 = tpu.matmul %356, %4, %cst_72 {dimension_numbers = #tpu.dot_dimension_numbers<[1], [0], [0], [1], [0, 0, 1, 1], [], []>} : vector<8x128xf32>, vector<128x384xf32>, vector<8x384xf32> -> vector<8x384xf32>
    %374 = vector.extract_strided_slice %372 {offsets = [0, 0], sizes = [8, 128], strides = [1, 1]} : vector<8x384xf32> to vector<8x128xf32>
    %375 = vector.extract_strided_slice %373 {offsets = [0, 0], sizes = [8, 128], strides = [1, 1]} : vector<8x384xf32> to vector<8x128xf32>
    %376 = arith.addf %374, %375 : vector<8x128xf32>
    %377 = arith.negf %376 : vector<8x128xf32>
    %378 = math.exp %377 : vector<8x128xf32>
    %cst_73 = arith.constant 1.000000e+00 : f32
    %379 = vector.broadcast %cst_73 : f32 to vector<8x128xf32>
    %380 = arith.addf %379, %378 : vector<8x128xf32>
    %381 = arith.divf %379, %380 : vector<8x128xf32>
    %382 = vector.extract_strided_slice %372 {offsets = [0, 128], sizes = [8, 128], strides = [1, 1]} : vector<8x384xf32> to vector<8x128xf32>
    %383 = vector.extract_strided_slice %373 {offsets = [0, 128], sizes = [8, 128], strides = [1, 1]} : vector<8x384xf32> to vector<8x128xf32>
    %384 = arith.addf %382, %383 : vector<8x128xf32>
    %385 = arith.negf %384 : vector<8x128xf32>
    %386 = math.exp %385 : vector<8x128xf32>
    %cst_74 = arith.constant 1.000000e+00 : f32
    %387 = vector.broadcast %cst_74 : f32 to vector<8x128xf32>
    %388 = arith.addf %387, %386 : vector<8x128xf32>
    %389 = arith.divf %387, %388 : vector<8x128xf32>
    %390 = vector.extract_strided_slice %372 {offsets = [0, 256], sizes = [8, 128], strides = [1, 1]} : vector<8x384xf32> to vector<8x128xf32>
    %391 = vector.extract_strided_slice %373 {offsets = [0, 256], sizes = [8, 128], strides = [1, 1]} : vector<8x384xf32> to vector<8x128xf32>
    %392 = arith.addf %391, %10 : vector<8x128xf32>
    %393 = arith.mulf %381, %392 : vector<8x128xf32>
    %394 = arith.addf %390, %393 : vector<8x128xf32>
    %395 = math.tanh %394 : vector<8x128xf32>
    %396 = arith.subf %356, %395 : vector<8x128xf32>
    %397 = arith.mulf %389, %396 : vector<8x128xf32>
    %398 = arith.addf %395, %397 : vector<8x128xf32>
    %399 = arith.addi %15, %c7_i32 : i32
    %c8_i32_75 = arith.constant 8 : i32
    %400 = arith.cmpi slt, %399, %c8_i32_75 : i32
    %401 = arith.extui %400 : i1 to i32
    %402 = arith.sitofp %401 : i32 to f32
    %403 = arith.subf %398, %356 : vector<8x128xf32>
    %404 = vector.broadcast %402 : f32 to vector<8x128xf32>
    %405 = arith.mulf %404, %403 : vector<8x128xf32>
    %406 = arith.addf %356, %405 : vector<8x128xf32>
    %407 = arith.mulf %406, %13 : vector<8x128xf32>
    %cst_76 = arith.constant dense<0.000000e+00> : vector<8xf32>
    %408 = vector.multi_reduction <add>, %407, %cst_76 [1] : vector<8x128xf32> to vector<8xf32>
    %409 = vector.shape_cast %408 : vector<8xf32> to vector<8x1xf32>
    %410 = vector.broadcast %c7_i32 : i32 to vector<1x8xi32>
    %411 = arith.cmpi eq, %14, %410 : vector<1x8xi32>
    %412 = arith.extui %411 : vector<1x8xi1> to vector<1x8xi32>
    %413 = arith.sitofp %412 : vector<1x8xi32> to vector<1x8xf32>
    %414 = vector.broadcast %409 : vector<8x1xf32> to vector<8x8xf32>
    %415 = vector.broadcast %413 : vector<1x8xf32> to vector<8x8xf32>
    %416 = arith.mulf %414, %415 : vector<8x8xf32>
    %417 = arith.addf %367, %416 : vector<8x8xf32>
    %c8_i32_77 = arith.constant 8 : i32
    %c0_78 = arith.constant 0 : index
    %c0_79 = arith.constant 0 : index
    %418 = vector.load %arg10[%c0_78, %c0_79] : memref<8x128xf32, #tpu.memory_space<vmem>>, vector<8x128xf32>
    tpu.vector_store %arg10[%c0_78, %c0_79], %406 {strides = array<i32>} : memref<8x128xf32, #tpu.memory_space<vmem>>, vector<8x128xf32>,
    %c0_80 = arith.constant 0 : index
    %c0_81 = arith.constant 0 : index
    %419 = vector.load %arg8[%c0_80, %c0_81] : memref<8x8xf32, #tpu.memory_space<vmem>>, vector<8x8xf32>
    tpu.vector_store %arg8[%c0_80, %c0_81], %417 {strides = array<i32>} : memref<8x8xf32, #tpu.memory_space<vmem>>, vector<8x8xf32>,
    %c0_i32_82 = arith.constant 0 : i32
    %420 = arith.cmpi eq, %arg0, %c0_i32_82 : i32
    %421 = arith.extui %420 : i1 to i32
    %c0_i32_83 = arith.constant 0 : i32
    %422 = arith.cmpi ne, %421, %c0_i32_83 : i32
    scf.if %422 {
      %c0_84 = arith.constant 0 : index
      %c0_85 = arith.constant 0 : index
      %423 = vector.load %arg9[%c0_84, %c0_85] : memref<8x128xf32, #tpu.memory_space<vmem>>, vector<8x128xf32>
      tpu.vector_store %arg9[%c0_84, %c0_85], %406 {strides = array<i32>} : memref<8x128xf32, #tpu.memory_space<vmem>>, vector<8x128xf32>,
    } else {
    }
    return
  }
  func.func @transform_0(%arg0: i32) -> (i32, i32, i32) {
    %c0_i32 = arith.constant 0 : i32
    %c0_i32_0 = arith.constant 0 : i32
    %c0_i32_1 = arith.constant 0 : i32
    return %arg0, %c0_i32, %c0_i32_0 : i32, i32, i32
  }
  func.func @transform_1(%arg0: i32) -> (i32, i32) {
    %c0_i32 = arith.constant 0 : i32
    %c0_i32_0 = arith.constant 0 : i32
    %c0_i32_1 = arith.constant 0 : i32
    return %c0_i32, %c0_i32_0 : i32, i32
  }
  func.func @transform_2(%arg0: i32) -> (i32, i32) {
    %c0_i32 = arith.constant 0 : i32
    %c0_i32_0 = arith.constant 0 : i32
    %c0_i32_1 = arith.constant 0 : i32
    return %c0_i32, %c0_i32_0 : i32, i32
  }
  func.func @transform_3(%arg0: i32) -> (i32, i32) {
    %c0_i32 = arith.constant 0 : i32
    %c0_i32_0 = arith.constant 0 : i32
    %c0_i32_1 = arith.constant 0 : i32
    return %c0_i32, %c0_i32_0 : i32, i32
  }
  func.func @transform_4(%arg0: i32) -> (i32, i32) {
    %c0_i32 = arith.constant 0 : i32
    %c0_i32_0 = arith.constant 0 : i32
    %c0_i32_1 = arith.constant 0 : i32
    return %c0_i32, %c0_i32_0 : i32, i32
  }
  func.func @transform_5(%arg0: i32) -> (i32, i32) {
    %c0_i32 = arith.constant 0 : i32
    %c0_i32_0 = arith.constant 0 : i32
    %c0_i32_1 = arith.constant 0 : i32
    return %c0_i32, %c0_i32_0 : i32, i32
  }
  func.func @transform_6(%arg0: i32) -> (i32, i32) {
    %c0_i32 = arith.constant 0 : i32
    %c0_i32_0 = arith.constant 0 : i32
    %c0_i32_1 = arith.constant 0 : i32
    return %c0_i32, %c0_i32_0 : i32, i32
  }
  func.func @transform_7(%arg0: i32) -> (i32, i32) {
    %c0_i32 = arith.constant 0 : i32
    %c0_i32_0 = arith.constant 0 : i32
    return %c0_i32, %arg0 : i32, i32
  }
  func.func @transform_8(%arg0: i32) -> (i32, i32) {
    %c0_i32 = arith.constant 0 : i32
    %c0_i32_0 = arith.constant 0 : i32
    %c0_i32_1 = arith.constant 0 : i32
    return %c0_i32, %c0_i32_0 : i32, i32
  }
}

</mosaic_0001>

<bundles_post_ra>
// kernel: gru_forward.1
= control target key start
LH: loop header
LB: loop body
LE: loop exit
PB: predicated region body
PF: predicated region fallthrough
CT: control target
= control target key end

     0   :  { %v5795_v3 = vmov 0.0|0.0   ;;  %v5792_v4 = vmov 0.0   ;;  %vm4626_vm0 = vmmov 0   ;;  %vm2732_vm9 = vcmask 64512   ;;  %s5783_s1 = inlined_call_operand.vmem [shape: f32[128,384], index: 1, kind: input, shape index: {}]   ;;  %s5784_s2 = inlined_call_operand.vmem [shape: f32[128,384], index: 2, kind: input, shape index: {}]   ;;  %s5785_s0 = inlined_call_operand.vmem [shape: f32[8,8,128], index: 0, kind: input, shape index: {}]   ;;  %s5786_s6 = inlined_call_operand.vmem [shape: f32[8,128], index: 6, kind: input, shape index: {}]   ;;  %s5787_s3 = inlined_call_operand.vmem [shape: f32[1,384], index: 3, kind: input, shape index: {}]   ;;  %s5788_s4 = inlined_call_operand.vmem [shape: f32[1,128], index: 4, kind: input, shape index: {}]   ;;  %s5789_s5 = inlined_call_operand.vmem [shape: f32[1,128], index: 5, kind: input, shape index: {}]   ;;  %s5790_s8 = inlined_call_operand.vmem [shape: f32[8,128], index: 8, kind: output, shape index: {1}]   ;;  %s5791_s7 = inlined_call_operand.vmem [shape: f32[8,8], index: 7, kind: output, shape index: {0}]  }
   0x1   :  { %v35_v0 = vld [vmem:[%s5783_s1 + $0x8] sm:$0xff]  ;;  %v38_v1 = vld [vmem:[%s5783_s1 + $0x20] sm:$0xff]  ;;  %3643 = vmatprep.subr.bf16.mxu1 %v5795_v3  ;;  %230 = vmatprep.mubr.f32.mxu0 %v5792_v4  ;;  %v37_v6 = vld [vmem:[%s5783_s1 + $0x18] sm:$0xff] }
   0x2   :  { %v34_v2 = vld [vmem:[%s5783_s1] sm:$0xff]  ;;  %v4683_v5 = vpack.c.bf16 %v38_v1, %v35_v0  ;;  %v41_v7 = vld [vmem:[%s5783_s1 + $0x38] sm:$0xff]  ;;  %v44_v8 = vld [vmem:[%s5783_s1 + $0x50] sm:$0xff]  ;;  %3083 = vmatprep.mubr.msk.f32.mxu1 %vm4626_vm0, %v5792_v4 }
   0x3   :  { %v4696_v9 = vpack.c.bf16 %v37_v6, %v34_v2  ;;  %v4698_v10 = vpack.c.bf16 %v44_v8, %v41_v7  ;;  %v40_v11 = vld [vmem:[%s5783_s1 + $0x30] sm:$0xff]  ;;  %v43_v12 = vld [vmem:[%s5783_s1 + $0x48] sm:$0xff]  ;;  %v50_v14 = vld [vmem:[%s5783_s1 + $0x80] sm:$0xff] }
   0x4   :  { %5821 = vst [vmem:[#allocation3_spill] sm:$0xff] %v4683_v5  ;;  %v47_v13 = vld [vmem:[%s5783_s1 + $0x68] sm:$0xff]  ;;  %3612 = vmatprep.subr.bf16.mxu0 %v4683_v5  ;;  %v4714_v15 = vpack.c.bf16 %v43_v12, %v40_v11  ;;  %v46_v17 = vld [vmem:[%s5783_s1 + $0x60] sm:$0xff]  ;;  %v49_v18 = vld [vmem:[%s5783_s1 + $0x78] sm:$0xff] }
   0x5   :  { %3614 = vmatpush1.bf16.msra.mxu0 %v4696_v9  ;;  %v4717_v16 = vpack.c.bf16 %v50_v14, %v47_v13  ;;  %v53_v19 = vld [vmem:[%s5783_s1 + $0x98] sm:$0xff]  ;;  %v56_v20 = vld [vmem:[%s5783_s1 + $0xb0] sm:$0xff]  ;;  %v4732_v21 = vpack.c.bf16 %v49_v18, %v46_v17  ;;  %v55_v24 = vld [vmem:[%s5783_s1 + $0xa8] sm:$0xff] }
   0x6   :  { %3616 = vmatprep.subr.bf16.mxu0 %v4698_v10  ;;  %v52_v22 = vld [vmem:[%s5783_s1 + $0x90] sm:$0xff]  ;;  %v4738_v23 = vpack.c.bf16 %v56_v20, %v53_v19  ;;  %v39_v26 = vld [vmem:[%s5783_s1 + $0x28] sm:$0xff]  ;;  %v62_v28 = vld [vmem:[%s5783_s1 + $0xe0] sm:$0xff] }
   0x7   :  { %v36_v25 = vld [vmem:[%s5783_s1 + $0x10] sm:$0xff]  ;;  %v59_v27 = vld [vmem:[%s5783_s1 + $0xc8] sm:$0xff]  ;;  %v42_v30 = vld [vmem:[%s5783_s1 + $0x40] sm:$0xff]  ;;  %v4764_v32 = vpack.c.bf16 %v55_v24, %v52_v22 }
   0x8   :  { %v4755_v29 = vpack.c.bf16 %v39_v26, %v36_v25  ;;  %v45_v31 = vld [vmem:[%s5783_s1 + $0x58] sm:$0xff]  ;;  %v4770_v34 = vpack.c.bf16 %v62_v28, %v59_v27  ;;  %v58_v35 = vld [vmem:[%s5783_s1 + $0xc0] sm:$0xff]  ;;  %v48_v37 = vld [vmem:[%s5783_s1 + $0x70] sm:$0xff] }
   0x9   :  { %3618 = vmatpush1.bf16.msra.mxu0 %v4714_v15  ;;  %v4767_v33 = vpack.c.bf16 %v45_v31, %v42_v30  ;;  %v61_v36 = vld [vmem:[%s5783_s1 + $0xd8] sm:$0xff]  ;;  %v68_v39 = vld [vmem:[%s5783_s1 + $0x110] sm:$0xff]  ;;  %v51_v40 = vld [vmem:[%s5783_s1 + $0x88] sm:$0xff] }
   0xa   :  { %3620 = vmatprep.subr.bf16.mxu0 %v4717_v16  ;;  %3645 = vmatpush3.bf16.msra.mxu1 %v4755_v29  ;;  %v65_v38 = vld [vmem:[%s5783_s1 + $0xf8] sm:$0xff]  ;;  %v4792_v41 = vpack.c.bf16 %v61_v36, %v58_v35  ;;  %v64_v42 = vld [vmem:[%s5783_s1 + $0xf0] sm:$0xff]  ;;  %v4798_v43 = vpack.c.bf16 %v51_v40, %v48_v37  ;;  %v67_v45 = vld [vmem:[%s5783_s1 + $0x108] sm:$0xff] }
   0xb   :  { %3646 = vmatprep.subr.bf16.mxu1 %v5795_v3  ;;  %v4801_v44 = vpack.c.bf16 %v68_v39, %v65_v38  ;;  %v54_v46 = vld [vmem:[%s5783_s1 + $0xa0] sm:$0xff]  ;;  %v57_v47 = vld [vmem:[%s5783_s1 + $0xb8] sm:$0xff]  ;;  %v71_v48 = vld [vmem:[%s5783_s1 + $0x128] sm:$0xff]  ;;  %v4820_v50 = vpack.c.bf16 %v67_v45, %v64_v42 }
   0xc   :  { %v74_v49 = vld [vmem:[%s5783_s1 + $0x140] sm:$0xff]  ;;  %v4826_v52 = vpack.c.bf16 %v57_v47, %v54_v46  ;;  %v73_v54 = vld [vmem:[%s5783_s1 + $0x138] sm:$0xff]  ;;  %v60_v55 = vld [vmem:[%s5783_s1 + $0xd0] sm:$0xff] }
   0xd   :  { %3622 = vmatpush1.bf16.msra.mxu0 %v4732_v21  ;;  %v70_v51 = vld [vmem:[%s5783_s1 + $0x120] sm:$0xff]  ;;  %v4829_v53 = vpack.c.bf16 %v74_v49, %v71_v48  ;;  %v63_v56 = vld [vmem:[%s5783_s1 + $0xe8] sm:$0xff]  ;;  %v77_v57 = vld [vmem:[%s5783_s1 + $0x158] sm:$0xff] }
   0xe   :  { %3624 = vmatprep.subr.bf16.mxu0 %v4738_v23  ;;  %3648 = vmatpush3.bf16.msra.mxu1 %v4767_v33  ;;  %v80_v58 = vld [vmem:[%s5783_s1 + $0x170] sm:$0xff]  ;;  %v4848_v59 = vpack.c.bf16 %v73_v54, %v70_v51  ;;  %v4854_v61 = vpack.c.bf16 %v63_v56, %v60_v55  ;;  %v79_v63 = vld [vmem:[%s5783_s1 + $0x168] sm:$0xff]  ;;  %v66_v0 = vld [vmem:[%s5783_s1 + $0x100] sm:$0xff] }
   0xf   :  { %3649 = vmatprep.subr.bf16.mxu1 %v5795_v3  ;;  %v76_v60 = vld [vmem:[%s5783_s1 + $0x150] sm:$0xff]  ;;  %v4857_v62 = vpack.c.bf16 %v80_v58, %v77_v57  ;;  %v69_v1 = vld [vmem:[%s5783_s1 + $0x118] sm:$0xff]  ;;  %v83_v2 = vld [vmem:[%s5784_s2 + $0x8] sm:$0xff] }
  0x10   :  { %v86_v6 = vld [vmem:[%s5784_s2 + $0x20] sm:$0xff]  ;;  %v4876_v7 = vpack.c.bf16 %v79_v63, %v76_v60  ;;  %v4882_v11 = vpack.c.bf16 %v69_v1, %v66_v0  ;;  %v85_v13 = vld [vmem:[%s5784_s2 + $0x18] sm:$0xff]  ;;  %v72_v14 = vld [vmem:[%s5783_s1 + $0x130] sm:$0xff] }
  0x11   :  { %3626 = vmatpush1.bf16.msra.mxu0 %v4764_v32  ;;  %v82_v8 = vld [vmem:[%s5784_s2] sm:$0xff]  ;;  %v4885_v12 = vpack.c.bf16 %v86_v6, %v83_v2  ;;  %v75_v17 = vld [vmem:[%s5783_s1 + $0x148] sm:$0xff]  ;;  %v89_v18 = vld [vmem:[%s5784_s2 + $0x38] sm:$0xff] }
  0x12   :  { %3628 = vmatprep.subr.bf16.mxu0 %v4770_v34  ;;  %3651 = vmatpush3.bf16.msra.mxu1 %v4798_v43  ;;  %v92_v19 = vld [vmem:[%s5784_s2 + $0x50] sm:$0xff]  ;;  %v165_v20 = vld [vmem:[%s5785_s0] sm:$0xff]  ;;  %v4907_v22 = vpack.c.bf16 %v85_v13, %v82_v8  ;;  %v4913_v25 = vpack.c.bf16 %v75_v17, %v72_v14  ;;  %v91_v27 = vld [vmem:[%s5784_s2 + $0x48] sm:$0xff] }
  0x13   :  { %3652 = vmatprep.subr.bf16.mxu1 %v5795_v3  ;;  %v88_v24 = vld [vmem:[%s5784_s2 + $0x30] sm:$0xff]  ;;  %v4916_v26 = vpack.c.bf16 %v92_v19, %v89_v18  ;;  %v78_v28 = vld [vmem:[%s5783_s1 + $0x160] sm:$0xff]  ;;  %v81_v30 = vld [vmem:[%s5783_s1 + $0x178] sm:$0xff] }
  0x14   :  { %v95_v31 = vld [vmem:[%s5784_s2 + $0x68] sm:$0xff]  ;;  %v98_v35 = vld [vmem:[%s5784_s2 + $0x80] sm:$0xff]  ;;  %v4935_v36 = vpack.c.bf16 %v91_v27, %v88_v24  ;;  %v4941_v38 = vpack.c.bf16 %v81_v30, %v78_v28  ;;  %v97_v40 = vld [vmem:[%s5784_s2 + $0x78] sm:$0xff] }
  0x15   :  { %3630 = vmatpush1.bf16.msra.mxu0 %v4792_v41  ;;  %v94_v37 = vld [vmem:[%s5784_s2 + $0x60] sm:$0xff]  ;;  %v4944_v39 = vpack.c.bf16 %v98_v35, %v95_v31  ;;  %v84_v42 = vld [vmem:[%s5784_s2 + $0x10] sm:$0xff]  ;;  %v87_v45 = vld [vmem:[%s5784_s2 + $0x28] sm:$0xff] }
  0x16   :  { %3632 = vmatprep.subr.bf16.mxu0 %v4801_v44  ;;  %3654 = vmatpush3.bf16.msra.mxu1 %v4826_v52  ;;  %v101_v46 = vld [vmem:[%s5784_s2 + $0x98] sm:$0xff]  ;;  %v104_v47 = vld [vmem:[%s5784_s2 + $0xb0] sm:$0xff]  ;;  %v4964_v48 = vpack.c.bf16 %v97_v40, %v94_v37  ;;  %v4970_v51 = vpack.c.bf16 %v87_v45, %v84_v42  ;;  %v103_v55 = vld [vmem:[%s5784_s2 + $0xa8] sm:$0xff] }
  0x17   :  { %3655 = vmatprep.subr.bf16.mxu1 %v5795_v3  ;;  %v100_v49 = vld [vmem:[%s5784_s2 + $0x90] sm:$0xff]  ;;  %v4973_v54 = vpack.c.bf16 %v104_v47, %v101_v46  ;;  %v90_v56 = vld [vmem:[%s5784_s2 + $0x40] sm:$0xff]  ;;  %v93_v57 = vld [vmem:[%s5784_s2 + $0x58] sm:$0xff] }
  0x18   :  { %v107_v58 = vld [vmem:[%s5784_s2 + $0xc8] sm:$0xff]  ;;  %v110_v60 = vld [vmem:[%s5784_s2 + $0xe0] sm:$0xff]  ;;  %v4992_v63 = vpack.c.bf16 %v103_v55, %v100_v49  ;;  %v4998_v1 = vpack.c.bf16 %v93_v57, %v90_v56  ;;  %v109_v6 = vld [vmem:[%s5784_s2 + $0xd8] sm:$0xff] }
  0x19   :  { %3634 = vmatpush1.bf16.msra.mxu0 %v4820_v50  ;;  %v106_v0 = vld [vmem:[%s5784_s2 + $0xc0] sm:$0xff]  ;;  %v5001_v2 = vpack.c.bf16 %v110_v60, %v107_v58  ;;  %v96_v8 = vld [vmem:[%s5784_s2 + $0x70] sm:$0xff]  ;;  %v99_v13 = vld [vmem:[%s5784_s2 + $0x88] sm:$0xff] }
  0x1a   :  { %3636 = vmatprep.subr.bf16.mxu0 %v4829_v53  ;;  %3657 = vmatpush3.bf16.msra.mxu1 %v4854_v61  ;;  %v113_v14 = vld [vmem:[%s5784_s2 + $0xf8] sm:$0xff]  ;;  %v116_v17 = vld [vmem:[%s5784_s2 + $0x110] sm:$0xff]  ;;  %v5022_v18 = vpack.c.bf16 %v109_v6, %v106_v0  ;;  %v115_v27 = vld [vmem:[%s5784_s2 + $0x108] sm:$0xff] }
  0x1b   :  { %3658 = vmatprep.subr.bf16.mxu1 %v5795_v3  ;;  %v112_v19 = vld [vmem:[%s5784_s2 + $0xf0] sm:$0xff]  ;;  %v5031_v24 = vpack.c.bf16 %v116_v17, %v113_v14  ;;  %v102_v28 = vld [vmem:[%s5784_s2 + $0xa0] sm:$0xff]  ;;  %v105_v30 = vld [vmem:[%s5784_s2 + $0xb8] sm:$0xff] }
  0x1c   :  { %v119_v31 = vld [vmem:[%s5784_s2 + $0x128] sm:$0xff]  ;;  %v122_v35 = vld [vmem:[%s5784_s2 + $0x140] sm:$0xff]  ;;  %v5050_v37 = vpack.c.bf16 %v115_v27, %v112_v19  ;;  %v5056_v42 = vpack.c.bf16 %v105_v30, %v102_v28  ;;  %v121_v46 = vld [vmem:[%s5784_s2 + $0x138] sm:$0xff] }
  0x1d   :  { %3638 = vmatpush1.bf16.msra.mxu0 %v4848_v59  ;;  %v118_v40 = vld [vmem:[%s5784_s2 + $0x120] sm:$0xff]  ;;  %v5059_v45 = vpack.c.bf16 %v122_v35, %v119_v31  ;;  %v108_v47 = vld [vmem:[%s5784_s2 + $0xd0] sm:$0xff]  ;;  %v111_v49 = vld [vmem:[%s5784_s2 + $0xe8] sm:$0xff] }
  0x1e   :  { %3640 = vmatprep.subr.bf16.mxu0 %v4857_v62  ;;  %3660 = vmatpush3.bf16.msra.mxu1 %v4882_v11  ;;  %5822 = vst [vmem:[#allocation4_spill] sm:$0xff] %v5050_v37  ;;  %v125_v55 = vld [vmem:[%s5784_s2 + $0x158] sm:$0xff]  ;;  %v128_v56 = vld [vmem:[%s5784_s2 + $0x170] sm:$0xff]  ;;  %v5078_v57 = vpack.c.bf16 %v121_v46, %v118_v40  ;;  %v5084_v60 = vpack.c.bf16 %v111_v49, %v108_v47  ;;  %v127_v6 = vld [vmem:[%s5784_s2 + $0x168] sm:$0xff] }
  0x1f   :  { %3661 = vmatprep.subr.bf16.mxu1 %v5795_v3  ;;  %5823 = vst [vmem:[#allocation5_spill] sm:$0xff] %v5059_v45  ;;  %v124_v58 = vld [vmem:[%s5784_s2 + $0x150] sm:$0xff]  ;;  %v5087_v0 = vpack.c.bf16 %v128_v56, %v125_v55  ;;  %v123_v27 = vld [vmem:[%s5784_s2 + $0x148] sm:$0xff]  ;;  %v5117_v28 = vld [vmem:[%s5786_s6] sm:$0xff]  ;;  %v5794_v55 = vlaneseq }
  0x20   :  { %5824 = vst [vmem:[#allocation6_spill] sm:$0xff] %v5078_v57  ;;  %v5100_v14 = vpack.c.bf16 %v127_v6, %v124_v58  ;;  %v120_v19 = vld [vmem:[%s5784_s2 + $0x130] sm:$0xff]  ;;  %v126_v31 = vld [vmem:[%s5784_s2 + $0x160] sm:$0xff]  ;;  %v129_v35 = vld [vmem:[%s5784_s2 + $0x178] sm:$0xff] }
  0x21   :  { %3642 = vmatpush1.bf16.msra.mxu0 %v4876_v7  ;;  %5825 = vst [vmem:[#allocation7_spill] sm:$0xff] %v5087_v0  ;;  %v5120_v30 = vpack.c.bf16 %v123_v27, %v120_v19  ;;  %v5132_v40 = vpack.c.bf16 %v129_v35, %v126_v31  ;;  %v2751_v46 = vld [vmem:[%s5785_s0 + $0x8] sm:$0xff]  ;;  %v133_v56 = vshrl.u32 %v5794_v55, 7  ;;  %v130_v6 = vld [vmem:[%s5787_s3] sm:$0x7] }
  0x22   :  { %3668 = vmatprep.subr.bf16.mxu0 %v4885_v12  ;;  %3663 = vmatpush3.bf16.msra.mxu1 %v4913_v25  ;;  %5826 = vst [vmem:[#allocation8_spill] sm:$0xff] %v5100_v14 }
  0x23   :  { %3664 = vmatprep.subr.bf16.mxu1 %v5795_v3  ;;  %5828 = vst [vmem:[#allocation10_spill] sm:$0xff] %v5120_v30  ;;  %5829 = vst [vmem:[#allocation11_spill] sm:$0xff] %v5132_v40  ;;  %v134_v58 = vsub.s32 0, %v133_v56  ;;  %v138_v27 = vsub.s32 1, %v133_v56 }
  0x24   :  { %231 = vmatmul.mubr.f32.vlgmr.msra.gmra.mrb[0].mxu0 %v165_v20 }
  0x25   :  { %3670 = vmatpush1.bf16.msra.mxu0 %v4907_v22  ;;  %371 = vmatprep.mubr.f32.mxu0 %v5792_v4 }
  0x26   :  { %3672 = vmatprep.subr.bf16.mxu0 %v4916_v26  ;;  %3666 = vmatpush3.bf16.msra.mxu1 %v4941_v38 }
  0x27   :  { %3699 = vmatprep.subr.bf16.mxu1 %v5795_v3 }
  0x29   :  { %3674 = vmatpush1.bf16.msra.mxu0 %v4935_v36  ;;  %3084 = vmatmul.mubr.f32.vlgmr.msra.gmra.mrb[0].mxu1 %v165_v20  ;;  %v5028_v20 = vpack.c.bf16 %v99_v13, %v96_v8  ;;  %v114_v8 = vld [vmem:[%s5784_s2 + $0x100] sm:$0xff]  ;;  %v117_v13 = vld [vmem:[%s5784_s2 + $0x118] sm:$0xff] }
  0x2a   :  { %3676 = vmatprep.subr.bf16.mxu0 %v4944_v39  ;;  %3701 = vmatpush3.bf16.msra.mxu1 %v4970_v51  ;;  %v5103_v17 = vpack.c.bf16 %v117_v13, %v114_v8  ;;  %v5215_v8 = vrot.slane %v130_v6, %v134_v58  ;;  %v142_v58 = vsub.s32 2, %v133_v56 }
  0x2b   :  { %3702 = vmatprep.subr.bf16.mxu1 %v5795_v3  ;;  %3118 = vmatprep.mubr.msk.f32.mxu1 %vm4626_vm0, %v5792_v4 }
  0x2c   :  { %5827 = vst [vmem:[#allocation9_spill] sm:$0xff] %v5103_v17  ;;  %5830 = vst [vmem:[#allocation12_spill] sm:$0xff] %v5215_v8 }
  0x2d   :  { %3678 = vmatpush1.bf16.msra.mxu0 %v4964_v48 }
  0x2e   :  { %3680 = vmatprep.subr.bf16.mxu0 %v4973_v54  ;;  %3704 = vmatpush3.bf16.msra.mxu1 %v4998_v1 }
  0x2f   :  { %3705 = vmatprep.subr.bf16.mxu1 %v5795_v3 }
  0x31   :  { %3682 = vmatpush1.bf16.msra.mxu0 %v4992_v63 }
  0x32   :  { %3684 = vmatprep.subr.bf16.mxu0 %v5001_v2  ;;  %3707 = vmatpush3.bf16.msra.mxu1 %v5028_v20 }
  0x33   :  { %3708 = vmatprep.subr.bf16.mxu1 %v5795_v3 }
  0x35   :  { %3686 = vmatpush1.bf16.msra.mxu0 %v5022_v18 }
  0x36   :  { %3688 = vmatprep.subr.bf16.mxu0 %v5031_v24  ;;  %3710 = vmatpush3.bf16.msra.mxu1 %v5056_v42 }
  0x37   :  { %3711 = vmatprep.subr.bf16.mxu1 %v5795_v3 }
  0x39   :  { %3690 = vmatpush1.bf16.msra.mxu0 %v5050_v37 }
  0x3a   :  { %3692 = vmatprep.subr.bf16.mxu0 %v5059_v45  ;;  %3713 = vmatpush3.bf16.msra.mxu1 %v5084_v60 }
  0x3b   :  { %3714 = vmatprep.subr.bf16.mxu1 %v5795_v3 }
  0x3d   :  { %3694 = vmatpush1.bf16.msra.mxu0 %v5078_v57 }
  0x3e   :  { %3696 = vmatprep.subr.bf16.mxu0 %v5087_v0  ;;  %3716 = vmatpush3.bf16.msra.mxu1 %v5103_v17 }
  0x3f   :  { %3717 = vmatprep.subr.bf16.mxu1 %v5795_v3 }
  0x41   :  { %3698 = vmatpush1.bf16.msra.mxu0 %v5100_v14 }
  0x42   :  { %3724 = vmatprep.subr.bf16.mxu0 %v4683_v5  ;;  %3719 = vmatpush3.bf16.msra.mxu1 %v5120_v30 }
  0x43   :  { %3720 = vmatprep.subr.bf16.mxu1 %v5795_v3 }
  0x44   :  { %372 = vmatmul.mubr.f32.vlgmr.msra.gmra.mrb[0].mxu0 %v5117_v28 }
  0x45   :  { %3726 = vmatpush1.bf16.msra.mxu0 %v4696_v9  ;;  %550 = vmatprep.mubr.f32.mxu0 %v5792_v4 }
  0x46   :  { %3728 = vmatprep.subr.bf16.mxu0 %v4698_v10  ;;  %3722 = vmatpush3.bf16.msra.mxu1 %v5132_v40 }
  0x47   :  { %3755 = vmatprep.subr.bf16.mxu1 %v5795_v3 }
  0x49   :  { %3730 = vmatpush1.bf16.msra.mxu0 %v4714_v15  ;;  %3119 = vmatmul.mubr.f32.vlgmr.msra.gmra.mrb[2].mxu1 %v5117_v28 }
  0x4a   :  { %3732 = vmatprep.subr.bf16.mxu0 %v4717_v16  ;;  %3757 = vmatpush3.bf16.msra.mxu1 %v4755_v29 }
  0x4b   :  { %3758 = vmatprep.subr.bf16.mxu1 %v5795_v3  ;;  %3153 = vmatprep.mubr.msk.f32.mxu1 %vm4626_vm0, %v5792_v4 }
  0x4d   :  { %3734 = vmatpush1.bf16.msra.mxu0 %v4732_v21 }
  0x4e   :  { %3736 = vmatprep.subr.bf16.mxu0 %v4738_v23  ;;  %3760 = vmatpush3.bf16.msra.mxu1 %v4767_v33 }
  0x4f   :  { %3761 = vmatprep.subr.bf16.mxu1 %v5795_v3 }
  0x51   :  { %3738 = vmatpush1.bf16.msra.mxu0 %v4764_v32 }
  0x52   :  { %3740 = vmatprep.subr.bf16.mxu0 %v4770_v34  ;;  %3763 = vmatpush3.bf16.msra.mxu1 %v4798_v43 }
  0x53   :  { %3764 = vmatprep.subr.bf16.mxu1 %v5795_v3 }
  0x55   :  { %3742 = vmatpush1.bf16.msra.mxu0 %v4792_v41 }
  0x56   :  { %3744 = vmatprep.subr.bf16.mxu0 %v4801_v44  ;;  %3766 = vmatpush3.bf16.msra.mxu1 %v4826_v52 }
  0x57   :  { %3767 = vmatprep.subr.bf16.mxu1 %v5795_v3 }
  0x59   :  { %3746 = vmatpush1.bf16.msra.mxu0 %v4820_v50 }
  0x5a   :  { %3748 = vmatprep.subr.bf16.mxu0 %v4829_v53  ;;  %3769 = vmatpush3.bf16.msra.mxu1 %v4854_v61 }
  0x5b   :  { %3770 = vmatprep.subr.bf16.mxu1 %v5795_v3 }
  0x5d   :  { %3750 = vmatpush1.bf16.msra.mxu0 %v4848_v59 }
  0x5e   :  { %3752 = vmatprep.subr.bf16.mxu0 %v4857_v62  ;;  %3772 = vmatpush3.bf16.msra.mxu1 %v4882_v11 }
  0x5f   :  { %3773 = vmatprep.subr.bf16.mxu1 %v5795_v3 }
  0x61   :  { %3754 = vmatpush1.bf16.msra.mxu0 %v4876_v7 }
  0x62   :  { %3780 = vmatprep.subr.bf16.mxu0 %v4885_v12  ;;  %3775 = vmatpush3.bf16.msra.mxu1 %v4913_v25 }
  0x63   :  { %3776 = vmatprep.subr.bf16.mxu1 %v5795_v3 }
  0x64   :  { %551 = vmatmul.mubr.f32.vlgmr.msra.gmra.mrb[2].mxu0 %v2751_v46 }
  0x65   :  { %3782 = vmatpush1.bf16.msra.mxu0 %v4907_v22  ;;  %691 = vmatprep.mubr.f32.mxu0 %v5792_v4 }
  0x66   :  { %3778 = vmatpush3.bf16.msra.mxu1 %v4941_v38  ;;  %3784 = vmatprep.subr.bf16.mxu0 %v4916_v26 }
  0x67   :  { %3811 = vmatprep.subr.bf16.mxu1 %v5795_v3 }
  0x69   :  { %3154 = vmatmul.mubr.f32.vlgmr.msra.gmra.mrb[4].mxu1 %v2751_v46  ;;  %3786 = vmatpush1.bf16.msra.mxu0 %v4935_v36  ;;  %v5218_v46 = vrot.slane %v130_v6, %v138_v27 }
  0x6a   :  { %3813 = vmatpush3.bf16.msra.mxu1 %v4970_v51  ;;  %3188 = vmatprep.mubr.msk.f32.mxu1 %vm4626_vm0, %v5792_v4 }
  0x6b   :  { %3814 = vmatprep.subr.bf16.mxu1 %v5795_v3  ;;  %3788 = vmatprep.subr.bf16.mxu0 %v4944_v39  ;;  %5831 = vst [vmem:[#allocation13_spill] sm:$0xff] %v5218_v46 }
  0x6d   :  { %3790 = vmatpush1.bf16.msra.mxu0 %v4964_v48 }
  0x6e   :  { %3816 = vmatpush3.bf16.msra.mxu1 %v4998_v1  ;;  %3792 = vmatprep.subr.bf16.mxu0 %v4973_v54 }
  0x6f   :  { %3817 = vmatprep.subr.bf16.mxu1 %v5795_v3 }
  0x71   :  { %3794 = vmatpush1.bf16.msra.mxu0 %v4992_v63 }
  0x72   :  { %3819 = vmatpush3.bf16.msra.mxu1 %v5028_v20  ;;  %3796 = vmatprep.subr.bf16.mxu0 %v5001_v2 }
  0x73   :  { %3820 = vmatprep.subr.bf16.mxu1 %v5795_v3 }
  0x75   :  { %3798 = vmatpush1.bf16.msra.mxu0 %v5022_v18 }
  0x76   :  { %3822 = vmatpush3.bf16.msra.mxu1 %v5056_v42  ;;  %3800 = vmatprep.subr.bf16.mxu0 %v5031_v24 }
  0x77   :  { %3823 = vmatprep.subr.bf16.mxu1 %v5795_v3 }
  0x79   :  { %3802 = vmatpush1.bf16.msra.mxu0 %v5050_v37 }
  0x7a   :  { %3825 = vmatpush3.bf16.msra.mxu1 %v5084_v60  ;;  %3804 = vmatprep.subr.bf16.mxu0 %v5059_v45 }
  0x7b   :  { %3826 = vmatprep.subr.bf16.mxu1 %v5795_v3 }
  0x7d   :  { %3806 = vmatpush1.bf16.msra.mxu0 %v5078_v57 }
  0x7e   :  { %3828 = vmatpush3.bf16.msra.mxu1 %v5103_v17  ;;  %3808 = vmatprep.subr.bf16.mxu0 %v5087_v0 }
  0x7f   :  { %3829 = vmatprep.subr.bf16.mxu1 %v5795_v3 }
  0x81   :  { %3810 = vmatpush1.bf16.msra.mxu0 %v5100_v14 }
  0x82   :  { %3831 = vmatpush3.bf16.msra.mxu1 %v5120_v30  ;;  %3836 = vmatprep.subr.bf16.mxu0 %v4683_v5 }
  0x83   :  { %3832 = vmatprep.subr.bf16.mxu1 %v5795_v3 }
  0x86   :  { %3834 = vmatpush3.bf16.msra.mxu1 %v5132_v40 }
  0x87   :  { %3867 = vmatprep.subr.bf16.mxu1 %v5795_v3 }
  0xfc   :  { %v303_v47 = vpop.f32.mrb[0].mxu1 }
  0xfd   :  { %v3085_v49 = vpop.f32.mrb[1].mxu1 }
 0x117   :  { %v373_v13 = vpop.f32.mrb[0].mxu0 }
 0x118   :  { %v4507_v19 = vadd.f32 %v373_v13, %v5215_v8  ;;  %v375_v31 = vpop.f32.mrb[1].mxu0  ;;  %v5224_v13 = vld [vmem:[%s5788_s4] ss:$0 sm:$0xff]  ;;  %v5226_v8 = vrot.slane %v130_v6, %v142_v58  ;;  %v5833_v58 = vmov 0.0  }
 0x119   :  { %v4508_v4 = vadd.f32 %v375_v31, %v5218_v46 }
 0x11a   :  { %v2748_v35 = vmul.f32 -1.442695, %v4507_v19  ;;  %v304_v31 = vadd.f32 %v303_v47, %v5226_v8 }
 0x11b   :  { %v2749_v3 = vmul.f32 -1.442695, %v4508_v4 }
 0x11c   :  { %4542 = vpow2.f32 %v2748_v35  ;;  %v444_v49 = vpop.f32.mrb[2].mxu1 }
 0x11d   :  { %v3120_v55 = vpop.f32.mrb[3].mxu1  ;;  %4544 = vpow2.f32 %v2749_v3  ;;  %v462_v19 = vadd.f32 %v5224_v13, %v444_v49  ;;  %v5235_v49 = vld [vmem:[%s5789_s5] ss:$0 sm:$0xff] }
 0x126   :  { %v4543_v5 = vpop.eup %4542 }
 0x127   :  { %v452_v40 = vadd.f32 1.0, %v4543_v5  ;;  %v4545_v27 = vpop.eup %4544 }
 0x128   :  { %v459_v4 = vadd.f32 1.0, %v4545_v27  ;;  %v2755_v27 = vld [vmem:[%s5785_s0 + $0x10] sm:$0xff] }
 0x129   :  { %4546 = vrcp.f32 %v452_v40 }
 0x133   :  { %v4547_v35 = vpop.eup %4546 }
 0x134   :  { %v463_v55 = vmul.f32 %v4547_v35, %v462_v19  ;;  %v5834_v35 = vld [vmem:[#allocation8_spill] sm:$0xff] }
 0x136   :  { %v464_v46 = vadd.f32 %v463_v55, %v304_v31  ;;  %v5835_v31 = vld [vmem:[#allocation11_spill] sm:$0xff] }
 0x137   :  { %v5836_v55 = vld [vmem:[#allocation3_spill] sm:$0xff] }
 0x138   :  { %4548 = vtanh.f32 %v464_v46 }
 0x139   :  { %4550 = vrcp.f32 %v459_v4 }
 0x142   :  { %v4549_v3 = vpop.eup %4548 }
 0x143   :  { %v466_v5 = vsub.f32 %v5117_v28, %v4549_v3  ;;  %v4551_v40 = vpop.eup %4550 }
 0x145   :  { %v467_v56 = vmul.f32 %v4551_v40, %v466_v5  ;;  %v5837_v5 = vld [vmem:[#allocation12_spill] sm:$0xff] }
 0x147   :  { %v468_v14 = vadd.f32 %v4549_v3, %v467_v56 }
 0x149   :  { %v472_v6 = vsub.f32 %v468_v14, %v5117_v28  ;;  %v5832_v14 = vmov 0.0|0.0  }
 0x14b   :  { %v5238_v47 = vadd.f32 %v472_v6, %v5117_v28  ;;  %v623_v28 = vpop.f32.mrb[4].mxu1 }
 0x14c   :  { %v3155_v19 = vpop.f32.mrb[5].mxu1 }
 0x14d   :  { %692 = vmatmul.mubr.f32.vlgmr.msra.gmra.mrb[2].mxu0 %v5238_v47  ;;  %3189 = vmatmul.mubr.f32.vlgmr.msra.gmra.mrb[6].mxu1 %v5238_v47  ;;  %v476_v46 = vmul.f32 %v5235_v49, %v5238_v47  ;;  %v5838_v19 = vld [vmem:[#allocation13_spill] sm:$0xff] }
 0x14e   :  { %3838 = vmatpush1.bf16.msra.mxu0 %v4696_v9  ;;  %3869 = vmatpush3.bf16.msra.mxu1 %v4755_v29 }
 0x14f   :  { %477 = vadd.xlane.f32.xlu0 %v476_v46  ;;  %3840 = vmatprep.subr.bf16.mxu0 %v4698_v10 }
 0x150   :  { %3870 = vmatprep.subr.bf16.mxu1 %v5832_v14  ;;  %871 = vmatprep.mubr.f32.mxu0 %v5833_v58 }
 0x151   :  { %3223 = vmatprep.mubr.msk.f32.mxu1 %vm4626_vm0, %v5833_v58 }
 0x152   :  { %3842 = vmatpush1.bf16.msra.mxu0 %v4714_v15  ;;  %3872 = vmatpush3.bf16.msra.mxu1 %v4767_v33 }
 0x153   :  { %3844 = vmatprep.subr.bf16.mxu0 %v4717_v16  ;;  %3873 = vmatprep.subr.bf16.mxu1 %v5832_v14 }
 0x156   :  { %3846 = vmatpush1.bf16.msra.mxu0 %v4732_v21  ;;  %3875 = vmatpush3.bf16.msra.mxu1 %v4798_v43 }
 0x157   :  { %3848 = vmatprep.subr.bf16.mxu0 %v4738_v23  ;;  %3876 = vmatprep.subr.bf16.mxu1 %v5832_v14 }
 0x15a   :  { %3850 = vmatpush1.bf16.msra.mxu0 %v4764_v32  ;;  %3878 = vmatpush3.bf16.msra.mxu1 %v4826_v52 }
 0x15b   :  { %3852 = vmatprep.subr.bf16.mxu0 %v4770_v34  ;;  %3879 = vmatprep.subr.bf16.mxu1 %v5832_v14 }
 0x15e   :  { %3854 = vmatpush1.bf16.msra.mxu0 %v4792_v41  ;;  %3881 = vmatpush3.bf16.msra.mxu1 %v4854_v61 }
 0x15f   :  { %3856 = vmatprep.subr.bf16.mxu0 %v4801_v44  ;;  %3882 = vmatprep.subr.bf16.mxu1 %v5832_v14 }
 0x162   :  { %3858 = vmatpush1.bf16.msra.mxu0 %v4820_v50  ;;  %3884 = vmatpush3.bf16.msra.mxu1 %v4882_v11 }
 0x163   :  { %3860 = vmatprep.subr.bf16.mxu0 %v4829_v53  ;;  %3885 = vmatprep.subr.bf16.mxu1 %v5832_v14 }
 0x166   :  { %3862 = vmatpush1.bf16.msra.mxu0 %v4848_v59  ;;  %3887 = vmatpush3.bf16.msra.mxu1 %v4913_v25 }
 0x167   :  { %3864 = vmatprep.subr.bf16.mxu0 %v4857_v62  ;;  %3888 = vmatprep.subr.bf16.mxu1 %v5832_v14 }
 0x16a   :  { %3866 = vmatpush1.bf16.msra.mxu0 %v4876_v7  ;;  %3890 = vmatpush3.bf16.msra.mxu1 %v4941_v38 }
 0x16b   :  { %3892 = vmatprep.subr.bf16.mxu0 %v4885_v12  ;;  %3923 = vmatprep.subr.bf16.mxu1 %v5832_v14 }
 0x16d   :  { %872 = vmatmul.mubr.f32.vlgmr.msra.gmra.mrb[4].mxu0 %v2755_v27  ;;  %3224 = vmatmul.mubr.f32.vlgmr.msra.gmra.mrb[8].mxu1 %v2755_v27 }
 0x16e   :  { %3894 = vmatpush1.bf16.msra.mxu0 %v4907_v22  ;;  %3925 = vmatpush3.bf16.msra.mxu1 %v4970_v51 }
 0x16f   :  { %3896 = vmatprep.subr.bf16.mxu0 %v4916_v26  ;;  %3926 = vmatprep.subr.bf16.mxu1 %v5832_v14 }
 0x170   :  { %1012 = vmatprep.mubr.f32.mxu0 %v5833_v58  ;;  %3258 = vmatprep.mubr.msk.f32.mxu1 %vm4626_vm0, %v5833_v58 }
 0x172   :  { %3898 = vmatpush1.bf16.msra.mxu0 %v4935_v36  ;;  %3928 = vmatpush3.bf16.msra.mxu1 %v4998_v1 }
 0x173   :  { %3900 = vmatprep.subr.bf16.mxu0 %v4944_v39  ;;  %3929 = vmatprep.subr.bf16.mxu1 %v5832_v14 }
 0x176   :  { %3902 = vmatpush1.bf16.msra.mxu0 %v4964_v48  ;;  %3931 = vmatpush3.bf16.msra.mxu1 %v5028_v20 }
 0x177   :  { %3904 = vmatprep.subr.bf16.mxu0 %v4973_v54  ;;  %3932 = vmatprep.subr.bf16.mxu1 %v5832_v14 }
 0x17a   :  { %3906 = vmatpush1.bf16.msra.mxu0 %v4992_v63  ;;  %3934 = vmatpush3.bf16.msra.mxu1 %v5056_v42 }
 0x17b   :  { %3908 = vmatprep.subr.bf16.mxu0 %v5001_v2  ;;  %3935 = vmatprep.subr.bf16.mxu1 %v5832_v14 }
 0x17e   :  { %3910 = vmatpush1.bf16.msra.mxu0 %v5022_v18  ;;  %3937 = vmatpush3.bf16.msra.mxu1 %v5084_v60 }
 0x17f   :  { %3912 = vmatprep.subr.bf16.mxu0 %v5031_v24  ;;  %3938 = vmatprep.subr.bf16.mxu1 %v5832_v14 }
 0x182   :  { %3914 = vmatpush1.bf16.msra.mxu0 %v5050_v37  ;;  %3940 = vmatpush3.bf16.msra.mxu1 %v5103_v17 }
 0x183   :  { %3916 = vmatprep.subr.bf16.mxu0 %v5059_v45  ;;  %3941 = vmatprep.subr.bf16.mxu1 %v5832_v14  ;;  %v624_v45 = vadd.f32 %v623_v28, %v5226_v8  ;;  %v5840_v28 = vld [vmem:[#allocation9_spill] sm:$0xff] }
 0x186   :  { %3918 = vmatpush1.bf16.msra.mxu0 %v5078_v57  ;;  %3943 = vmatpush3.bf16.msra.mxu1 %v5120_v30 }
 0x187   :  { %3920 = vmatprep.subr.bf16.mxu0 %v5087_v0  ;;  %3944 = vmatprep.subr.bf16.mxu1 %v5832_v14 }
 0x18a   :  { %3922 = vmatpush1.bf16.msra.mxu0 %v5834_v35  ;;  %3946 = vmatpush3.bf16.msra.mxu1 %v5835_v31 }
 0x18b   :  { %3948 = vmatprep.subr.bf16.mxu0 %v5836_v55  ;;  %3979 = vmatprep.subr.bf16.mxu1 %v5832_v14 }
 0x220   :  { %v693_v4 = vpop.f32.mrb[2].mxu0  ;;  %v764_v3 = vpop.f32.mrb[6].mxu1 }
 0x221   :  { %v4509_v40 = vadd.f32 %v693_v4, %v5837_v5  ;;  %v695_v56 = vpop.f32.mrb[3].mxu0  ;;  %v3190_v6 = vpop.f32.mrb[7].mxu1  ;;  %v782_v55 = vadd.f32 %v5224_v13, %v764_v3  ;;  %v5844_v3 = vld [vmem:[#allocation7_spill] sm:$0xff] }
 0x222   :  { %v4510_v27 = vadd.f32 %v695_v56, %v5838_v19 }
 0x223   :  { %v2752_v46 = vmul.f32 -1.442695, %v4509_v40 }
 0x224   :  { %v2753_v0 = vmul.f32 -1.442695, %v4510_v27 }
 0x225   :  { %4552 = vpow2.f32 %v2752_v46 }
 0x226   :  { %4554 = vpow2.f32 %v2753_v0 }
 0x22f   :  { %v4553_v30 = vpop.eup %4552 }
 0x230   :  { %v772_v57 = vadd.f32 1.0, %v4553_v30  ;;  %v4555_v31 = vpop.eup %4554  ;;  %v2759_v30 = vld [vmem:[%s5785_s0 + $0x18] sm:$0xff] }
 0x231   :  { %v779_v4 = vadd.f32 1.0, %v4555_v31  ;;  %v5842_v31 = vld [vmem:[#allocation6_spill] sm:$0xff] }
 0x232   :  { %4556 = vrcp.f32 %v772_v57 }
 0x23c   :  { %v4557_v35 = vpop.eup %4556 }
 0x23d   :  { %v783_v17 = vmul.f32 %v4557_v35, %v782_v55  ;;  %v5841_v35 = vld [vmem:[#allocation5_spill] sm:$0xff]  ;;  %v5843_v55 = vld [vmem:[#allocation10_spill] sm:$0xff] }
 0x23f   :  { %v784_v37 = vadd.f32 %v783_v17, %v624_v45 }
 0x241   :  { %4558 = vtanh.f32 %v784_v37  ;;  %v944_v37 = vpop.f32.mrb[8].mxu1 }
 0x242   :  { %4560 = vrcp.f32 %v779_v4  ;;  %v3225_v17 = vpop.f32.mrb[9].mxu1  ;;  %v5845_v4 = vld [vmem:[#allocation8_spill] sm:$0xff] }
 0x24b   :  { %v4559_v40 = vpop.eup %4558 }
 0x24c   :  { %v786_v6 = vsub.f32 %v5238_v47, %v4559_v40  ;;  %v4561_v56 = vpop.eup %4560 }
 0x24e   :  { %v787_v46 = vmul.f32 %v4561_v56, %v786_v6  ;;  %v5847_v6 = vld [vmem:[#allocation3_spill] sm:$0xff] }
 0x250   :  { %v788_v27 = vadd.f32 %v4559_v40, %v787_v46  ;;  %v5846_v40 = vld [vmem:[#allocation11_spill] sm:$0xff] }
 0x252   :  { %v793_v0 = vsub.f32 %v788_v27, %v5238_v47 }
 0x254   :  { %v5324_v57 = vadd.f32 %v793_v0, %v5238_v47  ;;  %v5839_v47 = vld [vmem:[#allocation4_spill] sm:$0xff] }
 0x256   :  { %1013 = vmatmul.mubr.f32.vlgmr.msra.gmra.mrb[4].mxu0 %v5324_v57  ;;  %3259 = vmatmul.mubr.f32.vlgmr.msra.gmra.mrb[10].mxu1 %v5324_v57  ;;  %v797_v45 = vmul.f32 %v5235_v49, %v5324_v57 }
 0x257   :  { %3950 = vmatpush1.bf16.msra.mxu0 %v4696_v9  ;;  %3981 = vmatpush3.bf16.msra.mxu1 %v4755_v29 }
 0x258   :  { %798 = vadd.xlane.f32.xlu0 %v797_v45  ;;  %3952 = vmatprep.subr.bf16.mxu0 %v4698_v10 }
 0x259   :  { %3982 = vmatprep.subr.bf16.mxu1 %v5832_v14  ;;  %1192 = vmatprep.mubr.f32.mxu0 %v5833_v58 }
 0x25a   :  { %3293 = vmatprep.mubr.msk.f32.mxu1 %vm4626_vm0, %v5833_v58 }
 0x25b   :  { %3954 = vmatpush1.bf16.msra.mxu0 %v4714_v15  ;;  %3984 = vmatpush3.bf16.msra.mxu1 %v4767_v33 }
 0x25c   :  { %3956 = vmatprep.subr.bf16.mxu0 %v4717_v16  ;;  %3985 = vmatprep.subr.bf16.mxu1 %v5832_v14 }
 0x25f   :  { %3958 = vmatpush1.bf16.msra.mxu0 %v4732_v21  ;;  %3987 = vmatpush3.bf16.msra.mxu1 %v4798_v43 }
 0x260   :  { %3960 = vmatprep.subr.bf16.mxu0 %v4738_v23  ;;  %3988 = vmatprep.subr.bf16.mxu1 %v5832_v14 }
 0x263   :  { %3962 = vmatpush1.bf16.msra.mxu0 %v4764_v32  ;;  %3990 = vmatpush3.bf16.msra.mxu1 %v4826_v52 }
 0x264   :  { %3964 = vmatprep.subr.bf16.mxu0 %v4770_v34  ;;  %3991 = vmatprep.subr.bf16.mxu1 %v5832_v14 }
 0x267   :  { %3966 = vmatpush1.bf16.msra.mxu0 %v4792_v41  ;;  %3993 = vmatpush3.bf16.msra.mxu1 %v4854_v61 }
 0x268   :  { %3968 = vmatprep.subr.bf16.mxu0 %v4801_v44  ;;  %3994 = vmatprep.subr.bf16.mxu1 %v5832_v14 }
 0x26b   :  { %3970 = vmatpush1.bf16.msra.mxu0 %v4820_v50  ;;  %3996 = vmatpush3.bf16.msra.mxu1 %v4882_v11 }
 0x26c   :  { %3972 = vmatprep.subr.bf16.mxu0 %v4829_v53  ;;  %3997 = vmatprep.subr.bf16.mxu1 %v5832_v14 }
 0x26f   :  { %3974 = vmatpush1.bf16.msra.mxu0 %v4848_v59  ;;  %3999 = vmatpush3.bf16.msra.mxu1 %v4913_v25 }
 0x270   :  { %3976 = vmatprep.subr.bf16.mxu0 %v4857_v62  ;;  %4000 = vmatprep.subr.bf16.mxu1 %v5832_v14 }
 0x273   :  { %3978 = vmatpush1.bf16.msra.mxu0 %v4876_v7  ;;  %4002 = vmatpush3.bf16.msra.mxu1 %v4941_v38 }
 0x274   :  { %4004 = vmatprep.subr.bf16.mxu0 %v4885_v12  ;;  %4035 = vmatprep.subr.bf16.mxu1 %v5832_v14 }
 0x276   :  { %1193 = vmatmul.mubr.f32.vlgmr.msra.gmra.mrb[6].mxu0 %v2759_v30  ;;  %3294 = vmatmul.mubr.f32.vlgmr.msra.gmra.mrb[12].mxu1 %v2759_v30 }
 0x277   :  { %4006 = vmatpush1.bf16.msra.mxu0 %v4907_v22  ;;  %4037 = vmatpush3.bf16.msra.mxu1 %v4970_v51 }
 0x278   :  { %4008 = vmatprep.subr.bf16.mxu0 %v4916_v26  ;;  %4038 = vmatprep.subr.bf16.mxu1 %v5832_v14 }
 0x279   :  { %1333 = vmatprep.mubr.f32.mxu0 %v5833_v58  ;;  %3328 = vmatprep.mubr.msk.f32.mxu1 %vm4626_vm0, %v5833_v58 }
 0x27b   :  { %4010 = vmatpush1.bf16.msra.mxu0 %v4935_v36  ;;  %4040 = vmatpush3.bf16.msra.mxu1 %v4998_v1 }
 0x27c   :  { %4012 = vmatprep.subr.bf16.mxu0 %v4944_v39  ;;  %4041 = vmatprep.subr.bf16.mxu1 %v5832_v14 }
 0x27f   :  { %4014 = vmatpush1.bf16.msra.mxu0 %v4964_v48  ;;  %4043 = vmatpush3.bf16.msra.mxu1 %v5028_v20 }
 0x280   :  { %4016 = vmatprep.subr.bf16.mxu0 %v4973_v54  ;;  %4044 = vmatprep.subr.bf16.mxu1 %v5832_v14 }
 0x283   :  { %4018 = vmatpush1.bf16.msra.mxu0 %v4992_v63  ;;  %4046 = vmatpush3.bf16.msra.mxu1 %v5056_v42 }
 0x284   :  { %4020 = vmatprep.subr.bf16.mxu0 %v5001_v2  ;;  %4047 = vmatprep.subr.bf16.mxu1 %v5832_v14 }
 0x287   :  { %4022 = vmatpush1.bf16.msra.mxu0 %v5022_v18  ;;  %4049 = vmatpush3.bf16.msra.mxu1 %v5084_v60 }
 0x288   :  { %4024 = vmatprep.subr.bf16.mxu0 %v5031_v24  ;;  %4050 = vmatprep.subr.bf16.mxu1 %v5832_v14 }
 0x28b   :  { %4026 = vmatpush1.bf16.msra.mxu0 %v5839_v47  ;;  %4052 = vmatpush3.bf16.msra.mxu1 %v5840_v28 }
 0x28c   :  { %4028 = vmatprep.subr.bf16.mxu0 %v5841_v35  ;;  %4053 = vmatprep.subr.bf16.mxu1 %v5832_v14  ;;  %v945_v35 = vadd.f32 %v944_v37, %v5226_v8 }
 0x28f   :  { %4030 = vmatpush1.bf16.msra.mxu0 %v5842_v31  ;;  %4055 = vmatpush3.bf16.msra.mxu1 %v5843_v55 }
 0x290   :  { %4032 = vmatprep.subr.bf16.mxu0 %v5844_v3  ;;  %4056 = vmatprep.subr.bf16.mxu1 %v5832_v14 }
 0x293   :  { %4034 = vmatpush1.bf16.msra.mxu0 %v5845_v4  ;;  %4058 = vmatpush3.bf16.msra.mxu1 %v5846_v40 }
 0x294   :  { %4060 = vmatprep.subr.bf16.mxu0 %v5847_v6  ;;  %4091 = vmatprep.subr.bf16.mxu1 %v5832_v14 }
 0x329   :  { %v1014_v56 = vpop.f32.mrb[4].mxu0  ;;  %v1085_v46 = vpop.f32.mrb[10].mxu1 }
 0x32a   :  { %v4511_v27 = vadd.f32 %v1014_v56, %v5837_v5  ;;  %v1016_v0 = vpop.f32.mrb[5].mxu0  ;;  %v3260_v45 = vpop.f32.mrb[11].mxu1  ;;  %v1103_v6 = vadd.f32 %v5224_v13, %v1085_v46  ;;  %v5853_v46 = vld [vmem:[#allocation7_spill] sm:$0xff] }
 0x32b   :  { %v4512_v30 = vadd.f32 %v1016_v0, %v5838_v19 }
 0x32c   :  { %v2756_v17 = vmul.f32 -1.442695, %v4511_v27 }
 0x32d   :  { %v2757_v3 = vmul.f32 -1.442695, %v4512_v30 }
 0x32e   :  { %4562 = vpow2.f32 %v2756_v17 }
 0x32f   :  { %4564 = vpow2.f32 %v2757_v3  ;;  %v5849_v3 = vld [vmem:[#allocation9_spill] sm:$0xff] }
 0x338   :  { %v4563_v55 = vpop.eup %4562 }
 0x339   :  { %v1093_v31 = vadd.f32 1.0, %v4563_v55  ;;  %v4565_v40 = vpop.eup %4564 }
 0x33a   :  { %v1100_v56 = vadd.f32 1.0, %v4565_v40  ;;  %v5851_v40 = vld [vmem:[#allocation6_spill] sm:$0xff] }
 0x33b   :  { %4566 = vrcp.f32 %v1093_v31 }
 0x345   :  { %v4567_v4 = vpop.eup %4566 }
 0x346   :  { %v1104_v28 = vmul.f32 %v4567_v4, %v1103_v6  ;;  %v5850_v4 = vld [vmem:[#allocation5_spill] sm:$0xff]  ;;  %v5852_v6 = vld [vmem:[#allocation10_spill] sm:$0xff] }
 0x348   :  { %v1105_v47 = vadd.f32 %v1104_v28, %v945_v35  ;;  %v2763_v28 = vld [vmem:[%s5785_s0 + $0x20] sm:$0xff]  ;;  %v5848_v35 = vld [vmem:[#allocation4_spill] sm:$0xff] }
 0x34a   :  { %4568 = vtanh.f32 %v1105_v47 }
 0x34b   :  { %4570 = vrcp.f32 %v1100_v56  ;;  %v5854_v56 = vld [vmem:[#allocation8_spill] sm:$0xff] }
 0x354   :  { %v4569_v27 = vpop.eup %4568 }
 0x355   :  { %v1107_v45 = vsub.f32 %v5324_v57, %v4569_v27  ;;  %v4571_v0 = vpop.eup %4570 }
 0x357   :  { %v1108_v17 = vmul.f32 %v4571_v0, %v1107_v45  ;;  %v5856_v45 = vld [vmem:[#allocation3_spill] sm:$0xff] }
 0x359   :  { %v1109_v30 = vadd.f32 %v4569_v27, %v1108_v17  ;;  %v5855_v27 = vld [vmem:[#allocation11_spill] sm:$0xff] }
 0x35b   :  { %v1114_v55 = vsub.f32 %v1109_v30, %v5324_v57 }
 0x35d   :  { %v5410_v31 = vadd.f32 %v1114_v55, %v5324_v57  ;;  %v1265_v57 = vpop.f32.mrb[12].mxu1 }
 0x35e   :  { %v3295_v47 = vpop.f32.mrb[13].mxu1 }
 0x35f   :  { %1334 = vmatmul.mubr.f32.vlgmr.msra.gmra.mrb[6].mxu0 %v5410_v31  ;;  %3329 = vmatmul.mubr.f32.vlgmr.msra.gmra.mrb[14].mxu1 %v5410_v31  ;;  %v1118_v37 = vmul.f32 %v5235_v49, %v5410_v31 }
 0x360   :  { %4062 = vmatpush1.bf16.msra.mxu0 %v4696_v9  ;;  %4093 = vmatpush3.bf16.msra.mxu1 %v4755_v29 }
 0x361   :  { %1119 = vadd.xlane.f32.xlu1 %v1118_v37  ;;  %4064 = vmatprep.subr.bf16.mxu0 %v4698_v10 }
 0x362   :  { %4094 = vmatprep.subr.bf16.mxu1 %v5832_v14  ;;  %1513 = vmatprep.mubr.f32.mxu0 %v5833_v58 }
 0x363   :  { %3363 = vmatprep.mubr.msk.f32.mxu1 %vm4626_vm0, %v5833_v58 }
 0x364   :  { %4066 = vmatpush1.bf16.msra.mxu0 %v4714_v15  ;;  %4096 = vmatpush3.bf16.msra.mxu1 %v4767_v33 }
 0x365   :  { %4068 = vmatprep.subr.bf16.mxu0 %v4717_v16  ;;  %4097 = vmatprep.subr.bf16.mxu1 %v5832_v14 }
 0x368   :  { %4070 = vmatpush1.bf16.msra.mxu0 %v4732_v21  ;;  %4099 = vmatpush3.bf16.msra.mxu1 %v4798_v43 }
 0x369   :  { %4072 = vmatprep.subr.bf16.mxu0 %v4738_v23  ;;  %4100 = vmatprep.subr.bf16.mxu1 %v5832_v14 }
 0x36c   :  { %4074 = vmatpush1.bf16.msra.mxu0 %v4764_v32  ;;  %4102 = vmatpush3.bf16.msra.mxu1 %v4826_v52 }
 0x36d   :  { %4076 = vmatprep.subr.bf16.mxu0 %v4770_v34  ;;  %4103 = vmatprep.subr.bf16.mxu1 %v5832_v14 }
 0x370   :  { %4078 = vmatpush1.bf16.msra.mxu0 %v4792_v41  ;;  %4105 = vmatpush3.bf16.msra.mxu1 %v4854_v61 }
 0x371   :  { %4080 = vmatprep.subr.bf16.mxu0 %v4801_v44  ;;  %4106 = vmatprep.subr.bf16.mxu1 %v5832_v14 }
 0x374   :  { %4082 = vmatpush1.bf16.msra.mxu0 %v4820_v50  ;;  %4108 = vmatpush3.bf16.msra.mxu1 %v4882_v11 }
 0x375   :  { %4084 = vmatprep.subr.bf16.mxu0 %v4829_v53  ;;  %4109 = vmatprep.subr.bf16.mxu1 %v5832_v14 }
 0x378   :  { %4086 = vmatpush1.bf16.msra.mxu0 %v4848_v59  ;;  %4111 = vmatpush3.bf16.msra.mxu1 %v4913_v25 }
 0x379   :  { %4088 = vmatprep.subr.bf16.mxu0 %v4857_v62  ;;  %4112 = vmatprep.subr.bf16.mxu1 %v5832_v14 }
 0x37c   :  { %4090 = vmatpush1.bf16.msra.mxu0 %v4876_v7  ;;  %4114 = vmatpush3.bf16.msra.mxu1 %v4941_v38 }
 0x37d   :  { %4116 = vmatprep.subr.bf16.mxu0 %v4885_v12  ;;  %4147 = vmatprep.subr.bf16.mxu1 %v5832_v14 }
 0x37f   :  { %1514 = vmatmul.mubr.f32.vlgmr.msra.gmra.mrb[8].mxu0 %v2763_v28  ;;  %3364 = vmatmul.mubr.f32.vlgmr.msra.gmra.mrb[16].mxu1 %v2763_v28 }
 0x380   :  { %4118 = vmatpush1.bf16.msra.mxu0 %v4907_v22  ;;  %4149 = vmatpush3.bf16.msra.mxu1 %v4970_v51 }
 0x381   :  { %4120 = vmatprep.subr.bf16.mxu0 %v4916_v26  ;;  %4150 = vmatprep.subr.bf16.mxu1 %v5832_v14 }
 0x382   :  { %1654 = vmatprep.mubr.f32.mxu0 %v5833_v58  ;;  %3398 = vmatprep.mubr.msk.f32.mxu1 %vm4626_vm0, %v5833_v58 }
 0x384   :  { %4122 = vmatpush1.bf16.msra.mxu0 %v4935_v36  ;;  %4152 = vmatpush3.bf16.msra.mxu1 %v4998_v1 }
 0x385   :  { %4124 = vmatprep.subr.bf16.mxu0 %v4944_v39  ;;  %4153 = vmatprep.subr.bf16.mxu1 %v5832_v14 }
 0x388   :  { %4126 = vmatpush1.bf16.msra.mxu0 %v4964_v48  ;;  %4155 = vmatpush3.bf16.msra.mxu1 %v5028_v20 }
 0x389   :  { %4128 = vmatprep.subr.bf16.mxu0 %v4973_v54  ;;  %4156 = vmatprep.subr.bf16.mxu1 %v5832_v14 }
 0x38c   :  { %4130 = vmatpush1.bf16.msra.mxu0 %v4992_v63  ;;  %4158 = vmatpush3.bf16.msra.mxu1 %v5056_v42 }
 0x38d   :  { %4132 = vmatprep.subr.bf16.mxu0 %v5001_v2  ;;  %4159 = vmatprep.subr.bf16.mxu1 %v5832_v14 }
 0x390   :  { %4134 = vmatpush1.bf16.msra.mxu0 %v5022_v18  ;;  %4161 = vmatpush3.bf16.msra.mxu1 %v5084_v60 }
 0x391   :  { %4136 = vmatprep.subr.bf16.mxu0 %v5031_v24  ;;  %4162 = vmatprep.subr.bf16.mxu1 %v5832_v14 }
 0x394   :  { %4138 = vmatpush1.bf16.msra.mxu0 %v5848_v35  ;;  %4164 = vmatpush3.bf16.msra.mxu1 %v5849_v3 }
 0x395   :  { %4140 = vmatprep.subr.bf16.mxu0 %v5850_v4  ;;  %4165 = vmatprep.subr.bf16.mxu1 %v5832_v14  ;;  %v1266_v4 = vadd.f32 %v1265_v57, %v5226_v8 }
 0x398   :  { %4142 = vmatpush1.bf16.msra.mxu0 %v5851_v40  ;;  %4167 = vmatpush3.bf16.msra.mxu1 %v5852_v6 }
 0x399   :  { %4144 = vmatprep.subr.bf16.mxu0 %v5853_v46  ;;  %4168 = vmatprep.subr.bf16.mxu1 %v5832_v14 }
 0x39c   :  { %4146 = vmatpush1.bf16.msra.mxu0 %v5854_v56  ;;  %4170 = vmatpush3.bf16.msra.mxu1 %v5855_v27 }
 0x39d   :  { %4172 = vmatprep.subr.bf16.mxu0 %v5856_v45  ;;  %4203 = vmatprep.subr.bf16.mxu1 %v5832_v14 }
 0x432   :  { %v1335_v0 = vpop.f32.mrb[6].mxu0  ;;  %v1406_v17 = vpop.f32.mrb[14].mxu1 }
 0x433   :  { %v4513_v30 = vadd.f32 %v1335_v0, %v5837_v5  ;;  %v1337_v55 = vpop.f32.mrb[7].mxu0  ;;  %v3330_v37 = vpop.f32.mrb[15].mxu1  ;;  %v1424_v45 = vadd.f32 %v5224_v13, %v1406_v17  ;;  %v5862_v17 = vld [vmem:[#allocation7_spill] sm:$0xff] }
 0x434   :  { %v4514_v28 = vadd.f32 %v1337_v55, %v5838_v19 }
 0x435   :  { %v2760_v47 = vmul.f32 -1.442695, %v4513_v30 }
 0x436   :  { %v2761_v46 = vmul.f32 -1.442695, %v4514_v28 }
 0x437   :  { %4572 = vpow2.f32 %v2760_v47 }
 0x438   :  { %4574 = vpow2.f32 %v2761_v46  ;;  %v5858_v46 = vld [vmem:[#allocation9_spill] sm:$0xff] }
 0x441   :  { %v4573_v6 = vpop.eup %4572 }
 0x442   :  { %v1414_v40 = vadd.f32 1.0, %v4573_v6  ;;  %v4575_v27 = vpop.eup %4574 }
 0x443   :  { %v1421_v0 = vadd.f32 1.0, %v4575_v27  ;;  %v5860_v27 = vld [vmem:[#allocation6_spill] sm:$0xff] }
 0x444   :  { %4576 = vrcp.f32 %v1414_v40 }
 0x44e   :  { %v4577_v56 = vpop.eup %4576 }
 0x44f   :  { %v1425_v3 = vmul.f32 %v4577_v56, %v1424_v45  ;;  %v5859_v56 = vld [vmem:[#allocation5_spill] sm:$0xff]  ;;  %v5861_v45 = vld [vmem:[#allocation10_spill] sm:$0xff] }
 0x451   :  { %v1426_v35 = vadd.f32 %v1425_v3, %v1266_v4  ;;  %v2767_v3 = vld [vmem:[%s5785_s0 + $0x28] sm:$0xff] }
 0x452   :  { %v5857_v4 = vld [vmem:[#allocation4_spill] sm:$0xff] }
 0x453   :  { %4578 = vtanh.f32 %v1426_v35 }
 0x454   :  { %4580 = vrcp.f32 %v1421_v0  ;;  %v5863_v0 = vld [vmem:[#allocation8_spill] sm:$0xff] }
 0x45d   :  { %v4579_v30 = vpop.eup %4578 }
 0x45e   :  { %v1428_v37 = vsub.f32 %v5410_v31, %v4579_v30  ;;  %v4581_v55 = vpop.eup %4580 }
 0x460   :  { %v1429_v47 = vmul.f32 %v4581_v55, %v1428_v37  ;;  %v5865_v37 = vld [vmem:[#allocation3_spill] sm:$0xff] }
 0x462   :  { %v1430_v28 = vadd.f32 %v4579_v30, %v1429_v47  ;;  %v5864_v30 = vld [vmem:[#allocation11_spill] sm:$0xff] }
 0x464   :  { %v1435_v6 = vsub.f32 %v1430_v28, %v5410_v31 }
 0x466   :  { %v5496_v40 = vadd.f32 %v1435_v6, %v5410_v31  ;;  %v1586_v31 = vpop.f32.mrb[16].mxu1 }
 0x467   :  { %v3365_v35 = vpop.f32.mrb[17].mxu1 }
 0x468   :  { %1655 = vmatmul.mubr.f32.vlgmr.msra.gmra.mrb[8].mxu0 %v5496_v40  ;;  %3399 = vmatmul.mubr.f32.vlgmr.msra.gmra.mrb[18].mxu1 %v5496_v40  ;;  %v1439_v57 = vmul.f32 %v5235_v49, %v5496_v40 }
 0x469   :  { %4174 = vmatpush1.bf16.msra.mxu0 %v4696_v9  ;;  %4205 = vmatpush3.bf16.msra.mxu1 %v4755_v29 }
 0x46a   :  { %1440 = vadd.xlane.f32.xlu1 %v1439_v57  ;;  %4176 = vmatprep.subr.bf16.mxu0 %v4698_v10 }
 0x46b   :  { %4206 = vmatprep.subr.bf16.mxu1 %v5832_v14  ;;  %1834 = vmatprep.mubr.f32.mxu0 %v5833_v58 }
 0x46c   :  { %3433 = vmatprep.mubr.msk.f32.mxu1 %vm4626_vm0, %v5833_v58 }
 0x46d   :  { %4178 = vmatpush1.bf16.msra.mxu0 %v4714_v15  ;;  %4208 = vmatpush3.bf16.msra.mxu1 %v4767_v33 }
 0x46e   :  { %4180 = vmatprep.subr.bf16.mxu0 %v4717_v16  ;;  %4209 = vmatprep.subr.bf16.mxu1 %v5832_v14 }
 0x471   :  { %4182 = vmatpush1.bf16.msra.mxu0 %v4732_v21  ;;  %4211 = vmatpush3.bf16.msra.mxu1 %v4798_v43 }
 0x472   :  { %4184 = vmatprep.subr.bf16.mxu0 %v4738_v23  ;;  %4212 = vmatprep.subr.bf16.mxu1 %v5832_v14 }
 0x475   :  { %4186 = vmatpush1.bf16.msra.mxu0 %v4764_v32  ;;  %4214 = vmatpush3.bf16.msra.mxu1 %v4826_v52 }
 0x476   :  { %4188 = vmatprep.subr.bf16.mxu0 %v4770_v34  ;;  %4215 = vmatprep.subr.bf16.mxu1 %v5832_v14 }
 0x479   :  { %4190 = vmatpush1.bf16.msra.mxu0 %v4792_v41  ;;  %4217 = vmatpush3.bf16.msra.mxu1 %v4854_v61 }
 0x47a   :  { %4192 = vmatprep.subr.bf16.mxu0 %v4801_v44  ;;  %4218 = vmatprep.subr.bf16.mxu1 %v5832_v14 }
 0x47d   :  { %4194 = vmatpush1.bf16.msra.mxu0 %v4820_v50  ;;  %4220 = vmatpush3.bf16.msra.mxu1 %v4882_v11 }
 0x47e   :  { %4196 = vmatprep.subr.bf16.mxu0 %v4829_v53  ;;  %4221 = vmatprep.subr.bf16.mxu1 %v5832_v14 }
 0x481   :  { %4198 = vmatpush1.bf16.msra.mxu0 %v4848_v59  ;;  %4223 = vmatpush3.bf16.msra.mxu1 %v4913_v25 }
 0x482   :  { %4200 = vmatprep.subr.bf16.mxu0 %v4857_v62  ;;  %4224 = vmatprep.subr.bf16.mxu1 %v5832_v14 }
 0x485   :  { %4202 = vmatpush1.bf16.msra.mxu0 %v4876_v7  ;;  %4226 = vmatpush3.bf16.msra.mxu1 %v4941_v38 }
 0x486   :  { %4228 = vmatprep.subr.bf16.mxu0 %v4885_v12  ;;  %4259 = vmatprep.subr.bf16.mxu1 %v5832_v14 }
 0x488   :  { %1835 = vmatmul.mubr.f32.vlgmr.msra.gmra.mrb[10].mxu0 %v2767_v3  ;;  %3434 = vmatmul.mubr.f32.vlgmr.msra.gmra.mrb[20].mxu1 %v2767_v3 }
 0x489   :  { %4230 = vmatpush1.bf16.msra.mxu0 %v4907_v22  ;;  %4261 = vmatpush3.bf16.msra.mxu1 %v4970_v51 }
 0x48a   :  { %4232 = vmatprep.subr.bf16.mxu0 %v4916_v26  ;;  %4262 = vmatprep.subr.bf16.mxu1 %v5832_v14 }
 0x48b   :  { %1975 = vmatprep.mubr.f32.mxu0 %v5833_v58  ;;  %3468 = vmatprep.mubr.msk.f32.mxu1 %vm4626_vm0, %v5833_v58 }
 0x48d   :  { %4234 = vmatpush1.bf16.msra.mxu0 %v4935_v36  ;;  %4264 = vmatpush3.bf16.msra.mxu1 %v4998_v1 }
 0x48e   :  { %4236 = vmatprep.subr.bf16.mxu0 %v4944_v39  ;;  %4265 = vmatprep.subr.bf16.mxu1 %v5832_v14 }
 0x491   :  { %4238 = vmatpush1.bf16.msra.mxu0 %v4964_v48  ;;  %4267 = vmatpush3.bf16.msra.mxu1 %v5028_v20 }
 0x492   :  { %4240 = vmatprep.subr.bf16.mxu0 %v4973_v54  ;;  %4268 = vmatprep.subr.bf16.mxu1 %v5832_v14 }
 0x495   :  { %4242 = vmatpush1.bf16.msra.mxu0 %v4992_v63  ;;  %4270 = vmatpush3.bf16.msra.mxu1 %v5056_v42 }
 0x496   :  { %4244 = vmatprep.subr.bf16.mxu0 %v5001_v2  ;;  %4271 = vmatprep.subr.bf16.mxu1 %v5832_v14 }
 0x499   :  { %4246 = vmatpush1.bf16.msra.mxu0 %v5022_v18  ;;  %4273 = vmatpush3.bf16.msra.mxu1 %v5084_v60 }
 0x49a   :  { %4248 = vmatprep.subr.bf16.mxu0 %v5031_v24  ;;  %4274 = vmatprep.subr.bf16.mxu1 %v5832_v14 }
 0x49d   :  { %4250 = vmatpush1.bf16.msra.mxu0 %v5857_v4  ;;  %4276 = vmatpush3.bf16.msra.mxu1 %v5858_v46 }
 0x49e   :  { %4252 = vmatprep.subr.bf16.mxu0 %v5859_v56  ;;  %4277 = vmatprep.subr.bf16.mxu1 %v5832_v14  ;;  %v1587_v56 = vadd.f32 %v1586_v31, %v5226_v8  ;;  %v2771_v31 = vld [vmem:[%s5785_s0 + $0x30] sm:$0xff] }
 0x4a1   :  { %4254 = vmatpush1.bf16.msra.mxu0 %v5860_v27  ;;  %4279 = vmatpush3.bf16.msra.mxu1 %v5861_v45 }
 0x4a2   :  { %4256 = vmatprep.subr.bf16.mxu0 %v5862_v17  ;;  %4280 = vmatprep.subr.bf16.mxu1 %v5832_v14 }
 0x4a5   :  { %4258 = vmatpush1.bf16.msra.mxu0 %v5863_v0  ;;  %4282 = vmatpush3.bf16.msra.mxu1 %v5864_v30 }
 0x4a6   :  { %4284 = vmatprep.subr.bf16.mxu0 %v5865_v37  ;;  %4315 = vmatprep.subr.bf16.mxu1 %v5832_v14 }
 0x53b   :  { %v1656_v55 = vpop.f32.mrb[8].mxu0  ;;  %v1727_v47 = vpop.f32.mrb[18].mxu1 }
 0x53c   :  { %v4515_v28 = vadd.f32 %v1656_v55, %v5837_v5  ;;  %v1658_v6 = vpop.f32.mrb[9].mxu0  ;;  %v3400_v57 = vpop.f32.mrb[19].mxu1  ;;  %v1745_v37 = vadd.f32 %v5224_v13, %v1727_v47  ;;  %v5873_v47 = vld [vmem:[#allocation11_spill] sm:$0xff] }
 0x53d   :  { %v4516_v3 = vadd.f32 %v1658_v6, %v5838_v19 }
 0x53e   :  { %v2764_v35 = vmul.f32 -1.442695, %v4515_v28 }
 0x53f   :  { %v2765_v17 = vmul.f32 -1.442695, %v4516_v3 }
 0x540   :  { %4582 = vpow2.f32 %v2764_v35 }
 0x541   :  { %4584 = vpow2.f32 %v2765_v17  ;;  %v5869_v17 = vld [vmem:[#allocation6_spill] sm:$0xff] }
 0x54a   :  { %v4583_v45 = vpop.eup %4582 }
 0x54b   :  { %v1735_v27 = vadd.f32 1.0, %v4583_v45  ;;  %v4585_v30 = vpop.eup %4584 }
 0x54c   :  { %v1742_v55 = vadd.f32 1.0, %v4585_v30  ;;  %v5871_v30 = vld [vmem:[#allocation7_spill] sm:$0xff] }
 0x54d   :  { %4586 = vrcp.f32 %v1735_v27 }
 0x557   :  { %v4587_v0 = vpop.eup %4586 }
 0x558   :  { %v1746_v46 = vmul.f32 %v4587_v0, %v1745_v37  ;;  %v5870_v0 = vld [vmem:[#allocation10_spill] sm:$0xff]  ;;  %v5872_v37 = vld [vmem:[#allocation8_spill] sm:$0xff] }
 0x55a   :  { %v1747_v4 = vadd.f32 %v1746_v46, %v1587_v56  ;;  %v5867_v46 = vld [vmem:[#allocation9_spill] sm:$0xff] }
 0x55b   :  { %v5868_v56 = vld [vmem:[#allocation5_spill] sm:$0xff] }
 0x55c   :  { %4588 = vtanh.f32 %v1747_v4  ;;  %v5866_v4 = vld [vmem:[#allocation4_spill] sm:$0xff] }
 0x55d   :  { %4590 = vrcp.f32 %v1742_v55  ;;  %v5874_v55 = vld [vmem:[#allocation3_spill] sm:$0xff] }
 0x566   :  { %v4589_v28 = vpop.eup %4588 }
 0x567   :  { %v1749_v57 = vsub.f32 %v5496_v40, %v4589_v28  ;;  %v4591_v6 = vpop.eup %4590 }
 0x569   :  { %v1750_v35 = vmul.f32 %v4591_v6, %v1749_v57 }
 0x56b   :  { %v1751_v3 = vadd.f32 %v4589_v28, %v1750_v35 }
 0x56d   :  { %v1756_v45 = vsub.f32 %v1751_v3, %v5496_v40 }
 0x56f   :  { %v5582_v27 = vadd.f32 %v1756_v45, %v5496_v40 }
 0x571   :  { %1976 = vmatmul.mubr.f32.vlgmr.msra.gmra.mrb[10].mxu0 %v5582_v27  ;;  %3469 = vmatmul.mubr.f32.vlgmr.msra.gmra.mrb[22].mxu1 %v5582_v27  ;;  %v1760_v13 = vmul.f32 %v5235_v49, %v5582_v27  ;;  %v1907_v49 = vpop.f32.mrb[20].mxu1 }
 0x572   :  { %4286 = vmatpush1.bf16.msra.mxu0 %v4696_v9  ;;  %4317 = vmatpush3.bf16.msra.mxu1 %v4755_v29  ;;  %v3435_v40 = vpop.f32.mrb[21].mxu1 }
 0x573   :  { %1761 = vadd.xlane.f32.xlu0 %v1760_v13  ;;  %4288 = vmatprep.subr.bf16.mxu0 %v4698_v10 }
 0x574   :  { %4318 = vmatprep.subr.bf16.mxu1 %v5832_v14  ;;  %2155 = vmatprep.mubr.f32.mxu0 %v5833_v58 }
 0x575   :  { %3503 = vmatprep.mubr.msk.f32.mxu1 %vm4626_vm0, %v5833_v58 }
 0x576   :  { %4290 = vmatpush1.bf16.msra.mxu0 %v4714_v15  ;;  %4320 = vmatpush3.bf16.msra.mxu1 %v4767_v33 }
 0x577   :  { %4292 = vmatprep.subr.bf16.mxu0 %v4717_v16  ;;  %4321 = vmatprep.subr.bf16.mxu1 %v5832_v14 }
 0x57a   :  { %4294 = vmatpush1.bf16.msra.mxu0 %v4732_v21  ;;  %4323 = vmatpush3.bf16.msra.mxu1 %v4798_v43 }
 0x57b   :  { %4296 = vmatprep.subr.bf16.mxu0 %v4738_v23  ;;  %4324 = vmatprep.subr.bf16.mxu1 %v5832_v14 }
 0x57e   :  { %4298 = vmatpush1.bf16.msra.mxu0 %v4764_v32  ;;  %4326 = vmatpush3.bf16.msra.mxu1 %v4826_v52 }
 0x57f   :  { %4300 = vmatprep.subr.bf16.mxu0 %v4770_v34  ;;  %4327 = vmatprep.subr.bf16.mxu1 %v5832_v14 }
 0x582   :  { %4302 = vmatpush1.bf16.msra.mxu0 %v4792_v41  ;;  %4329 = vmatpush3.bf16.msra.mxu1 %v4854_v61 }
 0x583   :  { %4304 = vmatprep.subr.bf16.mxu0 %v4801_v44  ;;  %4330 = vmatprep.subr.bf16.mxu1 %v5832_v14 }
 0x586   :  { %4306 = vmatpush1.bf16.msra.mxu0 %v4820_v50  ;;  %4332 = vmatpush3.bf16.msra.mxu1 %v4882_v11 }
 0x587   :  { %4308 = vmatprep.subr.bf16.mxu0 %v4829_v53  ;;  %4333 = vmatprep.subr.bf16.mxu1 %v5832_v14 }
 0x58a   :  { %4310 = vmatpush1.bf16.msra.mxu0 %v4848_v59  ;;  %4335 = vmatpush3.bf16.msra.mxu1 %v4913_v25 }
 0x58b   :  { %4312 = vmatprep.subr.bf16.mxu0 %v4857_v62  ;;  %4336 = vmatprep.subr.bf16.mxu1 %v5832_v14 }
 0x58e   :  { %4314 = vmatpush1.bf16.msra.mxu0 %v4876_v7  ;;  %4338 = vmatpush3.bf16.msra.mxu1 %v4941_v38 }
 0x58f   :  { %4340 = vmatprep.subr.bf16.mxu0 %v4885_v12  ;;  %4371 = vmatprep.subr.bf16.mxu1 %v5832_v14 }
 0x591   :  { %2156 = vmatmul.mubr.f32.vlgmr.msra.gmra.mrb[12].mxu0 %v2771_v31  ;;  %3504 = vmatmul.mubr.f32.vlgmr.msra.gmra.mrb[24].mxu1 %v2771_v31 }
 0x592   :  { %4342 = vmatpush1.bf16.msra.mxu0 %v4907_v22  ;;  %4373 = vmatpush3.bf16.msra.mxu1 %v4970_v51 }
 0x593   :  { %4344 = vmatprep.subr.bf16.mxu0 %v4916_v26  ;;  %4374 = vmatprep.subr.bf16.mxu1 %v5832_v14 }
 0x594   :  { %2296 = vmatprep.mubr.f32.mxu0 %v5833_v58  ;;  %3538 = vmatprep.mubr.msk.f32.mxu1 %vm4626_vm0, %v5833_v58 }
 0x596   :  { %4346 = vmatpush1.bf16.msra.mxu0 %v4935_v36  ;;  %4376 = vmatpush3.bf16.msra.mxu1 %v4998_v1 }
 0x597   :  { %4348 = vmatprep.subr.bf16.mxu0 %v4944_v39  ;;  %4377 = vmatprep.subr.bf16.mxu1 %v5832_v14 }
 0x59a   :  { %4350 = vmatpush1.bf16.msra.mxu0 %v4964_v48  ;;  %4379 = vmatpush3.bf16.msra.mxu1 %v5028_v20 }
 0x59b   :  { %4352 = vmatprep.subr.bf16.mxu0 %v4973_v54  ;;  %4380 = vmatprep.subr.bf16.mxu1 %v5832_v14 }
 0x59e   :  { %4354 = vmatpush1.bf16.msra.mxu0 %v4992_v63  ;;  %4382 = vmatpush3.bf16.msra.mxu1 %v5056_v42 }
 0x59f   :  { %4356 = vmatprep.subr.bf16.mxu0 %v5001_v2  ;;  %4383 = vmatprep.subr.bf16.mxu1 %v5832_v14 }
 0x5a2   :  { %4358 = vmatpush1.bf16.msra.mxu0 %v5022_v18  ;;  %4385 = vmatpush3.bf16.msra.mxu1 %v5084_v60 }
 0x5a3   :  { %4360 = vmatprep.subr.bf16.mxu0 %v5031_v24  ;;  %4386 = vmatprep.subr.bf16.mxu1 %v5832_v14 }
 0x5a6   :  { %4362 = vmatpush1.bf16.msra.mxu0 %v5866_v4  ;;  %4388 = vmatpush3.bf16.msra.mxu1 %v5867_v46 }
 0x5a7   :  { %4364 = vmatprep.subr.bf16.mxu0 %v5868_v56  ;;  %4389 = vmatprep.subr.bf16.mxu1 %v5832_v14 }
 0x5aa   :  { %4366 = vmatpush1.bf16.msra.mxu0 %v5869_v17  ;;  %4391 = vmatpush3.bf16.msra.mxu1 %v5870_v0 }
 0x5ab   :  { %4368 = vmatprep.subr.bf16.mxu0 %v5871_v30  ;;  %4392 = vmatprep.subr.bf16.mxu1 %v5832_v14 }
 0x5ae   :  { %4370 = vmatpush1.bf16.msra.mxu0 %v5872_v37  ;;  %4394 = vmatpush3.bf16.msra.mxu1 %v5873_v47 }
 0x5af   :  { %4396 = vmatprep.subr.bf16.mxu0 %v5874_v55  ;;  %4427 = vmatprep.subr.bf16.mxu1 %v5832_v14  ;;  %v5666_v55 = vld [vmem:[%s5788_s4] ss:$0 sm:$0xff] }
 0x644   :  { %v1977_v28 = vpop.f32.mrb[10].mxu0  ;;  %v2048_v57 = vpop.f32.mrb[22].mxu1 }
 0x645   :  { %v4517_v6 = vadd.f32 %v1977_v28, %v5837_v5  ;;  %v1979_v35 = vpop.f32.mrb[11].mxu0  ;;  %v3470_v3 = vpop.f32.mrb[23].mxu1  ;;  %v2066_v37 = vadd.f32 %v5666_v55, %v2048_v57 }
 0x646   :  { %v4518_v13 = vadd.f32 %v1979_v35, %v5838_v19  ;;  %v1908_v3 = vadd.f32 %v1907_v49, %v5226_v8  ;;  %v5680_v49 = vld [vmem:[%s5789_s5] ss:$0 sm:$0xff] }
 0x647   :  { %v2768_v45 = vmul.f32 -1.442695, %v4517_v6 }
 0x648   :  { %v2769_v40 = vmul.f32 -1.442695, %v4518_v13 }
 0x649   :  { %4592 = vpow2.f32 %v2768_v45 }
 0x64a   :  { %4594 = vpow2.f32 %v2769_v40 }
 0x653   :  { %v4593_v31 = vpop.eup %4592 }
 0x654   :  { %v2056_v30 = vadd.f32 1.0, %v4593_v31  ;;  %v4595_v47 = vpop.eup %4594 }
 0x655   :  { %v2063_v5 = vadd.f32 1.0, %v4595_v47 }
 0x656   :  { %4596 = vrcp.f32 %v2056_v30 }
 0x660   :  { %v4597_v28 = vpop.eup %4596 }
 0x661   :  { %v2067_v6 = vmul.f32 %v4597_v28, %v2066_v37 }
 0x663   :  { %v2068_v45 = vadd.f32 %v2067_v6, %v1908_v3 }
 0x665   :  { %4598 = vtanh.f32 %v2068_v45 }
 0x666   :  { %4600 = vrcp.f32 %v2063_v5 }
 0x66f   :  { %v4599_v35 = vpop.eup %4598 }
 0x670   :  { %v2070_v13 = vsub.f32 %v5582_v27, %v4599_v35  ;;  %v4601_v30 = vpop.eup %4600 }
 0x672   :  { %v2071_v40 = vmul.f32 %v4601_v30, %v2070_v13 }
 0x674   :  { %v2072_v31 = vadd.f32 %v4599_v35, %v2071_v40 }
 0x676   :  { %v2077_v19 = vsub.f32 %v2072_v31, %v5582_v27 }
 0x678   :  { %v5673_v0 = vadd.f32 %v2077_v19, %v5582_v27 }
 0x67a   :  { %2297 = vmatmul.mubr.f32.vlgmr.msra.gmra.mrb[12].mxu0 %v5673_v0  ;;  %3539 = vmatmul.mubr.f32.vlgmr.msra.gmra.mrb[26].mxu1 %v5673_v0  ;;  %v2081_v5 = vmul.f32 %v5680_v49, %v5673_v0 }
 0x67b   :  { %4398 = vmatpush1.bf16.msra.mxu0 %v4696_v9  ;;  %4429 = vmatpush3.bf16.msra.mxu1 %v4755_v29  ;;  %v2228_v9 = vpop.f32.mrb[24].mxu1  ;;  %v5878_v29 = vld [vmem:[#allocation11_spill] sm:$0xff] }
 0x67c   :  { %2082 = vadd.xlane.f32.xlu1 %v2081_v5  ;;  %4400 = vmatprep.subr.bf16.mxu0 %v4698_v10  ;;  %v3505_v10 = vpop.f32.mrb[25].mxu1 }
 0x67d   :  { %4430 = vmatprep.subr.bf16.mxu1 %v5832_v14  ;;  %2476 = vmatprep.mubr.f32.mxu0 %v5833_v58  ;;  %v478_v10 = vpop.xlane.xlu0 %477 }
 0x67e   :  { %3573 = vmatprep.mubr.msk.f32.mxu1 %vm4626_vm0, %v5833_v58 }
 0x67f   :  { %4402 = vmatpush1.bf16.msra.mxu0 %v4714_v15  ;;  %4432 = vmatpush3.bf16.msra.mxu1 %v4767_v33  ;;  %v2775_v15 = vld [vmem:[%s5785_s0 + $0x38] sm:$0xff] }
 0x680   :  { %4404 = vmatprep.subr.bf16.mxu0 %v4717_v16  ;;  %4433 = vmatprep.subr.bf16.mxu1 %v5832_v14  ;;  %v5875_v16 = vld [vmem:[#allocation10_spill] sm:$0xff] }
 0x683   :  { %4406 = vmatpush1.bf16.msra.mxu0 %v4732_v21  ;;  %4435 = vmatpush3.bf16.msra.mxu1 %v4798_v43  ;;  %v5876_v21 = vld [vmem:[#allocation7_spill] sm:$0xff] }
 0x684   :  { %4408 = vmatprep.subr.bf16.mxu0 %v4738_v23  ;;  %4436 = vmatprep.subr.bf16.mxu1 %v5832_v14  ;;  %v5877_v23 = vld [vmem:[#allocation8_spill] sm:$0xff] }
 0x687   :  { %4410 = vmatpush1.bf16.msra.mxu0 %v4764_v32  ;;  %4438 = vmatpush3.bf16.msra.mxu1 %v4826_v52  ;;  %v5880_v52 = vld [vmem:[#allocation13_spill] sm:$0xff] }
 0x688   :  { %4412 = vmatprep.subr.bf16.mxu0 %v4770_v34  ;;  %4439 = vmatprep.subr.bf16.mxu1 %v5832_v14  ;;  %v5879_v34 = vld [vmem:[#allocation12_spill] sm:$0xff] }
 0x68b   :  { %4414 = vmatpush1.bf16.msra.mxu0 %v4792_v41  ;;  %4441 = vmatpush3.bf16.msra.mxu1 %v4854_v61 }
 0x68c   :  { %4416 = vmatprep.subr.bf16.mxu0 %v4801_v44  ;;  %4442 = vmatprep.subr.bf16.mxu1 %v5832_v14 }
 0x68f   :  { %4418 = vmatpush1.bf16.msra.mxu0 %v4820_v50  ;;  %4444 = vmatpush3.bf16.msra.mxu1 %v4882_v11 }
 0x690   :  { %4420 = vmatprep.subr.bf16.mxu0 %v4829_v53  ;;  %4445 = vmatprep.subr.bf16.mxu1 %v5832_v14 }
 0x693   :  { %4422 = vmatpush1.bf16.msra.mxu0 %v4848_v59  ;;  %4447 = vmatpush3.bf16.msra.mxu1 %v4913_v25 }
 0x694   :  { %4424 = vmatprep.subr.bf16.mxu0 %v4857_v62  ;;  %4448 = vmatprep.subr.bf16.mxu1 %v5832_v14 }
 0x697   :  { %4426 = vmatpush1.bf16.msra.mxu0 %v4876_v7  ;;  %4450 = vmatpush3.bf16.msra.mxu1 %v4941_v38 }
 0x698   :  { %4452 = vmatprep.subr.bf16.mxu0 %v4885_v12  ;;  %4483 = vmatprep.subr.bf16.mxu1 %v5832_v14 }
 0x69a   :  { %2477 = vmatmul.mubr.f32.vlgmr.msra.gmra.mrb[14].mxu0 %v2775_v15  ;;  %3574 = vmatmul.mubr.f32.vlgmr.msra.gmra.mrb[28].mxu1 %v2775_v15 }
 0x69b   :  { %4454 = vmatpush1.bf16.msra.mxu0 %v4907_v22  ;;  %4485 = vmatpush3.bf16.msra.mxu1 %v4970_v51  ;;  %v2229_v22 = vadd.f32 %v2228_v9, %v5226_v8 }
 0x69c   :  { %4456 = vmatprep.subr.bf16.mxu0 %v4916_v26  ;;  %4486 = vmatprep.subr.bf16.mxu1 %v5832_v14 }
 0x69d   :  { %2617 = vmatprep.mubr.f32.mxu0 %v5833_v58  ;;  %3608 = vmatprep.mubr.msk.f32.mxu1 %vm4626_vm0, %v5833_v58 }
 0x69f   :  { %4458 = vmatpush1.bf16.msra.mxu0 %v4935_v36  ;;  %4488 = vmatpush3.bf16.msra.mxu1 %v4998_v1 }
 0x6a0   :  { %4460 = vmatprep.subr.bf16.mxu0 %v4944_v39  ;;  %4489 = vmatprep.subr.bf16.mxu1 %v5832_v14 }
 0x6a3   :  { %4462 = vmatpush1.bf16.msra.mxu0 %v4964_v48  ;;  %4491 = vmatpush3.bf16.msra.mxu1 %v5028_v20 }
 0x6a4   :  { %4464 = vmatprep.subr.bf16.mxu0 %v4973_v54  ;;  %4492 = vmatprep.subr.bf16.mxu1 %v5832_v14 }
 0x6a7   :  { %4466 = vmatpush1.bf16.msra.mxu0 %v4992_v63  ;;  %4494 = vmatpush3.bf16.msra.mxu1 %v5056_v42 }
 0x6a8   :  { %4468 = vmatprep.subr.bf16.mxu0 %v5001_v2  ;;  %4495 = vmatprep.subr.bf16.mxu1 %v5832_v14 }
 0x6ab   :  { %4470 = vmatpush1.bf16.msra.mxu0 %v5022_v18  ;;  %4497 = vmatpush3.bf16.msra.mxu1 %v5084_v60 }
 0x6ac   :  { %4472 = vmatprep.subr.bf16.mxu0 %v5031_v24  ;;  %4498 = vmatprep.subr.bf16.mxu1 %v5832_v14 }
 0x6af   :  { %4474 = vmatpush1.bf16.msra.mxu0 %v5866_v4  ;;  %4500 = vmatpush3.bf16.msra.mxu1 %v5867_v46 }
 0x6b0   :  { %4476 = vmatprep.subr.bf16.mxu0 %v5868_v56  ;;  %4501 = vmatprep.subr.bf16.mxu1 %v5832_v14 }
 0x6b3   :  { %4478 = vmatpush1.bf16.msra.mxu0 %v5869_v17  ;;  %4503 = vmatpush3.bf16.msra.mxu1 %v5875_v16  ;;  %v799_v16 = vpop.xlane.xlu0 %798 }
 0x6b4   :  { %4480 = vmatprep.subr.bf16.mxu0 %v5876_v21  ;;  %4504 = vmatprep.subr.bf16.mxu1 %v5832_v14  ;;  %v1120_v21 = vpop.xlane.xlu1 %1119 }
 0x6b7   :  { %4482 = vmatpush1.bf16.msra.mxu0 %v5877_v23  ;;  %4506 = vmatpush3.bf16.msra.mxu1 %v5878_v29 }
 0x74d   :  { %v2298_v32 = vpop.f32.mrb[12].mxu0  ;;  %v2369_v33 = vpop.f32.mrb[26].mxu1 }
 0x74e   :  { %v4519_v41 = vadd.f32 %v2298_v32, %v5879_v34  ;;  %v2300_v43 = vpop.f32.mrb[13].mxu0  ;;  %v3540_v44 = vpop.f32.mrb[27].mxu1  ;;  %v2387_v11 = vadd.f32 %v5666_v55, %v2369_v33 }
 0x74f   :  { %v4520_v53 = vadd.f32 %v2300_v43, %v5880_v52  ;;  %v1441_v33 = vpop.xlane.xlu1 %1440  ;;  %v1762_v44 = vpop.xlane.xlu0 %1761 }
 0x750   :  { %v2772_v50 = vmul.f32 -1.442695, %v4519_v41 }
 0x751   :  { %v2773_v59 = vmul.f32 -1.442695, %v4520_v53 }
 0x752   :  { %4602 = vpow2.f32 %v2772_v50 }
 0x753   :  { %4604 = vpow2.f32 %v2773_v59  ;;  %v2083_v59 = vpop.xlane.xlu1 %2082 }
 0x75c   :  { %v4603_v61 = vpop.eup %4602 }
 0x75d   :  { %v2377_v62 = vadd.f32 1.0, %v4603_v61  ;;  %v4605_v7 = vpop.eup %4604 }
 0x75e   :  { %v2384_v36 = vadd.f32 1.0, %v4605_v7 }
 0x75f   :  { %4606 = vrcp.f32 %v2377_v62 }
 0x769   :  { %v4607_v12 = vpop.eup %4606 }
 0x76a   :  { %v2388_v25 = vmul.f32 %v4607_v12, %v2387_v11 }
 0x76c   :  { %v2389_v26 = vadd.f32 %v2388_v25, %v2229_v22 }
 0x76d   :  { %v2549_v18 = vpop.f32.mrb[28].mxu1 }
 0x76e   :  { %4608 = vtanh.f32 %v2389_v26  ;;  %v3575_v20 = vpop.f32.mrb[29].mxu1  ;;  %v2550_v57 = vadd.f32 %v2549_v18, %v5226_v8  ;;  %v5881_v8 = vlaneseq }
 0x76f   :  { %4610 = vrcp.f32 %v2384_v36 }
 0x778   :  { %v4609_v38 = vpop.eup %4608 }
 0x779   :  { %v2391_v39 = vsub.f32 %v5673_v0, %v4609_v38  ;;  %v4611_v48 = vpop.eup %4610 }
 0x77b   :  { %v2392_v51 = vmul.f32 %v4611_v48, %v2391_v39 }
 0x77d   :  { %v2393_v54 = vadd.f32 %v4609_v38, %v2392_v51 }
 0x77f   :  { %v2398_v63 = vsub.f32 %v2393_v54, %v5673_v0 }
 0x781   :  { %v2401_v1 = vadd.f32 %v2398_v63, %v5673_v0 }
 0x783   :  { %2618 = vmatmul.mubr.f32.vlgmr.msra.gmra.mrb[14].mxu0 %v2401_v1  ;;  %3609 = vmatmul.mubr.f32.vlgmr.msra.gmra.mrb[30].mxu1 %v2401_v1  ;;  %v2402_v2 = vmul.f32 %v5680_v49, %v2401_v1 }
 0x785   :  { %2403 = vadd.xlane.f32.xlu0 %v2402_v2 }
 0x812   :  { %v2404_v11 = vpop.xlane.xlu0 %2403 }
 0x856   :  { %v2619_v24 = vpop.f32.mrb[14].mxu0  ;;  %v2690_v42 = vpop.f32.mrb[30].mxu1 }
 0x857   :  { %v4521_v60 = vadd.f32 %v2619_v24, %v5879_v34  ;;  %v2621_v14 = vpop.f32.mrb[15].mxu0  ;;  %v3610_v19 = vpop.f32.mrb[31].mxu1  ;;  %v2708_v37 = vadd.f32 %v5666_v55, %v2690_v42  ;;  %v162_v55 = vand.u32 127, %v5881_v8 }
 0x858   :  { %v4522_v4 = vadd.f32 %v2621_v14, %v5880_v52 }
 0x859   :  { %v2776_v27 = vmul.f32 -1.442695, %v4521_v60  ;;  %vm800_vm1 = vcmp.eq.s32.totalorder %v162_v55, 1  ;;  %vm479_vm2 = vcmp.eq.s32.totalorder %v162_v55, 0  ;;  %vm1121_vm3 = vcmp.eq.s32.totalorder %v162_v55, 2 }
 0x85a   :  { %v2777_v46 = vmul.f32 -1.442695, %v4522_v4  ;;  %v2754_v15 = vsel %vm800_vm1, 1.0, %v5833_v58  ;;  %vm1442_vm4 = vcmp.eq.s32.totalorder %v162_v55, 3  ;;  %v2750_v23 = vsel %vm479_vm2, 1.0, %v5833_v58 }
 0x85b   :  { %4612 = vpow2.f32 %v2776_v27  ;;  %v803_v29 = vmul.f32 %v2754_v15, %v799_v16  ;;  %vm1763_vm5 = vcmp.eq.s32.totalorder %v162_v55, 4  ;;  %v2762_v32 = vsel %vm1442_vm4, 1.0, %v5833_v58 }
 0x85c   :  { %4614 = vpow2.f32 %v2777_v46  ;;  %v482_v34 = vmul.f32 %v2750_v23, %v478_v10  ;;  %vm2084_vm6 = vcmp.eq.s32.totalorder %v162_v55, 5  ;;  %v2766_v43 = vsel %vm1763_vm5, 1.0, %v5833_v58 }
 0x85d   :  { %v1445_v52 = vmul.f32 %v2762_v32, %v1441_v33  ;;  %vm2405_vm7 = vcmp.eq.s32.totalorder %v162_v55, 6  ;;  %v2770_v53 = vsel %vm2084_vm6, 1.0, %v5833_v58  ;;  %v1766_v62 = vmul.f32 %v2766_v43, %v1762_v44 }
 0x85e   :  { %v804_v50 = vadd.f32 %v803_v29, %v482_v34  ;;  %v2774_v7 = vsel %vm2405_vm7, 1.0, %v5833_v58  ;;  %v2087_v22 = vmul.f32 %v2770_v53, %v2083_v59  ;;  %vm2726_vm8 = vcmp.eq.s32.totalorder %v162_v55, 7 }
 0x85f   :  { %v2408_v26 = vmul.f32 %v2774_v7, %v2404_v11  ;;  %v2778_v36 = vsel %vm2726_vm8, 1.0, %v5833_v58 }
 0x865   :  { %v4613_v56 = vpop.eup %4612 }
 0x866   :  { %v2698_v17 = vadd.f32 1.0, %v4613_v56  ;;  %v4615_v0 = vpop.eup %4614 }
 0x867   :  { %v2705_v6 = vadd.f32 1.0, %v4615_v0 }
 0x868   :  { %4616 = vrcp.f32 %v2698_v17 }
 0x872   :  { %v4617_v47 = vpop.eup %4616 }
 0x873   :  { %v2709_v28 = vmul.f32 %v4617_v47, %v2708_v37 }
 0x875   :  { %v2710_v3 = vadd.f32 %v2709_v28, %v2550_v57 }
 0x877   :  { %4618 = vtanh.f32 %v2710_v3 }
 0x878   :  { %4620 = vrcp.f32 %v2705_v6 }
 0x881   :  { %v4619_v45 = vpop.eup %4618 }
 0x882   :  { %v2712_v35 = vsub.f32 %v2401_v1, %v4619_v45  ;;  %v4621_v13 = vpop.eup %4620 }
 0x884   :  { %v2713_v30 = vmul.f32 %v4621_v13, %v2712_v35 }
 0x886   :  { %v2714_v40 = vadd.f32 %v4619_v45, %v2713_v30 }
 0x888   :  { %v2719_v31 = vsub.f32 %v2714_v40, %v2401_v1 }
 0x88a   :  { %v2722_v5 = vadd.f32 %v2719_v31, %v2401_v1 }
 0x88c   :  { %v2723_v9 = vmul.f32 %v5680_v49, %v2722_v5  ;;  %2737 = vst [vmem:[%s5790_s8] sm:$0xff] %v2722_v5  ;;  %v2758_v49 = vsel %vm1121_vm3, 1.0, %v5833_v58 }
 0x88d   :  { %v1124_v41 = vmul.f32 %v2758_v49, %v1120_v21 }
 0x88e   :  { %2724 = vadd.xlane.f32.xlu1 %v2723_v9 }
 0x88f   :  { %v1125_v61 = vadd.f32 %v1124_v41, %v804_v50 }
 0x891   :  { %v1446_v12 = vadd.f32 %v1445_v52, %v1125_v61 }
 0x893   :  { %v1767_v25 = vadd.f32 %v1766_v62, %v1446_v12 }
 0x895   :  { %v2088_v38 = vadd.f32 %v2087_v22, %v1767_v25 }
 0x897   :  { %v2409_v48 = vadd.f32 %v2408_v26, %v2088_v38 }
 0x91b   :  { %v2725_v39 = vpop.xlane.xlu1 %2724 }
 0x91c   :  { %v2729_v51 = vmul.f32 %v2778_v36, %v2725_v39 }
 0x91e   :  { %v2730_v54 = vadd.f32 %v2729_v51, %v2409_v48 }
 0x920   :  { %2733 = vst.msk [vmem:[%s5791_s7] sm:$0xff] %vm2732_vm9, %v2730_v54 }

// kernel: gru_forward.1
= control target key start
LH: loop header
LB: loop body
LE: loop exit
PB: predicated region body
PF: predicated region fallthrough
CT: control target
= control target key end

     0   :  { %v5795_v3 = vmov 0.0|0.0   ;;  %v5792_v4 = vmov 0.0   ;;  %vm4626_vm0 = vmmov 0   ;;  %vm2732_vm9 = vcmask 64512   ;;  %s5783_s1 = inlined_call_operand.vmem [shape: f32[128,384], index: 1, kind: input, shape index: {}]   ;;  %s5784_s2 = inlined_call_operand.vmem [shape: f32[128,384], index: 2, kind: input, shape index: {}]   ;;  %s5785_s0 = inlined_call_operand.vmem [shape: f32[8,8,128], index: 0, kind: input, shape index: {}]   ;;  %s5786_s6 = inlined_call_operand.vmem [shape: f32[8,128], index: 6, kind: input, shape index: {}]   ;;  %s5787_s3 = inlined_call_operand.vmem [shape: f32[1,384], index: 3, kind: input, shape index: {}]   ;;  %s5788_s4 = inlined_call_operand.vmem [shape: f32[1,128], index: 4, kind: input, shape index: {}]   ;;  %s5789_s5 = inlined_call_operand.vmem [shape: f32[1,128], index: 5, kind: input, shape index: {}]   ;;  %s5790_s8 = inlined_call_operand.vmem [shape: f32[8,128], index: 8, kind: output, shape index: {1}]   ;;  %s5791_s7 = inlined_call_operand.vmem [shape: f32[8,8], index: 7, kind: output, shape index: {0}]  }
   0x1   :  { %v35_v0 = vld [vmem:[%s5783_s1 + $0x8] sm:$0xff]  ;;  %v38_v1 = vld [vmem:[%s5783_s1 + $0x20] sm:$0xff]  ;;  %3643 = vmatprep.subr.bf16.mxu1 %v5795_v3  ;;  %230 = vmatprep.mubr.f32.mxu0 %v5792_v4  ;;  %v37_v6 = vld [vmem:[%s5783_s1 + $0x18] sm:$0xff] }
   0x2   :  { %v34_v2 = vld [vmem:[%s5783_s1] sm:$0xff]  ;;  %v4683_v5 = vpack.c.bf16 %v38_v1, %v35_v0  ;;  %v41_v7 = vld [vmem:[%s5783_s1 + $0x38] sm:$0xff]  ;;  %v44_v8 = vld [vmem:[%s5783_s1 + $0x50] sm:$0xff]  ;;  %3083 = vmatprep.mubr.msk.f32.mxu1 %vm4626_vm0, %v5792_v4 }
   0x3   :  { %v4696_v9 = vpack.c.bf16 %v37_v6, %v34_v2  ;;  %v4698_v10 = vpack.c.bf16 %v44_v8, %v41_v7  ;;  %v40_v11 = vld [vmem:[%s5783_s1 + $0x30] sm:$0xff]  ;;  %v43_v12 = vld [vmem:[%s5783_s1 + $0x48] sm:$0xff]  ;;  %v50_v14 = vld [vmem:[%s5783_s1 + $0x80] sm:$0xff] }
   0x4   :  { %5821 = vst [vmem:[#allocation3_spill] sm:$0xff] %v4683_v5  ;;  %v47_v13 = vld [vmem:[%s5783_s1 + $0x68] sm:$0xff]  ;;  %3612 = vmatprep.subr.bf16.mxu0 %v4683_v5  ;;  %v4714_v15 = vpack.c.bf16 %v43_v12, %v40_v11  ;;  %v46_v17 = vld [vmem:[%s5783_s1 + $0x60] sm:$0xff]  ;;  %v49_v18 = vld [vmem:[%s5783_s1 + $0x78] sm:$0xff] }
   0x5   :  { %3614 = vmatpush1.bf16.msra.mxu0 %v4696_v9  ;;  %v4717_v16 = vpack.c.bf16 %v50_v14, %v47_v13  ;;  %v53_v19 = vld [vmem:[%s5783_s1 + $0x98] sm:$0xff]  ;;  %v56_v20 = vld [vmem:[%s5783_s1 + $0xb0] sm:$0xff]  ;;  %v4732_v21 = vpack.c.bf16 %v49_v18, %v46_v17  ;;  %v55_v24 = vld [vmem:[%s5783_s1 + $0xa8] sm:$0xff] }
   0x6   :  { %3616 = vmatprep.subr.bf16.mxu0 %v4698_v10  ;;  %v52_v22 = vld [vmem:[%s5783_s1 + $0x90] sm:$0xff]  ;;  %v4738_v23 = vpack.c.bf16 %v56_v20, %v53_v19  ;;  %v39_v26 = vld [vmem:[%s5783_s1 + $0x28] sm:$0xff]  ;;  %v62_v28 = vld [vmem:[%s5783_s1 + $0xe0] sm:$0xff] }
   0x7   :  { %v36_v25 = vld [vmem:[%s5783_s1 + $0x10] sm:$0xff]  ;;  %v59_v27 = vld [vmem:[%s5783_s1 + $0xc8] sm:$0xff]  ;;  %v42_v30 = vld [vmem:[%s5783_s1 + $0x40] sm:$0xff]  ;;  %v4764_v32 = vpack.c.bf16 %v55_v24, %v52_v22 }
   0x8   :  { %v4755_v29 = vpack.c.bf16 %v39_v26, %v36_v25  ;;  %v45_v31 = vld [vmem:[%s5783_s1 + $0x58] sm:$0xff]  ;;  %v4770_v34 = vpack.c.bf16 %v62_v28, %v59_v27  ;;  %v58_v35 = vld [vmem:[%s5783_s1 + $0xc0] sm:$0xff]  ;;  %v48_v37 = vld [vmem:[%s5783_s1 + $0x70] sm:$0xff] }
   0x9   :  { %3618 = vmatpush1.bf16.msra.mxu0 %v4714_v15  ;;  %v4767_v33 = vpack.c.bf16 %v45_v31, %v42_v30  ;;  %v61_v36 = vld [vmem:[%s5783_s1 + $0xd8] sm:$0xff]  ;;  %v68_v39 = vld [vmem:[%s5783_s1 + $0x110] sm:$0xff]  ;;  %v51_v40 = vld [vmem:[%s5783_s1 + $0x88] sm:$0xff] }
   0xa   :  { %3620 = vmatprep.subr.bf16.mxu0 %v4717_v16  ;;  %3645 = vmatpush3.bf16.msra.mxu1 %v4755_v29  ;;  %v65_v38 = vld [vmem:[%s5783_s1 + $0xf8] sm:$0xff]  ;;  %v4792_v41 = vpack.c.bf16 %v61_v36, %v58_v35  ;;  %v64_v42 = vld [vmem:[%s5783_s1 + $0xf0] sm:$0xff]  ;;  %v4798_v43 = vpack.c.bf16 %v51_v40, %v48_v37  ;;  %v67_v45 = vld [vmem:[%s5783_s1 + $0x108] sm:$0xff] }
   0xb   :  { %3646 = vmatprep.subr.bf16.mxu1 %v5795_v3  ;;  %v4801_v44 = vpack.c.bf16 %v68_v39, %v65_v38  ;;  %v54_v46 = vld [vmem:[%s5783_s1 + $0xa0] sm:$0xff]  ;;  %v57_v47 = vld [vmem:[%s5783_s1 + $0xb8] sm:$0xff]  ;;  %v71_v48 = vld [vmem:[%s5783_s1 + $0x128] sm:$0xff]  ;;  %v4820_v50 = vpack.c.bf16 %v67_v45, %v64_v42 }
   0xc   :  { %v74_v49 = vld [vmem:[%s5783_s1 + $0x140] sm:$0xff]  ;;  %v4826_v52 = vpack.c.bf16 %v57_v47, %v54_v46  ;;  %v73_v54 = vld [vmem:[%s5783_s1 + $0x138] sm:$0xff]  ;;  %v60_v55 = vld [vmem:[%s5783_s1 + $0xd0] sm:$0xff] }
   0xd   :  { %3622 = vmatpush1.bf16.msra.mxu0 %v4732_v21  ;;  %v70_v51 = vld [vmem:[%s5783_s1 + $0x120] sm:$0xff]  ;;  %v4829_v53 = vpack.c.bf16 %v74_v49, %v71_v48  ;;  %v63_v56 = vld [vmem:[%s5783_s1 + $0xe8] sm:$0xff]  ;;  %v77_v57 = vld [vmem:[%s5783_s1 + $0x158] sm:$0xff] }
   0xe   :  { %3624 = vmatprep.subr.bf16.mxu0 %v4738_v23  ;;  %3648 = vmatpush3.bf16.msra.mxu1 %v4767_v33  ;;  %v80_v58 = vld [vmem:[%s5783_s1 + $0x170] sm:$0xff]  ;;  %v4848_v59 = vpack.c.bf16 %v73_v54, %v70_v51  ;;  %v4854_v61 = vpack.c.bf16 %v63_v56, %v60_v55  ;;  %v79_v63 = vld [vmem:[%s5783_s1 + $0x168] sm:$0xff]  ;;  %v66_v0 = vld [vmem:[%s5783_s1 + $0x100] sm:$0xff] }
   0xf   :  { %3649 = vmatprep.subr.bf16.mxu1 %v5795_v3  ;;  %v76_v60 = vld [vmem:[%s5783_s1 + $0x150] sm:$0xff]  ;;  %v4857_v62 = vpack.c.bf16 %v80_v58, %v77_v57  ;;  %v69_v1 = vld [vmem:[%s5783_s1 + $0x118] sm:$0xff]  ;;  %v83_v2 = vld [vmem:[%s5784_s2 + $0x8] sm:$0xff] }
  0x10   :  { %v86_v6 = vld [vmem:[%s5784_s2 + $0x20] sm:$0xff]  ;;  %v4876_v7 = vpack.c.bf16 %v79_v63, %v76_v60  ;;  %v4882_v11 = vpack.c.bf16 %v69_v1, %v66_v0  ;;  %v85_v13 = vld [vmem:[%s5784_s2 + $0x18] sm:$0xff]  ;;  %v72_v14 = vld [vmem:[%s5783_s1 + $0x130] sm:$0xff] }
  0x11   :  { %3626 = vmatpush1.bf16.msra.mxu0 %v4764_v32  ;;  %v82_v8 = vld [vmem:[%s5784_s2] sm:$0xff]  ;;  %v4885_v12 = vpack.c.bf16 %v86_v6, %v83_v2  ;;  %v75_v17 = vld [vmem:[%s5783_s1 + $0x148] sm:$0xff]  ;;  %v89_v18 = vld [vmem:[%s5784_s2 + $0x38] sm:$0xff] }
  0x12   :  { %3628 = vmatprep.subr.bf16.mxu0 %v4770_v34  ;;  %3651 = vmatpush3.bf16.msra.mxu1 %v4798_v43  ;;  %v92_v19 = vld [vmem:[%s5784_s2 + $0x50] sm:$0xff]  ;;  %v165_v20 = vld [vmem:[%s5785_s0] sm:$0xff]  ;;  %v4907_v22 = vpack.c.bf16 %v85_v13, %v82_v8  ;;  %v4913_v25 = vpack.c.bf16 %v75_v17, %v72_v14  ;;  %v91_v27 = vld [vmem:[%s5784_s2 + $0x48] sm:$0xff] }
  0x13   :  { %3652 = vmatprep.subr.bf16.mxu1 %v5795_v3  ;;  %v88_v24 = vld [vmem:[%s5784_s2 + $0x30] sm:$0xff]  ;;  %v4916_v26 = vpack.c.bf16 %v92_v19, %v89_v18  ;;  %v78_v28 = vld [vmem:[%s5783_s1 + $0x160] sm:$0xff]  ;;  %v81_v30 = vld [vmem:[%s5783_s1 + $0x178] sm:$0xff] }
  0x14   :  { %v95_v31 = vld [vmem:[%s5784_s2 + $0x68] sm:$0xff]  ;;  %v98_v35 = vld [vmem:[%s5784_s2 + $0x80] sm:$0xff]  ;;  %v4935_v36 = vpack.c.bf16 %v91_v27, %v88_v24  ;;  %v4941_v38 = vpack.c.bf16 %v81_v30, %v78_v28  ;;  %v97_v40 = vld [vmem:[%s5784_s2 + $0x78] sm:$0xff] }
  0x15   :  { %3630 = vmatpush1.bf16.msra.mxu0 %v4792_v41  ;;  %v94_v37 = vld [vmem:[%s5784_s2 + $0x60] sm:$0xff]  ;;  %v4944_v39 = vpack.c.bf16 %v98_v35, %v95_v31  ;;  %v84_v42 = vld [vmem:[%s5784_s2 + $0x10] sm:$0xff]  ;;  %v87_v45 = vld [vmem:[%s5784_s2 + $0x28] sm:$0xff] }
  0x16   :  { %3632 = vmatprep.subr.bf16.mxu0 %v4801_v44  ;;  %3654 = vmatpush3.bf16.msra.mxu1 %v4826_v52  ;;  %v101_v46 = vld [vmem:[%s5784_s2 + $0x98] sm:$0xff]  ;;  %v104_v47 = vld [vmem:[%s5784_s2 + $0xb0] sm:$0xff]  ;;  %v4964_v48 = vpack.c.bf16 %v97_v40, %v94_v37  ;;  %v4970_v51 = vpack.c.bf16 %v87_v45, %v84_v42  ;;  %v103_v55 = vld [vmem:[%s5784_s2 + $0xa8] sm:$0xff] }
  0x17   :  { %3655 = vmatprep.subr.bf16.mxu1 %v5795_v3  ;;  %v100_v49 = vld [vmem:[%s5784_s2 + $0x90] sm:$0xff]  ;;  %v4973_v54 = vpack.c.bf16 %v104_v47, %v101_v46  ;;  %v90_v56 = vld [vmem:[%s5784_s2 + $0x40] sm:$0xff]  ;;  %v93_v57 = vld [vmem:[%s5784_s2 + $0x58] sm:$0xff] }
  0x18   :  { %v107_v58 = vld [vmem:[%s5784_s2 + $0xc8] sm:$0xff]  ;;  %v110_v60 = vld [vmem:[%s5784_s2 + $0xe0] sm:$0xff]  ;;  %v4992_v63 = vpack.c.bf16 %v103_v55, %v100_v49  ;;  %v4998_v1 = vpack.c.bf16 %v93_v57, %v90_v56  ;;  %v109_v6 = vld [vmem:[%s5784_s2 + $0xd8] sm:$0xff] }
  0x19   :  { %3634 = vmatpush1.bf16.msra.mxu0 %v4820_v50  ;;  %v106_v0 = vld [vmem:[%s5784_s2 + $0xc0] sm:$0xff]  ;;  %v5001_v2 = vpack.c.bf16 %v110_v60, %v107_v58  ;;  %v96_v8 = vld [vmem:[%s5784_s2 + $0x70] sm:$0xff]  ;;  %v99_v13 = vld [vmem:[%s5784_s2 + $0x88] sm:$0xff] }
  0x1a   :  { %3636 = vmatprep.subr.bf16.mxu0 %v4829_v53  ;;  %3657 = vmatpush3.bf16.msra.mxu1 %v4854_v61  ;;  %v113_v14 = vld [vmem:[%s5784_s2 + $0xf8] sm:$0xff]  ;;  %v116_v17 = vld [vmem:[%s5784_s2 + $0x110] sm:$0xff]  ;;  %v5022_v18 = vpack.c.bf16 %v109_v6, %v106_v0  ;;  %v115_v27 = vld [vmem:[%s5784_s2 + $0x108] sm:$0xff] }
  0x1b   :  { %3658 = vmatprep.subr.bf16.mxu1 %v5795_v3  ;;  %v112_v19 = vld [vmem:[%s5784_s2 + $0xf0] sm:$0xff]  ;;  %v5031_v24 = vpack.c.bf16 %v116_v17, %v113_v14  ;;  %v102_v28 = vld [vmem:[%s5784_s2 + $0xa0] sm:$0xff]  ;;  %v105_v30 = vld [vmem:[%s5784_s2 + $0xb8] sm:$0xff] }
  0x1c   :  { %v119_v31 = vld [vmem:[%s5784_s2 + $0x128] sm:$0xff]  ;;  %v122_v35 = vld [vmem:[%s5784_s2 + $0x140] sm:$0xff]  ;;  %v5050_v37 = vpack.c.bf16 %v115_v27, %v112_v19  ;;  %v5056_v42 = vpack.c.bf16 %v105_v30, %v102_v28  ;;  %v121_v46 = vld [vmem:[%s5784_s2 + $0x138] sm:$0xff] }
  0x1d   :  { %3638 = vmatpush1.bf16.msra.mxu0 %v4848_v59  ;;  %v118_v40 = vld [vmem:[%s5784_s2 + $0x120] sm:$0xff]  ;;  %v5059_v45 = vpack.c.bf16 %v122_v35, %v119_v31  ;;  %v108_v47 = vld [vmem:[%s5784_s2 + $0xd0] sm:$0xff]  ;;  %v111_v49 = vld [vmem:[%s5784_s2 + $0xe8] sm:$0xff] }
  0x1e   :  { %3640 = vmatprep.subr.bf16.mxu0 %v4857_v62  ;;  %3660 = vmatpush3.bf16.msra.mxu1 %v4882_v11  ;;  %5822 = vst [vmem:[#allocation4_spill] sm:$0xff] %v5050_v37  ;;  %v125_v55 = vld [vmem:[%s5784_s2 + $0x158] sm:$0xff]  ;;  %v128_v56 = vld [vmem:[%s5784_s2 + $0x170] sm:$0xff]  ;;  %v5078_v57 = vpack.c.bf16 %v121_v46, %v118_v40  ;;  %v5084_v60 = vpack.c.bf16 %v111_v49, %v108_v47  ;;  %v127_v6 = vld [vmem:[%s5784_s2 + $0x168] sm:$0xff] }
  0x1f   :  { %3661 = vmatprep.subr.bf16.mxu1 %v5795_v3  ;;  %5823 = vst [vmem:[#allocation5_spill] sm:$0xff] %v5059_v45  ;;  %v124_v58 = vld [vmem:[%s5784_s2 + $0x150] sm:$0xff]  ;;  %v5087_v0 = vpack.c.bf16 %v128_v56, %v125_v55  ;;  %v123_v27 = vld [vmem:[%s5784_s2 + $0x148] sm:$0xff]  ;;  %v5117_v28 = vld [vmem:[%s5786_s6] sm:$0xff]  ;;  %v5794_v55 = vlaneseq }
  0x20   :  { %5824 = vst [vmem:[#allocation6_spill] sm:$0xff] %v5078_v57  ;;  %v5100_v14 = vpack.c.bf16 %v127_v6, %v124_v58  ;;  %v120_v19 = vld [vmem:[%s5784_s2 + $0x130] sm:$0xff]  ;;  %v126_v31 = vld [vmem:[%s5784_s2 + $0x160] sm:$0xff]  ;;  %v129_v35 = vld [vmem:[%s5784_s2 + $0x178] sm:$0xff] }
  0x21   :  { %3642 = vmatpush1.bf16.msra.mxu0 %v4876_v7  ;;  %5825 = vst [vmem:[#allocation7_spill] sm:$0xff] %v5087_v0  ;;  %v5120_v30 = vpack.c.bf16 %v123_v27, %v120_v19  ;;  %v5132_v40 = vpack.c.bf16 %v129_v35, %v126_v31  ;;  %v2751_v46 = vld [vmem:[%s5785_s0 + $0x8] sm:$0xff]  ;;  %v133_v56 = vshrl.u32 %v5794_v55, 7  ;;  %v130_v6 = vld [vmem:[%s5787_s3] sm:$0x7] }
  0x22   :  { %3668 = vmatprep.subr.bf16.mxu0 %v4885_v12  ;;  %3663 = vmatpush3.bf16.msra.mxu1 %v4913_v25  ;;  %5826 = vst [vmem:[#allocation8_spill] sm:$0xff] %v5100_v14 }
  0x23   :  { %3664 = vmatprep.subr.bf16.mxu1 %v5795_v3  ;;  %5828 = vst [vmem:[#allocation10_spill] sm:$0xff] %v5120_v30  ;;  %5829 = vst [vmem:[#allocation11_spill] sm:$0xff] %v5132_v40  ;;  %v134_v58 = vsub.s32 0, %v133_v56  ;;  %v138_v27 = vsub.s32 1, %v133_v56 }
  0x24   :  { %231 = vmatmul.mubr.f32.vlgmr.msra.gmra.mrb[0].mxu0 %v165_v20 }
  0x25   :  { %3670 = vmatpush1.bf16.msra.mxu0 %v4907_v22  ;;  %371 = vmatprep.mubr.f32.mxu0 %v5792_v4 }
  0x26   :  { %3672 = vmatprep.subr.bf16.mxu0 %v4916_v26  ;;  %3666 = vmatpush3.bf16.msra.mxu1 %v4941_v38 }
  0x27   :  { %3699 = vmatprep.subr.bf16.mxu1 %v5795_v3 }
  0x29   :  { %3674 = vmatpush1.bf16.msra.mxu0 %v4935_v36  ;;  %3084 = vmatmul.mubr.f32.vlgmr.msra.gmra.mrb[0].mxu1 %v165_v20  ;;  %v5028_v20 = vpack.c.bf16 %v99_v13, %v96_v8  ;;  %v114_v8 = vld [vmem:[%s5784_s2 + $0x100] sm:$0xff]  ;;  %v117_v13 = vld [vmem:[%s5784_s2 + $0x118] sm:$0xff] }
  0x2a   :  { %3676 = vmatprep.subr.bf16.mxu0 %v4944_v39  ;;  %3701 = vmatpush3.bf16.msra.mxu1 %v4970_v51  ;;  %v5103_v17 = vpack.c.bf16 %v117_v13, %v114_v8  ;;  %v5215_v8 = vrot.slane %v130_v6, %v134_v58  ;;  %v142_v58 = vsub.s32 2, %v133_v56 }
  0x2b   :  { %3702 = vmatprep.subr.bf16.mxu1 %v5795_v3  ;;  %3118 = vmatprep.mubr.msk.f32.mxu1 %vm4626_vm0, %v5792_v4 }
  0x2c   :  { %5827 = vst [vmem:[#allocation9_spill] sm:$0xff] %v5103_v17  ;;  %5830 = vst [vmem:[#allocation12_spill] sm:$0xff] %v5215_v8 }
  0x2d   :  { %3678 = vmatpush1.bf16.msra.mxu0 %v4964_v48 }
  0x2e   :  { %3680 = vmatprep.subr.bf16.mxu0 %v4973_v54  ;;  %3704 = vmatpush3.bf16.msra.mxu1 %v4998_v1 }
  0x2f   :  { %3705 = vmatprep.subr.bf16.mxu1 %v5795_v3 }
  0x31   :  { %3682 = vmatpush1.bf16.msra.mxu0 %v4992_v63 }
  0x32   :  { %3684 = vmatprep.subr.bf16.mxu0 %v5001_v2  ;;  %3707 = vmatpush3.bf16.msra.mxu1 %v5028_v20 }
  0x33   :  { %3708 = vmatprep.subr.bf16.mxu1 %v5795_v3 }
  0x35   :  { %3686 = vmatpush1.bf16.msra.mxu0 %v5022_v18 }
  0x36   :  { %3688 = vmatprep.subr.bf16.mxu0 %v5031_v24  ;;  %3710 = vmatpush3.bf16.msra.mxu1 %v5056_v42 }
  0x37   :  { %3711 = vmatprep.subr.bf16.mxu1 %v5795_v3 }
  0x39   :  { %3690 = vmatpush1.bf16.msra.mxu0 %v5050_v37 }
  0x3a   :  { %3692 = vmatprep.subr.bf16.mxu0 %v5059_v45  ;;  %3713 = vmatpush3.bf16.msra.mxu1 %v5084_v60 }
  0x3b   :  { %3714 = vmatprep.subr.bf16.mxu1 %v5795_v3 }
  0x3d   :  { %3694 = vmatpush1.bf16.msra.mxu0 %v5078_v57 }
  0x3e   :  { %3696 = vmatprep.subr.bf16.mxu0 %v5087_v0  ;;  %3716 = vmatpush3.bf16.msra.mxu1 %v5103_v17 }
  0x3f   :  { %3717 = vmatprep.subr.bf16.mxu1 %v5795_v3 }
  0x41   :  { %3698 = vmatpush1.bf16.msra.mxu0 %v5100_v14 }
  0x42   :  { %3724 = vmatprep.subr.bf16.mxu0 %v4683_v5  ;;  %3719 = vmatpush3.bf16.msra.mxu1 %v5120_v30 }
  0x43   :  { %3720 = vmatprep.subr.bf16.mxu1 %v5795_v3 }
  0x44   :  { %372 = vmatmul.mubr.f32.vlgmr.msra.gmra.mrb[0].mxu0 %v5117_v28 }
  0x45   :  { %3726 = vmatpush1.bf16.msra.mxu0 %v4696_v9  ;;  %550 = vmatprep.mubr.f32.mxu0 %v5792_v4 }
  0x46   :  { %3728 = vmatprep.subr.bf16.mxu0 %v4698_v10  ;;  %3722 = vmatpush3.bf16.msra.mxu1 %v5132_v40 }
  0x47   :  { %3755 = vmatprep.subr.bf16.mxu1 %v5795_v3 }
  0x49   :  { %3730 = vmatpush1.bf16.msra.mxu0 %v4714_v15  ;;  %3119 = vmatmul.mubr.f32.vlgmr.msra.gmra.mrb[2].mxu1 %v5117_v28 }
  0x4a   :  { %3732 = vmatprep.subr.bf16.mxu0 %v4717_v16  ;;  %3757 = vmatpush3.bf16.msra.mxu1 %v4755_v29 }
  0x4b   :  { %3758 = vmatprep.subr.bf16.mxu1 %v5795_v3  ;;  %3153 = vmatprep.mubr.msk.f32.mxu1 %vm4626_vm0, %v5792_v4 }
  0x4d   :  { %3734 = vmatpush1.bf16.msra.mxu0 %v4732_v21 }
  0x4e   :  { %3736 = vmatprep.subr.bf16.mxu0 %v4738_v23  ;;  %3760 = vmatpush3.bf16.msra.mxu1 %v4767_v33 }
  0x4f   :  { %3761 = vmatprep.subr.bf16.mxu1 %v5795_v3 }
  0x51   :  { %3738 = vmatpush1.bf16.msra.mxu0 %v4764_v32 }
  0x52   :  { %3740 = vmatprep.subr.bf16.mxu0 %v4770_v34  ;;  %3763 = vmatpush3.bf16.msra.mxu1 %v4798_v43 }
  0x53   :  { %3764 = vmatprep.subr.bf16.mxu1 %v5795_v3 }
  0x55   :  { %3742 = vmatpush1.bf16.msra.mxu0 %v4792_v41 }
  0x56   :  { %3744 = vmatprep.subr.bf16.mxu0 %v4801_v44  ;;  %3766 = vmatpush3.bf16.msra.mxu1 %v4826_v52 }
  0x57   :  { %3767 = vmatprep.subr.bf16.mxu1 %v5795_v3 }
  0x59   :  { %3746 = vmatpush1.bf16.msra.mxu0 %v4820_v50 }
  0x5a   :  { %3748 = vmatprep.subr.bf16.mxu0 %v4829_v53  ;;  %3769 = vmatpush3.bf16.msra.mxu1 %v4854_v61 }
  0x5b   :  { %3770 = vmatprep.subr.bf16.mxu1 %v5795_v3 }
  0x5d   :  { %3750 = vmatpush1.bf16.msra.mxu0 %v4848_v59 }
  0x5e   :  { %3752 = vmatprep.subr.bf16.mxu0 %v4857_v62  ;;  %3772 = vmatpush3.bf16.msra.mxu1 %v4882_v11 }
  0x5f   :  { %3773 = vmatprep.subr.bf16.mxu1 %v5795_v3 }
  0x61   :  { %3754 = vmatpush1.bf16.msra.mxu0 %v4876_v7 }
  0x62   :  { %3780 = vmatprep.subr.bf16.mxu0 %v4885_v12  ;;  %3775 = vmatpush3.bf16.msra.mxu1 %v4913_v25 }
  0x63   :  { %3776 = vmatprep.subr.bf16.mxu1 %v5795_v3 }
  0x64   :  { %551 = vmatmul.mubr.f32.vlgmr.msra.gmra.mrb[2].mxu0 %v2751_v46 }
  0x65   :  { %3782 = vmatpush1.bf16.msra.mxu0 %v4907_v22  ;;  %691 = vmatprep.mubr.f32.mxu0 %v5792_v4 }
  0x66   :  { %3778 = vmatpush3.bf16.msra.mxu1 %v4941_v38  ;;  %3784 = vmatprep.subr.bf16.mxu0 %v4916_v26 }
  0x67   :  { %3811 = vmatprep.subr.bf16.mxu1 %v5795_v3 }
  0x69   :  { %3154 = vmatmul.mubr.f32.vlgmr.msra.gmra.mrb[4].mxu1 %v2751_v46  ;;  %3786 = vmatpush1.bf16.msra.mxu0 %v4935_v36  ;;  %v5218_v46 = vrot.slane %v130_v6, %v138_v27 }
  0x6a   :  { %3813 = vmatpush3.bf16.msra.mxu1 %v4970_v51  ;;  %3188 = vmatprep.mubr.msk.f32.mxu1 %vm4626_vm0, %v5792_v4 }
  0x6b   :  { %3814 = vmatprep.subr.bf16.mxu1 %v5795_v3  ;;  %3788 = vmatprep.subr.bf16.mxu0 %v4944_v39  ;;  %5831 = vst [vmem:[#allocation13_spill] sm:$0xff] %v5218_v46 }
  0x6d   :  { %3790 = vmatpush1.bf16.msra.mxu0 %v4964_v48 }
  0x6e   :  { %3816 = vmatpush3.bf16.msra.mxu1 %v4998_v1  ;;  %3792 = vmatprep.subr.bf16.mxu0 %v4973_v54 }
  0x6f   :  { %3817 = vmatprep.subr.bf16.mxu1 %v5795_v3 }
  0x71   :  { %3794 = vmatpush1.bf16.msra.mxu0 %v4992_v63 }
  0x72   :  { %3819 = vmatpush3.bf16.msra.mxu1 %v5028_v20  ;;  %3796 = vmatprep.subr.bf16.mxu0 %v5001_v2 }
  0x73   :  { %3820 = vmatprep.subr.bf16.mxu1 %v5795_v3 }
  0x75   :  { %3798 = vmatpush1.bf16.msra.mxu0 %v5022_v18 }
  0x76   :  { %3822 = vmatpush3.bf16.msra.mxu1 %v5056_v42  ;;  %3800 = vmatprep.subr.bf16.mxu0 %v5031_v24 }
  0x77   :  { %3823 = vmatprep.subr.bf16.mxu1 %v5795_v3 }
  0x79   :  { %3802 = vmatpush1.bf16.msra.mxu0 %v5050_v37 }
  0x7a   :  { %3825 = vmatpush3.bf16.msra.mxu1 %v5084_v60  ;;  %3804 = vmatprep.subr.bf16.mxu0 %v5059_v45 }
  0x7b   :  { %3826 = vmatprep.subr.bf16.mxu1 %v5795_v3 }
  0x7d   :  { %3806 = vmatpush1.bf16.msra.mxu0 %v5078_v57 }
  0x7e   :  { %3828 = vmatpush3.bf16.msra.mxu1 %v5103_v17  ;;  %3808 = vmatprep.subr.bf16.mxu0 %v5087_v0 }
  0x7f   :  { %3829 = vmatprep.subr.bf16.mxu1 %v5795_v3 }
  0x81   :  { %3810 = vmatpush1.bf16.msra.mxu0 %v5100_v14 }
  0x82   :  { %3831 = vmatpush3.bf16.msra.mxu1 %v5120_v30  ;;  %3836 = vmatprep.subr.bf16.mxu0 %v4683_v5 }
  0x83   :  { %3832 = vmatprep.subr.bf16.mxu1 %v5795_v3 }
  0x86   :  { %3834 = vmatpush3.bf16.msra.mxu1 %v5132_v40 }
  0x87   :  { %3867 = vmatprep.subr.bf16.mxu1 %v5795_v3 }
  0xfc   :  { %v303_v47 = vpop.f32.mrb[0].mxu1 }
  0xfd   :  { %v3085_v49 = vpop.f32.mrb[1].mxu1 }
 0x117   :  { %v373_v13 = vpop.f32.mrb[0].mxu0 }
 0x118   :  { %v4507_v19 = vadd.f32 %v373_v13, %v5215_v8  ;;  %v375_v31 = vpop.f32.mrb[1].mxu0  ;;  %v5224_v13 = vld [vmem:[%s5788_s4] ss:$0 sm:$0xff]  ;;  %v5226_v8 = vrot.slane %v130_v6, %v142_v58  ;;  %v5833_v58 = vmov 0.0  }
 0x119   :  { %v4508_v4 = vadd.f32 %v375_v31, %v5218_v46 }
 0x11a   :  { %v2748_v35 = vmul.f32 -1.442695, %v4507_v19  ;;  %v304_v31 = vadd.f32 %v303_v47, %v5226_v8 }
 0x11b   :  { %v2749_v3 = vmul.f32 -1.442695, %v4508_v4 }
 0x11c   :  { %4542 = vpow2.f32 %v2748_v35  ;;  %v444_v49 = vpop.f32.mrb[2].mxu1 }
 0x11d   :  { %v3120_v55 = vpop.f32.mrb[3].mxu1  ;;  %4544 = vpow2.f32 %v2749_v3  ;;  %v462_v19 = vadd.f32 %v5224_v13, %v444_v49  ;;  %v5235_v49 = vld [vmem:[%s5789_s5] ss:$0 sm:$0xff] }
 0x126   :  { %v4543_v5 = vpop.eup %4542 }
 0x127   :  { %v452_v40 = vadd.f32 1.0, %v4543_v5  ;;  %v4545_v27 = vpop.eup %4544 }
 0x128   :  { %v459_v4 = vadd.f32 1.0, %v4545_v27  ;;  %v2755_v27 = vld [vmem:[%s5785_s0 + $0x10] sm:$0xff] }
 0x129   :  { %4546 = vrcp.f32 %v452_v40 }
 0x133   :  { %v4547_v35 = vpop.eup %4546 }
 0x134   :  { %v463_v55 = vmul.f32 %v4547_v35, %v462_v19  ;;  %v5834_v35 = vld [vmem:[#allocation8_spill] sm:$0xff] }
 0x136   :  { %v464_v46 = vadd.f32 %v463_v55, %v304_v31  ;;  %v5835_v31 = vld [vmem:[#allocation11_spill] sm:$0xff] }
 0x137   :  { %v5836_v55 = vld [vmem:[#allocation3_spill] sm:$0xff] }
 0x138   :  { %4548 = vtanh.f32 %v464_v46 }
 0x139   :  { %4550 = vrcp.f32 %v459_v4 }
 0x142   :  { %v4549_v3 = vpop.eup %4548 }
 0x143   :  { %v466_v5 = vsub.f32 %v5117_v28, %v4549_v3  ;;  %v4551_v40 = vpop.eup %4550 }
 0x145   :  { %v467_v56 = vmul.f32 %v4551_v40, %v466_v5  ;;  %v5837_v5 = vld [vmem:[#allocation12_spill] sm:$0xff] }
 0x147   :  { %v468_v14 = vadd.f32 %v4549_v3, %v467_v56 }
 0x149   :  { %v472_v6 = vsub.f32 %v468_v14, %v5117_v28  ;;  %v5832_v14 = vmov 0.0|0.0  }
 0x14b   :  { %v5238_v47 = vadd.f32 %v472_v6, %v5117_v28  ;;  %v623_v28 = vpop.f32.mrb[4].mxu1 }
 0x14c   :  { %v3155_v19 = vpop.f32.mrb[5].mxu1 }
 0x14d   :  { %692 = vmatmul.mubr.f32.vlgmr.msra.gmra.mrb[2].mxu0 %v5238_v47  ;;  %3189 = vmatmul.mubr.f32.vlgmr.msra.gmra.mrb[6].mxu1 %v5238_v47  ;;  %v476_v46 = vmul.f32 %v5235_v49, %v5238_v47  ;;  %v5838_v19 = vld [vmem:[#allocation13_spill] sm:$0xff] }
 0x14e   :  { %3838 = vmatpush1.bf16.msra.mxu0 %v4696_v9  ;;  %3869 = vmatpush3.bf16.msra.mxu1 %v4755_v29 }
 0x14f   :  { %477 = vadd.xlane.f32.xlu0 %v476_v46  ;;  %3840 = vmatprep.subr.bf16.mxu0 %v4698_v10 }
 0x150   :  { %3870 = vmatprep.subr.bf16.mxu1 %v5832_v14  ;;  %871 = vmatprep.mubr.f32.mxu0 %v5833_v58 }
 0x151   :  { %3223 = vmatprep.mubr.msk.f32.mxu1 %vm4626_vm0, %v5833_v58 }
 0x152   :  { %3842 = vmatpush1.bf16.msra.mxu0 %v4714_v15  ;;  %3872 = vmatpush3.bf16.msra.mxu1 %v4767_v33 }
 0x153   :  { %3844 = vmatprep.subr.bf16.mxu0 %v4717_v16  ;;  %3873 = vmatprep.subr.bf16.mxu1 %v5832_v14 }
 0x156   :  { %3846 = vmatpush1.bf16.msra.mxu0 %v4732_v21  ;;  %3875 = vmatpush3.bf16.msra.mxu1 %v4798_v43 }
 0x157   :  { %3848 = vmatprep.subr.bf16.mxu0 %v4738_v23  ;;  %3876 = vmatprep.subr.bf16.mxu1 %v5832_v14 }
 0x15a   :  { %3850 = vmatpush1.bf16.msra.mxu0 %v4764_v32  ;;  %3878 = vmatpush3.bf16.msra.mxu1 %v4826_v52 }
 0x15b   :  { %3852 = vmatprep.subr.bf16.mxu0 %v4770_v34  ;;  %3879 = vmatprep.subr.bf16.mxu1 %v5832_v14 }
 0x15e   :  { %3854 = vmatpush1.bf16.msra.mxu0 %v4792_v41  ;;  %3881 = vmatpush3.bf16.msra.mxu1 %v4854_v61 }
 0x15f   :  { %3856 = vmatprep.subr.bf16.mxu0 %v4801_v44  ;;  %3882 = vmatprep.subr.bf16.mxu1 %v5832_v14 }
 0x162   :  { %3858 = vmatpush1.bf16.msra.mxu0 %v4820_v50  ;;  %3884 = vmatpush3.bf16.msra.mxu1 %v4882_v11 }
 0x163   :  { %3860 = vmatprep.subr.bf16.mxu0 %v4829_v53  ;;  %3885 = vmatprep.subr.bf16.mxu1 %v5832_v14 }
 0x166   :  { %3862 = vmatpush1.bf16.msra.mxu0 %v4848_v59  ;;  %3887 = vmatpush3.bf16.msra.mxu1 %v4913_v25 }
 0x167   :  { %3864 = vmatprep.subr.bf16.mxu0 %v4857_v62  ;;  %3888 = vmatprep.subr.bf16.mxu1 %v5832_v14 }
 0x16a   :  { %3866 = vmatpush1.bf16.msra.mxu0 %v4876_v7  ;;  %3890 = vmatpush3.bf16.msra.mxu1 %v4941_v38 }
 0x16b   :  { %3892 = vmatprep.subr.bf16.mxu0 %v4885_v12  ;;  %3923 = vmatprep.subr.bf16.mxu1 %v5832_v14 }
 0x16d   :  { %872 = vmatmul.mubr.f32.vlgmr.msra.gmra.mrb[4].mxu0 %v2755_v27  ;;  %3224 = vmatmul.mubr.f32.vlgmr.msra.gmra.mrb[8].mxu1 %v2755_v27 }
 0x16e   :  { %3894 = vmatpush1.bf16.msra.mxu0 %v4907_v22  ;;  %3925 = vmatpush3.bf16.msra.mxu1 %v4970_v51 }
 0x16f   :  { %3896 = vmatprep.subr.bf16.mxu0 %v4916_v26  ;;  %3926 = vmatprep.subr.bf16.mxu1 %v5832_v14 }
 0x170   :  { %1012 = vmatprep.mubr.f32.mxu0 %v5833_v58  ;;  %3258 = vmatprep.mubr.msk.f32.mxu1 %vm4626_vm0, %v5833_v58 }
 0x172   :  { %3898 = vmatpush1.bf16.msra.mxu0 %v4935_v36  ;;  %3928 = vmatpush3.bf16.msra.mxu1 %v4998_v1 }
 0x173   :  { %3900 = vmatprep.subr.bf16.mxu0 %v4944_v39  ;;  %3929 = vmatprep.subr.bf16.mxu1 %v5832_v14 }
 0x176   :  { %3902 = vmatpush1.bf16.msra.mxu0 %v4964_v48  ;;  %3931 = vmatpush3.bf16.msra.mxu1 %v5028_v20 }
 0x177   :  { %3904 = vmatprep.subr.bf16.mxu0 %v4973_v54  ;;  %3932 = vmatprep.subr.bf16.mxu1 %v5832_v14 }
 0x17a   :  { %3906 = vmatpush1.bf16.msra.mxu0 %v4992_v63  ;;  %3934 = vmatpush3.bf16.msra.mxu1 %v5056_v42 }
 0x17b   :  { %3908 = vmatprep.subr.bf16.mxu0 %v5001_v2  ;;  %3935 = vmatprep.subr.bf16.mxu1 %v5832_v14 }
 0x17e   :  { %3910 = vmatpush1.bf16.msra.mxu0 %v5022_v18  ;;  %3937 = vmatpush3.bf16.msra.mxu1 %v5084_v60 }
 0x17f   :  { %3912 = vmatprep.subr.bf16.mxu0 %v5031_v24  ;;  %3938 = vmatprep.subr.bf16.mxu1 %v5832_v14 }
 0x182   :  { %3914 = vmatpush1.bf16.msra.mxu0 %v5050_v37  ;;  %3940 = vmatpush3.bf16.msra.mxu1 %v5103_v17 }
 0x183   :  { %3916 = vmatprep.subr.bf16.mxu0 %v5059_v45  ;;  %3941 = vmatprep.subr.bf16.mxu1 %v5832_v14  ;;  %v624_v45 = vadd.f32 %v623_v28, %v5226_v8  ;;  %v5840_v28 = vld [vmem:[#allocation9_spill] sm:$0xff] }
 0x186   :  { %3918 = vmatpush1.bf16.msra.mxu0 %v5078_v57  ;;  %3943 = vmatpush3.bf16.msra.mxu1 %v5120_v30 }
 0x187   :  { %3920 = vmatprep.subr.bf16.mxu0 %v5087_v0  ;;  %3944 = vmatprep.subr.bf16.mxu1 %v5832_v14 }
 0x18a   :  { %3922 = vmatpush1.bf16.msra.mxu0 %v5834_v35  ;;  %3946 = vmatpush3.bf16.msra.mxu1 %v5835_v31 }
 0x18b   :  { %3948 = vmatprep.subr.bf16.mxu0 %v5836_v55  ;;  %3979 = vmatprep.subr.bf16.mxu1 %v5832_v14 }
 0x220   :  { %v693_v4 = vpop.f32.mrb[2].mxu0  ;;  %v764_v3 = vpop.f32.mrb[6].mxu1 }
 0x221   :  { %v4509_v40 = vadd.f32 %v693_v4, %v5837_v5  ;;  %v695_v56 = vpop.f32.mrb[3].mxu0  ;;  %v3190_v6 = vpop.f32.mrb[7].mxu1  ;;  %v782_v55 = vadd.f32 %v5224_v13, %v764_v3  ;;  %v5844_v3 = vld [vmem:[#allocation7_spill] sm:$0xff] }
 0x222   :  { %v4510_v27 = vadd.f32 %v695_v56, %v5838_v19 }
 0x223   :  { %v2752_v46 = vmul.f32 -1.442695, %v4509_v40 }
 0x224   :  { %v2753_v0 = vmul.f32 -1.442695, %v4510_v27 }
 0x225   :  { %4552 = vpow2.f32 %v2752_v46 }
 0x226   :  { %4554 = vpow2.f32 %v2753_v0 }
 0x22f   :  { %v4553_v30 = vpop.eup %4552 }
 0x230   :  { %v772_v57 = vadd.f32 1.0, %v4553_v30  ;;  %v4555_v31 = vpop.eup %4554  ;;  %v2759_v30 = vld [vmem:[%s5785_s0 + $0x18] sm:$0xff] }
 0x231   :  { %v779_v4 = vadd.f32 1.0, %v4555_v31  ;;  %v5842_v31 = vld [vmem:[#allocation6_spill] sm:$0xff] }
 0x232   :  { %4556 = vrcp.f32 %v772_v57 }
 0x23c   :  { %v4557_v35 = vpop.eup %4556 }
 0x23d   :  { %v783_v17 = vmul.f32 %v4557_v35, %v782_v55  ;;  %v5841_v35 = vld [vmem:[#allocation5_spill] sm:$0xff]  ;;  %v5843_v55 = vld [vmem:[#allocation10_spill] sm:$0xff] }
 0x23f   :  { %v784_v37 = vadd.f32 %v783_v17, %v624_v45 }
 0x241   :  { %4558 = vtanh.f32 %v784_v37  ;;  %v944_v37 = vpop.f32.mrb[8].mxu1 }
 0x242   :  { %4560 = vrcp.f32 %v779_v4  ;;  %v3225_v17 = vpop.f32.mrb[9].mxu1  ;;  %v5845_v4 = vld [vmem:[#allocation8_spill] sm:$0xff] }
 0x24b   :  { %v4559_v40 = vpop.eup %4558 }
 0x24c   :  { %v786_v6 = vsub.f32 %v5238_v47, %v4559_v40  ;;  %v4561_v56 = vpop.eup %4560 }
 0x24e   :  { %v787_v46 = vmul.f32 %v4561_v56, %v786_v6  ;;  %v5847_v6 = vld [vmem:[#allocation3_spill] sm:$0xff] }
 0x250   :  { %v788_v27 = vadd.f32 %v4559_v40, %v787_v46  ;;  %v5846_v40 = vld [vmem:[#allocation11_spill] sm:$0xff] }
 0x252   :  { %v793_v0 = vsub.f32 %v788_v27, %v5238_v47 }
 0x254   :  { %v5324_v57 = vadd.f32 %v793_v0, %v5238_v47  ;;  %v5839_v47 = vld [vmem:[#allocation4_spill] sm:$0xff] }
 0x256   :  { %1013 = vmatmul.mubr.f32.vlgmr.msra.gmra.mrb[4].mxu0 %v5324_v57  ;;  %3259 = vmatmul.mubr.f32.vlgmr.msra.gmra.mrb[10].mxu1 %v5324_v57  ;;  %v797_v45 = vmul.f32 %v5235_v49, %v5324_v57 }
 0x257   :  { %3950 = vmatpush1.bf16.msra.mxu0 %v4696_v9  ;;  %3981 = vmatpush3.bf16.msra.mxu1 %v4755_v29 }
 0x258   :  { %798 = vadd.xlane.f32.xlu0 %v797_v45  ;;  %3952 = vmatprep.subr.bf16.mxu0 %v4698_v10 }
 0x259   :  { %3982 = vmatprep.subr.bf16.mxu1 %v5832_v14  ;;  %1192 = vmatprep.mubr.f32.mxu0 %v5833_v58 }
 0x25a   :  { %3293 = vmatprep.mubr.msk.f32.mxu1 %vm4626_vm0, %v5833_v58 }
 0x25b   :  { %3954 = vmatpush1.bf16.msra.mxu0 %v4714_v15  ;;  %3984 = vmatpush3.bf16.msra.mxu1 %v4767_v33 }
 0x25c   :  { %3956 = vmatprep.subr.bf16.mxu0 %v4717_v16  ;;  %3985 = vmatprep.subr.bf16.mxu1 %v5832_v14 }
 0x25f   :  { %3958 = vmatpush1.bf16.msra.mxu0 %v4732_v21  ;;  %3987 = vmatpush3.bf16.msra.mxu1 %v4798_v43 }
 0x260   :  { %3960 = vmatprep.subr.bf16.mxu0 %v4738_v23  ;;  %3988 = vmatprep.subr.bf16.mxu1 %v5832_v14 }
 0x263   :  { %3962 = vmatpush1.bf16.msra.mxu0 %v4764_v32  ;;  %3990 = vmatpush3.bf16.msra.mxu1 %v4826_v52 }
 0x264   :  { %3964 = vmatprep.subr.bf16.mxu0 %v4770_v34  ;;  %3991 = vmatprep.subr.bf16.mxu1 %v5832_v14 }
 0x267   :  { %3966 = vmatpush1.bf16.msra.mxu0 %v4792_v41  ;;  %3993 = vmatpush3.bf16.msra.mxu1 %v4854_v61 }
 0x268   :  { %3968 = vmatprep.subr.bf16.mxu0 %v4801_v44  ;;  %3994 = vmatprep.subr.bf16.mxu1 %v5832_v14 }
 0x26b   :  { %3970 = vmatpush1.bf16.msra.mxu0 %v4820_v50  ;;  %3996 = vmatpush3.bf16.msra.mxu1 %v4882_v11 }
 0x26c   :  { %3972 = vmatprep.subr.bf16.mxu0 %v4829_v53  ;;  %3997 = vmatprep.subr.bf16.mxu1 %v5832_v14 }
 0x26f   :  { %3974 = vmatpush1.bf16.msra.mxu0 %v4848_v59  ;;  %3999 = vmatpush3.bf16.msra.mxu1 %v4913_v25 }
 0x270   :  { %3976 = vmatprep.subr.bf16.mxu0 %v4857_v62  ;;  %4000 = vmatprep.subr.bf16.mxu1 %v5832_v14 }
 0x273   :  { %3978 = vmatpush1.bf16.msra.mxu0 %v4876_v7  ;;  %4002 = vmatpush3.bf16.msra.mxu1 %v4941_v38 }
 0x274   :  { %4004 = vmatprep.subr.bf16.mxu0 %v4885_v12  ;;  %4035 = vmatprep.subr.bf16.mxu1 %v5832_v14 }
 0x276   :  { %1193 = vmatmul.mubr.f32.vlgmr.msra.gmra.mrb[6].mxu0 %v2759_v30  ;;  %3294 = vmatmul.mubr.f32.vlgmr.msra.gmra.mrb[12].mxu1 %v2759_v30 }
 0x277   :  { %4006 = vmatpush1.bf16.msra.mxu0 %v4907_v22  ;;  %4037 = vmatpush3.bf16.msra.mxu1 %v4970_v51 }
 0x278   :  { %4008 = vmatprep.subr.bf16.mxu0 %v4916_v26  ;;  %4038 = vmatprep.subr.bf16.mxu1 %v5832_v14 }
 0x279   :  { %1333 = vmatprep.mubr.f32.mxu0 %v5833_v58  ;;  %3328 = vmatprep.mubr.msk.f32.mxu1 %vm4626_vm0, %v5833_v58 }
 0x27b   :  { %4010 = vmatpush1.bf16.msra.mxu0 %v4935_v36  ;;  %4040 = vmatpush3.bf16.msra.mxu1 %v4998_v1 }
 0x27c   :  { %4012 = vmatprep.subr.bf16.mxu0 %v4944_v39  ;;  %4041 = vmatprep.subr.bf16.mxu1 %v5832_v14 }
 0x27f   :  { %4014 = vmatpush1.bf16.msra.mxu0 %v4964_v48  ;;  %4043 = vmatpush3.bf16.msra.mxu1 %v5028_v20 }
 0x280   :  { %4016 = vmatprep.subr.bf16.mxu0 %v4973_v54  ;;  %4044 = vmatprep.subr.bf16.mxu1 %v5832_v14 }
 0x283   :  { %4018 = vmatpush1.bf16.msra.mxu0 %v4992_v63  ;;  %4046 = vmatpush3.bf16.msra.mxu1 %v5056_v42 }
 0x284   :  { %4020 = vmatprep.subr.bf16.mxu0 %v5001_v2  ;;  %4047 = vmatprep.subr.bf16.mxu1 %v5832_v14 }
 0x287   :  { %4022 = vmatpush1.bf16.msra.mxu0 %v5022_v18  ;;  %4049 = vmatpush3.bf16.msra.mxu1 %v5084_v60 }
 0x288   :  { %4024 = vmatprep.subr.bf16.mxu0 %v5031_v24  ;;  %4050 = vmatprep.subr.bf16.mxu1 %v5832_v14 }
 0x28b   :  { %4026 = vmatpush1.bf16.msra.mxu0 %v5839_v47  ;;  %4052 = vmatpush3.bf16.msra.mxu1 %v5840_v28 }
 0x28c   :  { %4028 = vmatprep.subr.bf16.mxu0 %v5841_v35  ;;  %4053 = vmatprep.subr.bf16.mxu1 %v5832_v14  ;;  %v945_v35 = vadd.f32 %v944_v37, %v5226_v8 }
 0x28f   :  { %4030 = vmatpush1.bf16.msra.mxu0 %v5842_v31  ;;  %4055 = vmatpush3.bf16.msra.mxu1 %v5843_v55 }
 0x290   :  { %4032 = vmatprep.subr.bf16.mxu0 %v5844_v3  ;;  %4056 = vmatprep.subr.bf16.mxu1 %v5832_v14 }
 0x293   :  { %4034 = vmatpush1.bf16.msra.mxu0 %v5845_v4  ;;  %4058 = vmatpush3.bf16.msra.mxu1 %v5846_v40 }
 0x294   :  { %4060 = vmatprep.subr.bf16.mxu0 %v5847_v6  ;;  %4091 = vmatprep.subr.bf16.mxu1 %v5832_v14 }
 0x329   :  { %v1014_v56 = vpop.f32.mrb[4].mxu0  ;;  %v1085_v46 = vpop.f32.mrb[10].mxu1 }
 0x32a   :  { %v4511_v27 = vadd.f32 %v1014_v56, %v5837_v5  ;;  %v1016_v0 = vpop.f32.mrb[5].mxu0  ;;  %v3260_v45 = vpop.f32.mrb[11].mxu1  ;;  %v1103_v6 = vadd.f32 %v5224_v13, %v1085_v46  ;;  %v5853_v46 = vld [vmem:[#allocation7_spill] sm:$0xff] }
 0x32b   :  { %v4512_v30 = vadd.f32 %v1016_v0, %v5838_v19 }
 0x32c   :  { %v2756_v17 = vmul.f32 -1.442695, %v4511_v27 }
 0x32d   :  { %v2757_v3 = vmul.f32 -1.442695, %v4512_v30 }
 0x32e   :  { %4562 = vpow2.f32 %v2756_v17 }
 0x32f   :  { %4564 = vpow2.f32 %v2757_v3  ;;  %v5849_v3 = vld [vmem:[#allocation9_spill] sm:$0xff] }
 0x338   :  { %v4563_v55 = vpop.eup %4562 }
 0x339   :  { %v1093_v31 = vadd.f32 1.0, %v4563_v55  ;;  %v4565_v40 = vpop.eup %4564 }
 0x33a   :  { %v1100_v56 = vadd.f32 1.0, %v4565_v40  ;;  %v5851_v40 = vld [vmem:[#allocation6_spill] sm:$0xff] }
 0x33b   :  { %4566 = vrcp.f32 %v1093_v31 }
 0x345   :  { %v4567_v4 = vpop.eup %4566 }
 0x346   :  { %v1104_v28 = vmul.f32 %v4567_v4, %v1103_v6  ;;  %v5850_v4 = vld [vmem:[#allocation5_spill] sm:$0xff]  ;;  %v5852_v6 = vld [vmem:[#allocation10_spill] sm:$0xff] }
 0x348   :  { %v1105_v47 = vadd.f32 %v1104_v28, %v945_v35  ;;  %v2763_v28 = vld [vmem:[%s5785_s0 + $0x20] sm:$0xff]  ;;  %v5848_v35 = vld [vmem:[#allocation4_spill] sm:$0xff] }
 0x34a   :  { %4568 = vtanh.f32 %v1105_v47 }
 0x34b   :  { %4570 = vrcp.f32 %v1100_v56  ;;  %v5854_v56 = vld [vmem:[#allocation8_spill] sm:$0xff] }
 0x354   :  { %v4569_v27 = vpop.eup %4568 }
 0x355   :  { %v1107_v45 = vsub.f32 %v5324_v57, %v4569_v27  ;;  %v4571_v0 = vpop.eup %4570 }
 0x357   :  { %v1108_v17 = vmul.f32 %v4571_v0, %v1107_v45  ;;  %v5856_v45 = vld [vmem:[#allocation3_spill] sm:$0xff] }
 0x359   :  { %v1109_v30 = vadd.f32 %v4569_v27, %v1108_v17  ;;  %v5855_v27 = vld [vmem:[#allocation11_spill] sm:$0xff] }
 0x35b   :  { %v1114_v55 = vsub.f32 %v1109_v30, %v5324_v57 }
 0x35d   :  { %v5410_v31 = vadd.f32 %v1114_v55, %v5324_v57  ;;  %v1265_v57 = vpop.f32.mrb[12].mxu1 }
 0x35e   :  { %v3295_v47 = vpop.f32.mrb[13].mxu1 }
 0x35f   :  { %1334 = vmatmul.mubr.f32.vlgmr.msra.gmra.mrb[6].mxu0 %v5410_v31  ;;  %3329 = vmatmul.mubr.f32.vlgmr.msra.gmra.mrb[14].mxu1 %v5410_v31  ;;  %v1118_v37 = vmul.f32 %v5235_v49, %v5410_v31 }
 0x360   :  { %4062 = vmatpush1.bf16.msra.mxu0 %v4696_v9  ;;  %4093 = vmatpush3.bf16.msra.mxu1 %v4755_v29 }
 0x361   :  { %1119 = vadd.xlane.f32.xlu1 %v1118_v37  ;;  %4064 = vmatprep.subr.bf16.mxu0 %v4698_v10 }
 0x362   :  { %4094 = vmatprep.subr.bf16.mxu1 %v5832_v14  ;;  %1513 = vmatprep.mubr.f32.mxu0 %v5833_v58 }
 0x363   :  { %3363 = vmatprep.mubr.msk.f32.mxu1 %vm4626_vm0, %v5833_v58 }
 0x364   :  { %4066 = vmatpush1.bf16.msra.mxu0 %v4714_v15  ;;  %4096 = vmatpush3.bf16.msra.mxu1 %v4767_v33 }
 0x365   :  { %4068 = vmatprep.subr.bf16.mxu0 %v4717_v16  ;;  %4097 = vmatprep.subr.bf16.mxu1 %v5832_v14 }
 0x368   :  { %4070 = vmatpush1.bf16.msra.mxu0 %v4732_v21  ;;  %4099 = vmatpush3.bf16.msra.mxu1 %v4798_v43 }
 0x369   :  { %4072 = vmatprep.subr.bf16.mxu0 %v4738_v23  ;;  %4100 = vmatprep.subr.bf16.mxu1 %v5832_v14 }
 0x36c   :  { %4074 = vmatpush1.bf16.msra.mxu0 %v4764_v32  ;;  %4102 = vmatpush3.bf16.msra.mxu1 %v4826_v52 }
 0x36d   :  { %4076 = vmatprep.subr.bf16.mxu0 %v4770_v34  ;;  %4103 = vmatprep.subr.bf16.mxu1 %v5832_v14 }
 0x370   :  { %4078 = vmatpush1.bf16.msra.mxu0 %v4792_v41  ;;  %4105 = vmatpush3.bf16.msra.mxu1 %v4854_v61 }
 0x371   :  { %4080 = vmatprep.subr.bf16.mxu0 %v4801_v44  ;;  %4106 = vmatprep.subr.bf16.mxu1 %v5832_v14 }
 0x374   :  { %4082 = vmatpush1.bf16.msra.mxu0 %v4820_v50  ;;  %4108 = vmatpush3.bf16.msra.mxu1 %v4882_v11 }
 0x375   :  { %4084 = vmatprep.subr.bf16.mxu0 %v4829_v53  ;;  %4109 = vmatprep.subr.bf16.mxu1 %v5832_v14 }
 0x378   :  { %4086 = vmatpush1.bf16.msra.mxu0 %v4848_v59  ;;  %4111 = vmatpush3.bf16.msra.mxu1 %v4913_v25 }
 0x379   :  { %4088 = vmatprep.subr.bf16.mxu0 %v4857_v62  ;;  %4112 = vmatprep.subr.bf16.mxu1 %v5832_v14 }
 0x37c   :  { %4090 = vmatpush1.bf16.msra.mxu0 %v4876_v7  ;;  %4114 = vmatpush3.bf16.msra.mxu1 %v4941_v38 }
 0x37d   :  { %4116 = vmatprep.subr.bf16.mxu0 %v4885_v12  ;;  %4147 = vmatprep.subr.bf16.mxu1 %v5832_v14 }
 0x37f   :  { %1514 = vmatmul.mubr.f32.vlgmr.msra.gmra.mrb[8].mxu0 %v2763_v28  ;;  %3364 = vmatmul.mubr.f32.vlgmr.msra.gmra.mrb[16].mxu1 %v2763_v28 }
 0x380   :  { %4118 = vmatpush1.bf16.msra.mxu0 %v4907_v22  ;;  %4149 = vmatpush3.bf16.msra.mxu1 %v4970_v51 }
 0x381   :  { %4120 = vmatprep.subr.bf16.mxu0 %v4916_v26  ;;  %4150 = vmatprep.subr.bf16.mxu1 %v5832_v14 }
 0x382   :  { %1654 = vmatprep.mubr.f32.mxu0 %v5833_v58  ;;  %3398 = vmatprep.mubr.msk.f32.mxu1 %vm4626_vm0, %v5833_v58 }
 0x384   :  { %4122 = vmatpush1.bf16.msra.mxu0 %v4935_v36  ;;  %4152 = vmatpush3.bf16.msra.mxu1 %v4998_v1 }
 0x385   :  { %4124 = vmatprep.subr.bf16.mxu0 %v4944_v39  ;;  %4153 = vmatprep.subr.bf16.mxu1 %v5832_v14 }
 0x388   :  { %4126 = vmatpush1.bf16.msra.mxu0 %v4964_v48  ;;  %4155 = vmatpush3.bf16.msra.mxu1 %v5028_v20 }
 0x389   :  { %4128 = vmatprep.subr.bf16.mxu0 %v4973_v54  ;;  %4156 = vmatprep.subr.bf16.mxu1 %v5832_v14 }
 0x38c   :  { %4130 = vmatpush1.bf16.msra.mxu0 %v4992_v63  ;;  %4158 = vmatpush3.bf16.msra.mxu1 %v5056_v42 }
 0x38d   :  { %4132 = vmatprep.subr.bf16.mxu0 %v5001_v2  ;;  %4159 = vmatprep.subr.bf16.mxu1 %v5832_v14 }
 0x390   :  { %4134 = vmatpush1.bf16.msra.mxu0 %v5022_v18  ;;  %4161 = vmatpush3.bf16.msra.mxu1 %v5084_v60 }
 0x391   :  { %4136 = vmatprep.subr.bf16.mxu0 %v5031_v24  ;;  %4162 = vmatprep.subr.bf16.mxu1 %v5832_v14 }
 0x394   :  { %4138 = vmatpush1.bf16.msra.mxu0 %v5848_v35  ;;  %4164 = vmatpush3.bf16.msra.mxu1 %v5849_v3 }
 0x395   :  { %4140 = vmatprep.subr.bf16.mxu0 %v5850_v4  ;;  %4165 = vmatprep.subr.bf16.mxu1 %v5832_v14  ;;  %v1266_v4 = vadd.f32 %v1265_v57, %v5226_v8 }
 0x398   :  { %4142 = vmatpush1.bf16.msra.mxu0 %v5851_v40  ;;  %4167 = vmatpush3.bf16.msra.mxu1 %v5852_v6 }
 0x399   :  { %4144 = vmatprep.subr.bf16.mxu0 %v5853_v46  ;;  %4168 = vmatprep.subr.bf16.mxu1 %v5832_v14 }
 0x39c   :  { %4146 = vmatpush1.bf16.msra.mxu0 %v5854_v56  ;;  %4170 = vmatpush3.bf16.msra.mxu1 %v5855_v27 }
 0x39d   :  { %4172 = vmatprep.subr.bf16.mxu0 %v5856_v45  ;;  %4203 = vmatprep.subr.bf16.mxu1 %v5832_v14 }
 0x432   :  { %v1335_v0 = vpop.f32.mrb[6].mxu0  ;;  %v1406_v17 = vpop.f32.mrb[14].mxu1 }
 0x433   :  { %v4513_v30 = vadd.f32 %v1335_v0, %v5837_v5  ;;  %v1337_v55 = vpop.f32.mrb[7].mxu0  ;;  %v3330_v37 = vpop.f32.mrb[15].mxu1  ;;  %v1424_v45 = vadd.f32 %v5224_v13, %v1406_v17  ;;  %v5862_v17 = vld [vmem:[#allocation7_spill] sm:$0xff] }
 0x434   :  { %v4514_v28 = vadd.f32 %v1337_v55, %v5838_v19 }
 0x435   :  { %v2760_v47 = vmul.f32 -1.442695, %v4513_v30 }
 0x436   :  { %v2761_v46 = vmul.f32 -1.442695, %v4514_v28 }
 0x437   :  { %4572 = vpow2.f32 %v2760_v47 }
 0x438   :  { %4574 = vpow2.f32 %v2761_v46  ;;  %v5858_v46 = vld [vmem:[#allocation9_spill] sm:$0xff] }
 0x441   :  { %v4573_v6 = vpop.eup %4572 }
 0x442   :  { %v1414_v40 = vadd.f32 1.0, %v4573_v6  ;;  %v4575_v27 = vpop.eup %4574 }
 0x443   :  { %v1421_v0 = vadd.f32 1.0, %v4575_v27  ;;  %v5860_v27 = vld [vmem:[#allocation6_spill] sm:$0xff] }
 0x444   :  { %4576 = vrcp.f32 %v1414_v40 }
 0x44e   :  { %v4577_v56 = vpop.eup %4576 }
 0x44f   :  { %v1425_v3 = vmul.f32 %v4577_v56, %v1424_v45  ;;  %v5859_v56 = vld [vmem:[#allocation5_spill] sm:$0xff]  ;;  %v5861_v45 = vld [vmem:[#allocation10_spill] sm:$0xff] }
 0x451   :  { %v1426_v35 = vadd.f32 %v1425_v3, %v1266_v4  ;;  %v2767_v3 = vld [vmem:[%s5785_s0 + $0x28] sm:$0xff] }
 0x452   :  { %v5857_v4 = vld [vmem:[#allocation4_spill] sm:$0xff] }
 0x453   :  { %4578 = vtanh.f32 %v1426_v35 }
 0x454   :  { %4580 = vrcp.f32 %v1421_v0  ;;  %v5863_v0 = vld [vmem:[#allocation8_spill] sm:$0xff] }
 0x45d   :  { %v4579_v30 = vpop.eup %4578 }
 0x45e   :  { %v1428_v37 = vsub.f32 %v5410_v31, %v4579_v30  ;;  %v4581_v55 = vpop.eup %4580 }
 0x460   :  { %v1429_v47 = vmul.f32 %v4581_v55, %v1428_v37  ;;  %v5865_v37 = vld [vmem:[#allocation3_spill] sm:$0xff] }
 0x462   :  { %v1430_v28 = vadd.f32 %v4579_v30, %v1429_v47  ;;  %v5864_v30 = vld [vmem:[#allocation11_spill] sm:$0xff] }
 0x464   :  { %v1435_v6 = vsub.f32 %v1430_v28, %v5410_v31 }
 0x466   :  { %v5496_v40 = vadd.f32 %v1435_v6, %v5410_v31  ;;  %v1586_v31 = vpop.f32.mrb[16].mxu1 }
 0x467   :  { %v3365_v35 = vpop.f32.mrb[17].mxu1 }
 0x468   :  { %1655 = vmatmul.mubr.f32.vlgmr.msra.gmra.mrb[8].mxu0 %v5496_v40  ;;  %3399 = vmatmul.mubr.f32.vlgmr.msra.gmra.mrb[18].mxu1 %v5496_v40  ;;  %v1439_v57 = vmul.f32 %v5235_v49, %v5496_v40 }
 0x469   :  { %4174 = vmatpush1.bf16.msra.mxu0 %v4696_v9  ;;  %4205 = vmatpush3.bf16.msra.mxu1 %v4755_v29 }
 0x46a   :  { %1440 = vadd.xlane.f32.xlu1 %v1439_v57  ;;  %4176 = vmatprep.subr.bf16.mxu0 %v4698_v10 }
 0x46b   :  { %4206 = vmatprep.subr.bf16.mxu1 %v5832_v14  ;;  %1834 = vmatprep.mubr.f32.mxu0 %v5833_v58 }
 0x46c   :  { %3433 = vmatprep.mubr.msk.f32.mxu1 %vm4626_vm0, %v5833_v58 }
 0x46d   :  { %4178 = vmatpush1.bf16.msra.mxu0 %v4714_v15  ;;  %4208 = vmatpush3.bf16.msra.mxu1 %v4767_v33 }
 0x46e   :  { %4180 = vmatprep.subr.bf16.mxu0 %v4717_v16  ;;  %4209 = vmatprep.subr.bf16.mxu1 %v5832_v14 }
 0x471   :  { %4182 = vmatpush1.bf16.msra.mxu0 %v4732_v21  ;;  %4211 = vmatpush3.bf16.msra.mxu1 %v4798_v43 }
 0x472   :  { %4184 = vmatprep.subr.bf16.mxu0 %v4738_v23  ;;  %4212 = vmatprep.subr.bf16.mxu1 %v5832_v14 }
 0x475   :  { %4186 = vmatpush1.bf16.msra.mxu0 %v4764_v32  ;;  %4214 = vmatpush3.bf16.msra.mxu1 %v4826_v52 }
 0x476   :  { %4188 = vmatprep.subr.bf16.mxu0 %v4770_v34  ;;  %4215 = vmatprep.subr.bf16.mxu1 %v5832_v14 }
 0x479   :  { %4190 = vmatpush1.bf16.msra.mxu0 %v4792_v41  ;;  %4217 = vmatpush3.bf16.msra.mxu1 %v4854_v61 }
 0x47a   :  { %4192 = vmatprep.subr.bf16.mxu0 %v4801_v44  ;;  %4218 = vmatprep.subr.bf16.mxu1 %v5832_v14 }
 0x47d   :  { %4194 = vmatpush1.bf16.msra.mxu0 %v4820_v50  ;;  %4220 = vmatpush3.bf16.msra.mxu1 %v4882_v11 }
 0x47e   :  { %4196 = vmatprep.subr.bf16.mxu0 %v4829_v53  ;;  %4221 = vmatprep.subr.bf16.mxu1 %v5832_v14 }
 0x481   :  { %4198 = vmatpush1.bf16.msra.mxu0 %v4848_v59  ;;  %4223 = vmatpush3.bf16.msra.mxu1 %v4913_v25 }
 0x482   :  { %4200 = vmatprep.subr.bf16.mxu0 %v4857_v62  ;;  %4224 = vmatprep.subr.bf16.mxu1 %v5832_v14 }
 0x485   :  { %4202 = vmatpush1.bf16.msra.mxu0 %v4876_v7  ;;  %4226 = vmatpush3.bf16.msra.mxu1 %v4941_v38 }
 0x486   :  { %4228 = vmatprep.subr.bf16.mxu0 %v4885_v12  ;;  %4259 = vmatprep.subr.bf16.mxu1 %v5832_v14 }
 0x488   :  { %1835 = vmatmul.mubr.f32.vlgmr.msra.gmra.mrb[10].mxu0 %v2767_v3  ;;  %3434 = vmatmul.mubr.f32.vlgmr.msra.gmra.mrb[20].mxu1 %v2767_v3 }
 0x489   :  { %4230 = vmatpush1.bf16.msra.mxu0 %v4907_v22  ;;  %4261 = vmatpush3.bf16.msra.mxu1 %v4970_v51 }
 0x48a   :  { %4232 = vmatprep.subr.bf16.mxu0 %v4916_v26  ;;  %4262 = vmatprep.subr.bf16.mxu1 %v5832_v14 }
 0x48b   :  { %1975 = vmatprep.mubr.f32.mxu0 %v5833_v58  ;;  %3468 = vmatprep.mubr.msk.f32.mxu1 %vm4626_vm0, %v5833_v58 }
 0x48d   :  { %4234 = vmatpush1.bf16.msra.mxu0 %v4935_v36  ;;  %4264 = vmatpush3.bf16.msra.mxu1 %v4998_v1 }
 0x48e   :  { %4236 = vmatprep.subr.bf16.mxu0 %v4944_v39  ;;  %4265 = vmatprep.subr.bf16.mxu1 %v5832_v14 }
 0x491   :  { %4238 = vmatpush1.bf16.msra.mxu0 %v4964_v48  ;;  %4267 = vmatpush3.bf16.msra.mxu1 %v5028_v20 }
 0x492   :  { %4240 = vmatprep.subr.bf16.mxu0 %v4973_v54  ;;  %4268 = vmatprep.subr.bf16.mxu1 %v5832_v14 }
 0x495   :  { %4242 = vmatpush1.bf16.msra.mxu0 %v4992_v63  ;;  %4270 = vmatpush3.bf16.msra.mxu1 %v5056_v42 }
 0x496   :  { %4244 = vmatprep.subr.bf16.mxu0 %v5001_v2  ;;  %4271 = vmatprep.subr.bf16.mxu1 %v5832_v14 }
 0x499   :  { %4246 = vmatpush1.bf16.msra.mxu0 %v5022_v18  ;;  %4273 = vmatpush3.bf16.msra.mxu1 %v5084_v60 }
 0x49a   :  { %4248 = vmatprep.subr.bf16.mxu0 %v5031_v24  ;;  %4274 = vmatprep.subr.bf16.mxu1 %v5832_v14 }
 0x49d   :  { %4250 = vmatpush1.bf16.msra.mxu0 %v5857_v4  ;;  %4276 = vmatpush3.bf16.msra.mxu1 %v5858_v46 }
 0x49e   :  { %4252 = vmatprep.subr.bf16.mxu0 %v5859_v56  ;;  %4277 = vmatprep.subr.bf16.mxu1 %v5832_v14  ;;  %v1587_v56 = vadd.f32 %v1586_v31, %v5226_v8  ;;  %v2771_v31 = vld [vmem:[%s5785_s0 + $0x30] sm:$0xff] }
 0x4a1   :  { %4254 = vmatpush1.bf16.msra.mxu0 %v5860_v27  ;;  %4279 = vmatpush3.bf16.msra.mxu1 %v5861_v45 }
 0x4a2   :  { %4256 = vmatprep.subr.bf16.mxu0 %v5862_v17  ;;  %4280 = vmatprep.subr.bf16.mxu1 %v5832_v14 }
 0x4a5   :  { %4258 = vmatpush1.bf16.msra.mxu0 %v5863_v0  ;;  %4282 = vmatpush3.bf16.msra.mxu1 %v5864_v30 }
 0x4a6   :  { %4284 = vmatprep.subr.bf16.mxu0 %v5865_v37  ;;  %4315 = vmatprep.subr.bf16.mxu1 %v5832_v14 }
 0x53b   :  { %v1656_v55 = vpop.f32.mrb[8].mxu0  ;;  %v1727_v47 = vpop.f32.mrb[18].mxu1 }
 0x53c   :  { %v4515_v28 = vadd.f32 %v1656_v55, %v5837_v5  ;;  %v1658_v6 = vpop.f32.mrb[9].mxu0  ;;  %v3400_v57 = vpop.f32.mrb[19].mxu1  ;;  %v1745_v37 = vadd.f32 %v5224_v13, %v1727_v47  ;;  %v5873_v47 = vld [vmem:[#allocation11_spill] sm:$0xff] }
 0x53d   :  { %v4516_v3 = vadd.f32 %v1658_v6, %v5838_v19 }
 0x53e   :  { %v2764_v35 = vmul.f32 -1.442695, %v4515_v28 }
 0x53f   :  { %v2765_v17 = vmul.f32 -1.442695, %v4516_v3 }
 0x540   :  { %4582 = vpow2.f32 %v2764_v35 }
 0x541   :  { %4584 = vpow2.f32 %v2765_v17  ;;  %v5869_v17 = vld [vmem:[#allocation6_spill] sm:$0xff] }
 0x54a   :  { %v4583_v45 = vpop.eup %4582 }
 0x54b   :  { %v1735_v27 = vadd.f32 1.0, %v4583_v45  ;;  %v4585_v30 = vpop.eup %4584 }
 0x54c   :  { %v1742_v55 = vadd.f32 1.0, %v4585_v30  ;;  %v5871_v30 = vld [vmem:[#allocation7_spill] sm:$0xff] }
 0x54d   :  { %4586 = vrcp.f32 %v1735_v27 }
 0x557   :  { %v4587_v0 = vpop.eup %4586 }
 0x558   :  { %v1746_v46 = vmul.f32 %v4587_v0, %v1745_v37  ;;  %v5870_v0 = vld [vmem:[#allocation10_spill] sm:$0xff]  ;;  %v5872_v37 = vld [vmem:[#allocation8_spill] sm:$0xff] }
 0x55a   :  { %v1747_v4 = vadd.f32 %v1746_v46, %v1587_v56  ;;  %v5867_v46 = vld [vmem:[#allocation9_spill] sm:$0xff] }
 0x55b   :  { %v5868_v56 = vld [vmem:[#allocation5_spill] sm:$0xff] }
 0x55c   :  { %4588 = vtanh.f32 %v1747_v4  ;;  %v5866_v4 = vld [vmem:[#allocation4_spill] sm:$0xff] }
 0x55d   :  { %4590 = vrcp.f32 %v1742_v55  ;;  %v5874_v55 = vld [vmem:[#allocation3_spill] sm:$0xff] }
 0x566   :  { %v4589_v28 = vpop.eup %4588 }
 0x567   :  { %v1749_v57 = vsub.f32 %v5496_v40, %v4589_v28  ;;  %v4591_v6 = vpop.eup %4590 }
 0x569   :  { %v1750_v35 = vmul.f32 %v4591_v6, %v1749_v57 }
 0x56b   :  { %v1751_v3 = vadd.f32 %v4589_v28, %v1750_v35 }
 0x56d   :  { %v1756_v45 = vsub.f32 %v1751_v3, %v5496_v40 }
 0x56f   :  { %v5582_v27 = vadd.f32 %v1756_v45, %v5496_v40 }
 0x571   :  { %1976 = vmatmul.mubr.f32.vlgmr.msra.gmra.mrb[10].mxu0 %v5582_v27  ;;  %3469 = vmatmul.mubr.f32.vlgmr.msra.gmra.mrb[22].mxu1 %v5582_v27  ;;  %v1760_v13 = vmul.f32 %v5235_v49, %v5582_v27  ;;  %v1907_v49 = vpop.f32.mrb[20].mxu1 }
 0x572   :  { %4286 = vmatpush1.bf16.msra.mxu0 %v4696_v9  ;;  %4317 = vmatpush3.bf16.msra.mxu1 %v4755_v29  ;;  %v3435_v40 = vpop.f32.mrb[21].mxu1 }
 0x573   :  { %1761 = vadd.xlane.f32.xlu0 %v1760_v13  ;;  %4288 = vmatprep.subr.bf16.mxu0 %v4698_v10 }
 0x574   :  { %4318 = vmatprep.subr.bf16.mxu1 %v5832_v14  ;;  %2155 = vmatprep.mubr.f32.mxu0 %v5833_v58 }
 0x575   :  { %3503 = vmatprep.mubr.msk.f32.mxu1 %vm4626_vm0, %v5833_v58 }
 0x576   :  { %4290 = vmatpush1.bf16.msra.mxu0 %v4714_v15  ;;  %4320 = vmatpush3.bf16.msra.mxu1 %v4767_v33 }
 0x577   :  { %4292 = vmatprep.subr.bf16.mxu0 %v4717_v16  ;;  %4321 = vmatprep.subr.bf16.mxu1 %v5832_v14 }
 0x57a   :  { %4294 = vmatpush1.bf16.msra.mxu0 %v4732_v21  ;;  %4323 = vmatpush3.bf16.msra.mxu1 %v4798_v43 }
 0x57b   :  { %4296 = vmatprep.subr.bf16.mxu0 %v4738_v23  ;;  %4324 = vmatprep.subr.bf16.mxu1 %v5832_v14 }
 0x57e   :  { %4298 = vmatpush1.bf16.msra.mxu0 %v4764_v32  ;;  %4326 = vmatpush3.bf16.msra.mxu1 %v4826_v52 }
 0x57f   :  { %4300 = vmatprep.subr.bf16.mxu0 %v4770_v34  ;;  %4327 = vmatprep.subr.bf16.mxu1 %v5832_v14 }
 0x582   :  { %4302 = vmatpush1.bf16.msra.mxu0 %v4792_v41  ;;  %4329 = vmatpush3.bf16.msra.mxu1 %v4854_v61 }
 0x583   :  { %4304 = vmatprep.subr.bf16.mxu0 %v4801_v44  ;;  %4330 = vmatprep.subr.bf16.mxu1 %v5832_v14 }
 0x586   :  { %4306 = vmatpush1.bf16.msra.mxu0 %v4820_v50  ;;  %4332 = vmatpush3.bf16.msra.mxu1 %v4882_v11 }
 0x587   :  { %4308 = vmatprep.subr.bf16.mxu0 %v4829_v53  ;;  %4333 = vmatprep.subr.bf16.mxu1 %v5832_v14 }
 0x58a   :  { %4310 = vmatpush1.bf16.msra.mxu0 %v4848_v59  ;;  %4335 = vmatpush3.bf16.msra.mxu1 %v4913_v25 }
 0x58b   :  { %4312 = vmatprep.subr.bf16.mxu0 %v4857_v62  ;;  %4336 = vmatprep.subr.bf16.mxu1 %v5832_v14 }
 0x58e   :  { %4314 = vmatpush1.bf16.msra.mxu0 %v4876_v7  ;;  %4338 = vmatpush3.bf16.msra.mxu1 %v4941_v38 }
 0x58f   :  { %4340 = vmatprep.subr.bf16.mxu0 %v4885_v12  ;;  %4371 = vmatprep.subr.bf16.mxu1 %v5832_v14 }
 0x591   :  { %2156 = vmatmul.mubr.f32.vlgmr.msra.gmra.mrb[12].mxu0 %v2771_v31  ;;  %3504 = vmatmul.mubr.f32.vlgmr.msra.gmra.mrb[24].mxu1 %v2771_v31 }
 0x592   :  { %4342 = vmatpush1.bf16.msra.mxu0 %v4907_v22  ;;  %4373 = vmatpush3.bf16.msra.mxu1 %v4970_v51 }
 0x593   :  { %4344 = vmatprep.subr.bf16.mxu0 %v4916_v26  ;;  %4374 = vmatprep.subr.bf16.mxu1 %v5832_v14 }
 0x594   :  { %2296 = vmatprep.mubr.f32.mxu0 %v5833_v58  ;;  %3538 = vmatprep.mubr.msk.f32.mxu1 %vm4626_vm0, %v5833_v58 }
 0x596   :  { %4346 = vmatpush1.bf16.msra.mxu0 %v4935_v36  ;;  %4376 = vmatpush3.bf16.msra.mxu1 %v4998_v1 }
 0x597   :  { %4348 = vmatprep.subr.bf16.mxu0 %v4944_v39  ;;  %4377 = vmatprep.subr.bf16.mxu1 %v5832_v14 }
 0x59a   :  { %4350 = vmatpush1.bf16.msra.mxu0 %v4964_v48  ;;  %4379 = vmatpush3.bf16.msra.mxu1 %v5028_v20 }
 0x59b   :  { %4352 = vmatprep.subr.bf16.mxu0 %v4973_v54  ;;  %4380 = vmatprep.subr.bf16.mxu1 %v5832_v14 }
 0x59e   :  { %4354 = vmatpush1.bf16.msra.mxu0 %v4992_v63  ;;  %4382 = vmatpush3.bf16.msra.mxu1 %v5056_v42 }
 0x59f   :  { %4356 = vmatprep.subr.bf16.mxu0 %v5001_v2  ;;  %4383 = vmatprep.subr.bf16.mxu1 %v5832_v14 }
 0x5a2   :  { %4358 = vmatpush1.bf16.msra.mxu0 %v5022_v18  ;;  %4385 = vmatpush3.bf16.msra.mxu1 %v5084_v60 }
 0x5a3   :  { %4360 = vmatprep.subr.bf16.mxu0 %v5031_v24  ;;  %4386 = vmatprep.subr.bf16.mxu1 %v5832_v14 }
 0x5a6   :  { %4362 = vmatpush1.bf16.msra.mxu0 %v5866_v4  ;;  %4388 = vmatpush3.bf16.msra.mxu1 %v5867_v46 }
 0x5a7   :  { %4364 = vmatprep.subr.bf16.mxu0 %v5868_v56  ;;  %4389 = vmatprep.subr.bf16.mxu1 %v5832_v14 }
 0x5aa   :  { %4366 = vmatpush1.bf16.msra.mxu0 %v5869_v17  ;;  %4391 = vmatpush3.bf16.msra.mxu1 %v5870_v0 }
 0x5ab   :  { %4368 = vmatprep.subr.bf16.mxu0 %v5871_v30  ;;  %4392 = vmatprep.subr.bf16.mxu1 %v5832_v14 }
 0x5ae   :  { %4370 = vmatpush1.bf16.msra.mxu0 %v5872_v37  ;;  %4394 = vmatpush3.bf16.msra.mxu1 %v5873_v47 }
 0x5af   :  { %4396 = vmatprep.subr.bf16.mxu0 %v5874_v55  ;;  %4427 = vmatprep.subr.bf16.mxu1 %v5832_v14  ;;  %v5666_v55 = vld [vmem:[%s5788_s4] ss:$0 sm:$0xff] }
 0x644   :  { %v1977_v28 = vpop.f32.mrb[10].mxu0  ;;  %v2048_v57 = vpop.f32.mrb[22].mxu1 }
 0x645   :  { %v4517_v6 = vadd.f32 %v1977_v28, %v5837_v5  ;;  %v1979_v35 = vpop.f32.mrb[11].mxu0  ;;  %v3470_v3 = vpop.f32.mrb[23].mxu1  ;;  %v2066_v37 = vadd.f32 %v5666_v55, %v2048_v57 }
 0x646   :  { %v4518_v13 = vadd.f32 %v1979_v35, %v5838_v19  ;;  %v1908_v3 = vadd.f32 %v1907_v49, %v5226_v8  ;;  %v5680_v49 = vld [vmem:[%s5789_s5] ss:$0 sm:$0xff] }
 0x647   :  { %v2768_v45 = vmul.f32 -1.442695, %v4517_v6 }
 0x648   :  { %v2769_v40 = vmul.f32 -1.442695, %v4518_v13 }
 0x649   :  { %4592 = vpow2.f32 %v2768_v45 }
 0x64a   :  { %4594 = vpow2.f32 %v2769_v40 }
 0x653   :  { %v4593_v31 = vpop.eup %4592 }
 0x654   :  { %v2056_v30 = vadd.f32 1.0, %v4593_v31  ;;  %v4595_v47 = vpop.eup %4594 }
 0x655   :  { %v2063_v5 = vadd.f32 1.0, %v4595_v47 }
 0x656   :  { %4596 = vrcp.f32 %v2056_v30 }
 0x660   :  { %v4597_v28 = vpop.eup %4596 }
 0x661   :  { %v2067_v6 = vmul.f32 %v4597_v28, %v2066_v37 }
 0x663   :  { %v2068_v45 = vadd.f32 %v2067_v6, %v1908_v3 }
 0x665   :  { %4598 = vtanh.f32 %v2068_v45 }
 0x666   :  { %4600 = vrcp.f32 %v2063_v5 }
 0x66f   :  { %v4599_v35 = vpop.eup %4598 }
 0x670   :  { %v2070_v13 = vsub.f32 %v5582_v27, %v4599_v35  ;;  %v4601_v30 = vpop.eup %4600 }
 0x672   :  { %v2071_v40 = vmul.f32 %v4601_v30, %v2070_v13 }
 0x674   :  { %v2072_v31 = vadd.f32 %v4599_v35, %v2071_v40 }
 0x676   :  { %v2077_v19 = vsub.f32 %v2072_v31, %v5582_v27 }
 0x678   :  { %v5673_v0 = vadd.f32 %v2077_v19, %v5582_v27 }
 0x67a   :  { %2297 = vmatmul.mubr.f32.vlgmr.msra.gmra.mrb[12].mxu0 %v5673_v0  ;;  %3539 = vmatmul.mubr.f32.vlgmr.msra.gmra.mrb[26].mxu1 %v5673_v0  ;;  %v2081_v5 = vmul.f32 %v5680_v49, %v5673_v0 }
 0x67b   :  { %4398 = vmatpush1.bf16.msra.mxu0 %v4696_v9  ;;  %4429 = vmatpush3.bf16.msra.mxu1 %v4755_v29  ;;  %v2228_v9 = vpop.f32.mrb[24].mxu1  ;;  %v5878_v29 = vld [vmem:[#allocation11_spill] sm:$0xff] }
 0x67c   :  { %2082 = vadd.xlane.f32.xlu1 %v2081_v5  ;;  %4400 = vmatprep.subr.bf16.mxu0 %v4698_v10  ;;  %v3505_v10 = vpop.f32.mrb[25].mxu1 }
 0x67d   :  { %4430 = vmatprep.subr.bf16.mxu1 %v5832_v14  ;;  %2476 = vmatprep.mubr.f32.mxu0 %v5833_v58  ;;  %v478_v10 = vpop.xlane.xlu0 %477 }
 0x67e   :  { %3573 = vmatprep.mubr.msk.f32.mxu1 %vm4626_vm0, %v5833_v58 }
 0x67f   :  { %4402 = vmatpush1.bf16.msra.mxu0 %v4714_v15  ;;  %4432 = vmatpush3.bf16.msra.mxu1 %v4767_v33  ;;  %v2775_v15 = vld [vmem:[%s5785_s0 + $0x38] sm:$0xff] }
 0x680   :  { %4404 = vmatprep.subr.bf16.mxu0 %v4717_v16  ;;  %4433 = vmatprep.subr.bf16.mxu1 %v5832_v14  ;;  %v5875_v16 = vld [vmem:[#allocation10_spill] sm:$0xff] }
 0x683   :  { %4406 = vmatpush1.bf16.msra.mxu0 %v4732_v21  ;;  %4435 = vmatpush3.bf16.msra.mxu1 %v4798_v43  ;;  %v5876_v21 = vld [vmem:[#allocation7_spill] sm:$0xff] }
 0x684   :  { %4408 = vmatprep.subr.bf16.mxu0 %v4738_v23  ;;  %4436 = vmatprep.subr.bf16.mxu1 %v5832_v14  ;;  %v5877_v23 = vld [vmem:[#allocation8_spill] sm:$0xff] }
 0x687   :  { %4410 = vmatpush1.bf16.msra.mxu0 %v4764_v32  ;;  %4438 = vmatpush3.bf16.msra.mxu1 %v4826_v52  ;;  %v5880_v52 = vld [vmem:[#allocation13_spill] sm:$0xff] }
 0x688   :  { %4412 = vmatprep.subr.bf16.mxu0 %v4770_v34  ;;  %4439 = vmatprep.subr.bf16.mxu1 %v5832_v14  ;;  %v5879_v34 = vld [vmem:[#allocation12_spill] sm:$0xff] }
 0x68b   :  { %4414 = vmatpush1.bf16.msra.mxu0 %v4792_v41  ;;  %4441 = vmatpush3.bf16.msra.mxu1 %v4854_v61 }
 0x68c   :  { %4416 = vmatprep.subr.bf16.mxu0 %v4801_v44  ;;  %4442 = vmatprep.subr.bf16.mxu1 %v5832_v14 }
 0x68f   :  { %4418 = vmatpush1.bf16.msra.mxu0 %v4820_v50  ;;  %4444 = vmatpush3.bf16.msra.mxu1 %v4882_v11 }
 0x690   :  { %4420 = vmatprep.subr.bf16.mxu0 %v4829_v53  ;;  %4445 = vmatprep.subr.bf16.mxu1 %v5832_v14 }
 0x693   :  { %4422 = vmatpush1.bf16.msra.mxu0 %v4848_v59  ;;  %4447 = vmatpush3.bf16.msra.mxu1 %v4913_v25 }
 0x694   :  { %4424 = vmatprep.subr.bf16.mxu0 %v4857_v62  ;;  %4448 = vmatprep.subr.bf16.mxu1 %v5832_v14 }
 0x697   :  { %4426 = vmatpush1.bf16.msra.mxu0 %v4876_v7  ;;  %4450 = vmatpush3.bf16.msra.mxu1 %v4941_v38 }
 0x698   :  { %4452 = vmatprep.subr.bf16.mxu0 %v4885_v12  ;;  %4483 = vmatprep.subr.bf16.mxu1 %v5832_v14 }
 0x69a   :  { %2477 = vmatmul.mubr.f32.vlgmr.msra.gmra.mrb[14].mxu0 %v2775_v15  ;;  %3574 = vmatmul.mubr.f32.vlgmr.msra.gmra.mrb[28].mxu1 %v2775_v15 }
 0x69b   :  { %4454 = vmatpush1.bf16.msra.mxu0 %v4907_v22  ;;  %4485 = vmatpush3.bf16.msra.mxu1 %v4970_v51  ;;  %v2229_v22 = vadd.f32 %v2228_v9, %v5226_v8 }
 0x69c   :  { %4456 = vmatprep.subr.bf16.mxu0 %v4916_v26  ;;  %4486 = vmatprep.subr.bf16.mxu1 %v5832_v14 }
 0x69d   :  { %2617 = vmatprep.mubr.f32.mxu0 %v5833_v58  ;;  %3608 = vmatprep.mubr.msk.f32.mxu1 %vm4626_vm0, %v5833_v58 }
 0x69f   :  { %4458 = vmatpush1.bf16.msra.mxu0 %v4935_v36  ;;  %4488 = vmatpush3.bf16.msra.mxu1 %v4998_v1 }
 0x6a0   :  { %4460 = vmatprep.subr.bf16.mxu0 %v4944_v39  ;;  %4489 = vmatprep.subr.bf16.mxu1 %v5832_v14 }
 0x6a3   :  { %4462 = vmatpush1.bf16.msra.mxu0 %v4964_v48  ;;  %4491 = vmatpush3.bf16.msra.mxu1 %v5028_v20 }
 0x6a4   :  { %4464 = vmatprep.subr.bf16.mxu0 %v4973_v54  ;;  %4492 = vmatprep.subr.bf16.mxu1 %v5832_v14 }
 0x6a7   :  { %4466 = vmatpush1.bf16.msra.mxu0 %v4992_v63  ;;  %4494 = vmatpush3.bf16.msra.mxu1 %v5056_v42 }
 0x6a8   :  { %4468 = vmatprep.subr.bf16.mxu0 %v5001_v2  ;;  %4495 = vmatprep.subr.bf16.mxu1 %v5832_v14 }
 0x6ab   :  { %4470 = vmatpush1.bf16.msra.mxu0 %v5022_v18  ;;  %4497 = vmatpush3.bf16.msra.mxu1 %v5084_v60 }
 0x6ac   :  { %4472 = vmatprep.subr.bf16.mxu0 %v5031_v24  ;;  %4498 = vmatprep.subr.bf16.mxu1 %v5832_v14 }
 0x6af   :  { %4474 = vmatpush1.bf16.msra.mxu0 %v5866_v4  ;;  %4500 = vmatpush3.bf16.msra.mxu1 %v5867_v46 }
 0x6b0   :  { %4476 = vmatprep.subr.bf16.mxu0 %v5868_v56  ;;  %4501 = vmatprep.subr.bf16.mxu1 %v5832_v14 }
 0x6b3   :  { %4478 = vmatpush1.bf16.msra.mxu0 %v5869_v17  ;;  %4503 = vmatpush3.bf16.msra.mxu1 %v5875_v16  ;;  %v799_v16 = vpop.xlane.xlu0 %798 }
 0x6b4   :  { %4480 = vmatprep.subr.bf16.mxu0 %v5876_v21  ;;  %4504 = vmatprep.subr.bf16.mxu1 %v5832_v14  ;;  %v1120_v21 = vpop.xlane.xlu1 %1119 }
 0x6b7   :  { %4482 = vmatpush1.bf16.msra.mxu0 %v5877_v23  ;;  %4506 = vmatpush3.bf16.msra.mxu1 %v5878_v29 }
 0x74d   :  { %v2298_v32 = vpop.f32.mrb[12].mxu0  ;;  %v2369_v33 = vpop.f32.mrb[26].mxu1 }
 0x74e   :  { %v4519_v41 = vadd.f32 %v2298_v32, %v5879_v34  ;;  %v2300_v43 = vpop.f32.mrb[13].mxu0  ;;  %v3540_v44 = vpop.f32.mrb[27].mxu1  ;;  %v2387_v11 = vadd.f32 %v5666_v55, %v2369_v33 }
 0x74f   :  { %v4520_v53 = vadd.f32 %v2300_v43, %v5880_v52  ;;  %v1441_v33 = vpop.xlane.xlu1 %1440  ;;  %v1762_v44 = vpop.xlane.xlu0 %1761 }
 0x750   :  { %v2772_v50 = vmul.f32 -1.442695, %v4519_v41 }
 0x751   :  { %v2773_v59 = vmul.f32 -1.442695, %v4520_v53 }
 0x752   :  { %4602 = vpow2.f32 %v2772_v50 }
 0x753   :  { %4604 = vpow2.f32 %v2773_v59  ;;  %v2083_v59 = vpop.xlane.xlu1 %2082 }
 0x75c   :  { %v4603_v61 = vpop.eup %4602 }
 0x75d   :  { %v2377_v62 = vadd.f32 1.0, %v4603_v61  ;;  %v4605_v7 = vpop.eup %4604 }
 0x75e   :  { %v2384_v36 = vadd.f32 1.0, %v4605_v7 }
 0x75f   :  { %4606 = vrcp.f32 %v2377_v62 }
 0x769   :  { %v4607_v12 = vpop.eup %4606 }
 0x76a   :  { %v2388_v25 = vmul.f32 %v4607_v12, %v2387_v11 }
 0x76c   :  { %v2389_v26 = vadd.f32 %v2388_v25, %v2229_v22 }
 0x76d   :  { %v2549_v18 = vpop.f32.mrb[28].mxu1 }
 0x76e   :  { %4608 = vtanh.f32 %v2389_v26  ;;  %v3575_v20 = vpop.f32.mrb[29].mxu1  ;;  %v2550_v57 = vadd.f32 %v2549_v18, %v5226_v8  ;;  %v5881_v8 = vlaneseq }
 0x76f   :  { %4610 = vrcp.f32 %v2384_v36 }
 0x778   :  { %v4609_v38 = vpop.eup %4608 }
 0x779   :  { %v2391_v39 = vsub.f32 %v5673_v0, %v4609_v38  ;;  %v4611_v48 = vpop.eup %4610 }
 0x77b   :  { %v2392_v51 = vmul.f32 %v4611_v48, %v2391_v39 }
 0x77d   :  { %v2393_v54 = vadd.f32 %v4609_v38, %v2392_v51 }
 0x77f   :  { %v2398_v63 = vsub.f32 %v2393_v54, %v5673_v0 }
 0x781   :  { %v2401_v1 = vadd.f32 %v2398_v63, %v5673_v0 }
 0x783   :  { %2618 = vmatmul.mubr.f32.vlgmr.msra.gmra.mrb[14].mxu0 %v2401_v1  ;;  %3609 = vmatmul.mubr.f32.vlgmr.msra.gmra.mrb[30].mxu1 %v2401_v1  ;;  %v2402_v2 = vmul.f32 %v5680_v49, %v2401_v1 }
 0x785   :  { %2403 = vadd.xlane.f32.xlu0 %v2402_v2 }
 0x812   :  { %v2404_v11 = vpop.xlane.xlu0 %2403 }
 0x856   :  { %v2619_v24 = vpop.f32.mrb[14].mxu0  ;;  %v2690_v42 = vpop.f32.mrb[30].mxu1 }
 0x857   :  { %v4521_v60 = vadd.f32 %v2619_v24, %v5879_v34  ;;  %v2621_v14 = vpop.f32.mrb[15].mxu0  ;;  %v3610_v19 = vpop.f32.mrb[31].mxu1  ;;  %v2708_v37 = vadd.f32 %v5666_v55, %v2690_v42  ;;  %v162_v55 = vand.u32 127, %v5881_v8 }
 0x858   :  { %v4522_v4 = vadd.f32 %v2621_v14, %v5880_v52 }
 0x859   :  { %v2776_v27 = vmul.f32 -1.442695, %v4521_v60  ;;  %vm800_vm1 = vcmp.eq.s32.totalorder %v162_v55, 1  ;;  %vm479_vm2 = vcmp.eq.s32.totalorder %v162_v55, 0  ;;  %vm1121_vm3 = vcmp.eq.s32.totalorder %v162_v55, 2 }
 0x85a   :  { %v2777_v46 = vmul.f32 -1.442695, %v4522_v4  ;;  %v2754_v15 = vsel %vm800_vm1, 1.0, %v5833_v58  ;;  %vm1442_vm4 = vcmp.eq.s32.totalorder %v162_v55, 3  ;;  %v2750_v23 = vsel %vm479_vm2, 1.0, %v5833_v58 }
 0x85b   :  { %4612 = vpow2.f32 %v2776_v27  ;;  %v803_v29 = vmul.f32 %v2754_v15, %v799_v16  ;;  %vm1763_vm5 = vcmp.eq.s32.totalorder %v162_v55, 4  ;;  %v2762_v32 = vsel %vm1442_vm4, 1.0, %v5833_v58 }
 0x85c   :  { %4614 = vpow2.f32 %v2777_v46  ;;  %v482_v34 = vmul.f32 %v2750_v23, %v478_v10  ;;  %vm2084_vm6 = vcmp.eq.s32.totalorder %v162_v55, 5  ;;  %v2766_v43 = vsel %vm1763_vm5, 1.0, %v5833_v58 }
 0x85d   :  { %v1445_v52 = vmul.f32 %v2762_v32, %v1441_v33  ;;  %vm2405_vm7 = vcmp.eq.s32.totalorder %v162_v55, 6  ;;  %v2770_v53 = vsel %vm2084_vm6, 1.0, %v5833_v58  ;;  %v1766_v62 = vmul.f32 %v2766_v43, %v1762_v44 }
 0x85e   :  { %v804_v50 = vadd.f32 %v803_v29, %v482_v34  ;;  %v2774_v7 = vsel %vm2405_vm7, 1.0, %v5833_v58  ;;  %v2087_v22 = vmul.f32 %v2770_v53, %v2083_v59  ;;  %vm2726_vm8 = vcmp.eq.s32.totalorder %v162_v55, 7 }
 0x85f   :  { %v2408_v26 = vmul.f32 %v2774_v7, %v2404_v11  ;;  %v2778_v36 = vsel %vm2726_vm8, 1.0, %v5833_v58 }
 0x865   :  { %v4613_v56 = vpop.eup %4612 }
 0x866   :  { %v2698_v17 = vadd.f32 1.0, %v4613_v56  ;;  %v4615_v0 = vpop.eup %4614 }
 0x867   :  { %v2705_v6 = vadd.f32 1.0, %v4615_v0 }
 0x868   :  { %4616 = vrcp.f32 %v2698_v17 }
 0x872   :  { %v4617_v47 = vpop.eup %4616 }
 0x873   :  { %v2709_v28 = vmul.f32 %v4617_v47, %v2708_v37 }
 0x875   :  { %v2710_v3 = vadd.f32 %v2709_v28, %v2550_v57 }
 0x877   :  { %4618 = vtanh.f32 %v2710_v3 }
 0x878   :  { %4620 = vrcp.f32 %v2705_v6 }
 0x881   :  { %v4619_v45 = vpop.eup %4618 }
 0x882   :  { %v2712_v35 = vsub.f32 %v2401_v1, %v4619_v45  ;;  %v4621_v13 = vpop.eup %4620 }
 0x884   :  { %v2713_v30 = vmul.f32 %v4621_v13, %v2712_v35 }
 0x886   :  { %v2714_v40 = vadd.f32 %v4619_v45, %v2713_v30 }
 0x888   :  { %v2719_v31 = vsub.f32 %v2714_v40, %v2401_v1 }
 0x88a   :  { %v2722_v5 = vadd.f32 %v2719_v31, %v2401_v1 }
 0x88c   :  { %v2723_v9 = vmul.f32 %v5680_v49, %v2722_v5  ;;  %2737 = vst [vmem:[%s5790_s8] sm:$0xff] %v2722_v5  ;;  %v2758_v49 = vsel %vm1121_vm3, 1.0, %v5833_v58 }
 0x88d   :  { %v1124_v41 = vmul.f32 %v2758_v49, %v1120_v21 }
 0x88e   :  { %2724 = vadd.xlane.f32.xlu1 %v2723_v9 }
 0x88f   :  { %v1125_v61 = vadd.f32 %v1124_v41, %v804_v50 }
 0x891   :  { %v1446_v12 = vadd.f32 %v1445_v52, %v1125_v61 }
 0x893   :  { %v1767_v25 = vadd.f32 %v1766_v62, %v1446_v12 }
 0x895   :  { %v2088_v38 = vadd.f32 %v2087_v22, %v1767_v25 }
 0x897   :  { %v2409_v48 = vadd.f32 %v2408_v26, %v2088_v38 }
 0x91b   :  { %v2725_v39 = vpop.xlane.xlu1 %2724 }
 0x91c   :  { %v2729_v51 = vmul.f32 %v2778_v36, %v2725_v39 }
 0x91e   :  { %v2730_v54 = vadd.f32 %v2729_v51, %v2409_v48 }
 0x920   :  { %2733 = vst.msk [vmem:[%s5791_s7] sm:$0xff] %vm2732_vm9, %v2730_v54 }

</bundles_post_ra>
